<compile_context>
chip_gen: v5e
topology: v5e:2x2
jax: 0.10.0
libtpu: 0.0.40
codegen_flags: <defaults>
</compile_context>

<pallas_src>
import numpy as np

import jax
import jax.numpy as jnp
from jax.experimental import pallas as pl
from jax.experimental.pallas import tpu as pltpu


# ----------------------------------------------------------------------------
# Pallas kernel: fused conv3x3 + bias + ReLU stack (lane-dense Toeplitz form)
# ----------------------------------------------------------------------------
def _make_mask_head_kernel(H, W, chans, dilation, r_blk):
    """chans = (Cin, C1, C2, ...).  Per layer the kernel receives 3
    block-Toeplitz weights (W*Cin_l, W*Cout_l) -- one per kernel row kh --
    and a lane-tiled bias (1, W*Cout_l)."""
    n_layers = len(chans) - 1
    pad = dilation
    m = r_blk * H

    def kernel(x_ref, mtop_ref, mbot_ref, *args):
        w_refs = args[:4 * n_layers]
        o_ref = args[4 * n_layers]

        mask_top = mtop_ref[...]     # (m, 1) f32: zeros the top `pad` rows/ROI
        mask_bot = mbot_ref[...]     # (m, 1) f32: zeros the bottom `pad` rows/ROI

        # Lane-dense activation: rows = (roi, h), lanes = (w, c).
        x = x_ref[...].reshape(m, W * chans[0])
        for l in range(n_layers):
            xb = x.astype(jnp.bfloat16)                       # bf16 MXU path
            w_top = w_refs[4 * l + 0][...]
            w_ct = w_refs[4 * l + 1][...]
            w_bot = w_refs[4 * l + 2][...]
            bias = w_refs[4 * l + 3][...]                     # (1, W*cout) f32

            # kw shifts + W-boundary zeros are inside the block-Toeplitz
            # weights -> three matmuls on the SAME lane-dense LHS.
            p_ct = jnp.dot(xb, w_ct, preferred_element_type=jnp.float32)
            p_top = jnp.dot(xb, w_top, preferred_element_type=jnp.float32)
            p_bot = jnp.dot(xb, w_bot, preferred_element_type=jnp.float32)

            # kh shifts: sublane rolls of the f32 partials.  Rows rolled across
            # ROI boundaries are exactly the rows the masks zero out.
            acc = p_ct
            acc = acc + pltpu.roll(p_top, shift=pad, axis=0) * mask_top
            acc = acc + pltpu.roll(p_bot, shift=(m - pad) % m, axis=0) * mask_bot
            x = jnp.maximum(acc + bias, 0.0)                  # bias + ReLU (f32)

        o_ref[...] = x.reshape(r_blk, H, W * chans[-1]).astype(o_ref.dtype)

    return kernel


def _toeplitz_weights(w_hwio, W, dilation, dtype=jnp.bfloat16):
    """(3,3,cin,cout) HWIO conv weight -> 3 block-Toeplitz matrices (one per
    kernel row kh), shape (W*cin, W*cout):
      T_kh[wi*cin+ci, wo*cout+co] = w[kh, kw, ci, co]  iff wi == wo + (kw-1)*d.
    """
    _, _, cin, cout = w_hwio.shape
    wi = jnp.arange(W)[:, None, None]
    wo = jnp.arange(W)[None, :, None]
    kw = jnp.arange(3)[None, None, :]
    sel = (wi == wo + (kw - 1) * dilation).astype(w_hwio.dtype)     # (W, W, 3)
    mats = jnp.einsum('abk,hkio->haibo', sel, w_hwio)               # (3,W,cin,W,cout)
    mats = mats.reshape(3, W * cin, W * cout).astype(dtype)
    return [mats[k] for k in range(3)]


def _pick_r_blk(R, H, target_m=1024, max_r_blk=128):
    """ROIs per grid step.  MXU rows per step M = r_blk*H; aim for ~1024 rows
    (amortizes the ~0.35us per-step overhead), but keep >= 4 grid steps when
    enough ROIs exist so both v7x TensorCores get >= 2 pipelined steps."""
    r_blk = min(max(1, -(-target_m // H)), max_r_blk)
    if R >= 4:
        r_blk = min(r_blk, max(1, R // 4))     # >= 4 grid steps
    elif R > 1:
        r_blk = min(r_blk, -(-R // 2))         # >= 2 grid steps
    return max(1, min(r_blk, max(1, R)))


def mask_head_convs_pallas(x_nhwc, weights_hwio, biases, *, dilation=1):
    """x_nhwc: (R, H, W, Cin) f32; weights_hwio: list of (3,3,Cin_l,Cout_l);
    biases: list of (Cout_l,).  Returns NHWC (R, H, W, Cout_last) f32."""
    R, H, W, Cin = x_nhwc.shape
    chans = (Cin,) + tuple(int(w.shape[-1]) for w in weights_hwio)
    Cout = chans[-1]
    n_layers = len(chans) - 1
    pad = dilation

    r_blk = _pick_r_blk(R, H)
    R_pad = -(-R // r_blk) * r_blk
    m = r_blk * H

    # Lane-dense input view (free reshape of NHWC memory: lanes = (w, c)).
    x2d = x_nhwc.reshape(R, H, W * Cin)
    if R_pad != R:
        x2d = jnp.pad(x2d, ((0, R_pad - R), (0, 0), (0, 0)))

    # Host-built 0/1 row masks for the kh shifts, one value per (roi, h) row.
    h_idx = np.arange(H)
    mask_top = jnp.asarray(
        np.tile((h_idx >= pad).astype(np.float32), r_blk).reshape(m, 1))
    mask_bot = jnp.asarray(
        np.tile((h_idx < H - pad).astype(np.float32), r_blk).reshape(m, 1))

    operands = [x2d, mask_top, mask_bot]
    in_specs = [
        pl.BlockSpec((r_blk, H, W * Cin), lambda r: (r, 0, 0)),
        pl.BlockSpec((m, 1), lambda r: (0, 0)),
        pl.BlockSpec((m, 1), lambda r: (0, 0)),
    ]
    # Block-Toeplitz weights (bf16) + lane-tiled biases (f32); constant index
    # maps keep them resident in VMEM across all grid steps.
    # TODO(synk): pipeline_mode=pl.Buffered(1) could avoid double-buffering
    # these constant blocks if the compiler does not already detect the revisit.
    for w, b in zip(weights_hwio, biases):
        cout = int(w.shape[-1])
        for t in _toeplitz_weights(w, W, dilation):
            operands.append(t)
            in_specs.append(pl.BlockSpec(t.shape, lambda r: (0, 0)))
        b_lane = jnp.tile(b.astype(jnp.float32), W).reshape(1, W * cout)
        operands.append(b_lane)
        in_specs.append(pl.BlockSpec((1, W * cout), lambda r: (0, 0)))

    # Explicit VMEM budget (v7x has 64 MiB physical per TensorCore).
    in_tile = r_blk * H * W * Cin * 4
    out_tile = r_blk * H * W * Cout * 4
    w_bytes = sum(3 * (W * chans[l]) * (W * chans[l + 1]) * 2
                  + W * chans[l + 1] * 4 for l in range(n_layers))
    tmp_bytes = 8 * m * W * max(chans) * 4        # in-kernel partials/activations
    vmem_limit = int(min(48 * 2 ** 20,
                         max(4 * 2 ** 20,
                             2 * (in_tile + out_tile) + 2 * w_bytes + tmp_bytes)))

    kernel = _make_mask_head_kernel(H, W, chans, dilation, r_blk)
    out = pl.pallas_call(
        kernel,
        out_shape=jax.ShapeDtypeStruct((R_pad, H, W * Cout), x_nhwc.dtype),
        grid_spec=pltpu.PrefetchScalarGridSpec(
            num_scalar_prefetch=0,
            grid=(R_pad // r_blk,),
            in_specs=in_specs,
            out_specs=pl.BlockSpec((r_blk, H, W * Cout), lambda r: (r, 0, 0)),
        ),
        compiler_params=pltpu.CompilerParams(
            dimension_semantics=("parallel",),
            vmem_limit_bytes=vmem_limit),
    )(*operands)

    return out.reshape(R_pad, H, W, Cout)[:R]


# ----------------------------------------------------------------------------
# ROIAlign (legacy maskrcnn_benchmark semantics, single FPN level), matmul
# form, NHWC output.  The batch one-hot is folded into the row-interpolation
# matrix so the feature map is never replicated per ROI.
# ----------------------------------------------------------------------------
def roi_align_nhwc(features, rois, output_size, spatial_scale, sampling_ratio):
    """features: (N, C, Hf, Wf) NCHW; rois: (R, 5) = [batch_idx, x1, y1, x2, y2].
    Returns (R, out_h, out_w, C) NHWC."""
    N, C, Hf, Wf = features.shape
    out_h, out_w = output_size
    # TODO(synk): adaptive sampling (sampling_ratio <= 0) path not implemented.
    ratio = sampling_ratio
    R = rois.shape[0]
    f32 = jnp.float32

    batch_idx = rois[:, 0].astype(jnp.int32)
    sel = jax.nn.one_hot(batch_idx, N, dtype=f32)                    # (R, N)

    x1 = rois[:, 1] * spatial_scale
    y1 = rois[:, 2] * spatial_scale
    x2 = rois[:, 3] * spatial_scale
    y2 = rois[:, 4] * spatial_scale
    roi_w = jnp.maximum(x2 - x1, 1.0)
    roi_h = jnp.maximum(y2 - y1, 1.0)
    bin_w = roi_w / out_w
    bin_h = roi_h / out_h

    frac = (jnp.arange(ratio, dtype=f32) + 0.5) / ratio              # (ratio,)
    ys = (y1[:, None, None]
          + (jnp.arange(out_h, dtype=f32)[None, :, None] + frac[None, None, :])
          * bin_h[:, None, None]).reshape(R, out_h * ratio)          # (R, Sy)
    xs = (x1[:, None, None]
          + (jnp.arange(out_w, dtype=f32)[None, :, None] + frac[None, None, :])
          * bin_w[:, None, None]).reshape(R, out_w * ratio)          # (R, Sx)

    def interp_matrix(coords, size):
        # (R, S) sample coords -> (R, S, size) bilinear interpolation weights.
        valid = (coords >= -1.0) & (coords <= size)
        c = jnp.clip(coords, 0.0, size - 1)
        i0 = jnp.floor(c).astype(jnp.int32)
        i1 = jnp.minimum(i0 + 1, size - 1)
        l = c - i0.astype(f32)
        h = 1.0 - l
        grid = jnp.arange(size, dtype=jnp.int32)
        w = (h[..., None] * (i0[..., None] == grid)
             + l[..., None] * (i1[..., None] == grid))
        return w * valid[..., None]

    Iy = interp_matrix(ys, Hf)                                       # (R, Sy, Hf)
    Ix = interp_matrix(xs, Wf)                                       # (R, Sx, Wf)

    # Fold the batch selection into the row matrix (no (R,C,Hf,Wf) intermediate).
    Iy_sel = (Iy[:, :, None, :] * sel[:, None, :, None]).reshape(
        R, out_h * ratio, N * Hf)                                    # (R, Sy, N*Hf)
    feats = features.astype(f32).transpose(1, 0, 2, 3).reshape(C, N * Hf, Wf)

    tmp = jnp.einsum('rsk,ckw->rcsw', Iy_sel, feats)                 # (R, C, Sy, Wf)
    val = jnp.einsum('rcsw,rtw->rstc', tmp, Ix)                      # (R, Sy, Sx, C)
    # Mean over the ratio x ratio samples per bin (includes zeroed OOB samples,
    # matching the legacy CUDA kernel / aligned=False semantics).
    val = val.reshape(R, out_h, ratio, out_w, ratio, C).mean(axis=(2, 4))
    return val                                                       # (R, out_h, out_w, C)


# ----------------------------------------------------------------------------
# Module: MaskRCNNFPNFeatureExtractor (synthetic params, forward only)
# ----------------------------------------------------------------------------
class MaskRCNNFPNFeatureExtractor:
    def __init__(self, key, in_channels, conv_layers, resolution,
                 scales, sampling_ratio, dilation=1):
        # TODO(synk): single-level Pooler only (len(scales)==1); multi-level FPN
        # level assignment (LevelMapper) and USE_GN GroupNorm are not reproduced.
        assert len(scales) == 1
        self.resolution = resolution
        self.scale = scales[0]
        self.sampling_ratio = sampling_ratio
        self.dilation = dilation

        self.weights = []   # HWIO (3, 3, Cin, Cout)
        self.biases = []
        next_feature = in_channels
        for layer_features in conv_layers:
            key, kw_ = jax.random.split(key)
            fan_in = 3 * 3 * next_feature
            # kaiming-normal-ish deterministic init (relu gain)
            w_oihw = jax.random.normal(
                kw_, (layer_features, next_feature, 3, 3), jnp.float32
            ) * jnp.sqrt(2.0 / fan_in)
            self.weights.append(jnp.transpose(w_oihw, (2, 3, 1, 0)))
            self.biases.append(jnp.zeros((layer_features,), jnp.float32))
            next_feature = layer_features
        self.out_channels = next_feature

    def __call__(self, features_nchw, rois):
        # pooler: ROIAlign over a single FPN level, emitted directly in NHWC
        x = roi_align_nhwc(features_nchw, rois,
                           output_size=(self.resolution, self.resolution),
                           spatial_scale=self.scale,
                           sampling_ratio=self.sampling_ratio)
        # conv stack: one fused Pallas call, lane-dense NHWC
        x = mask_head_convs_pallas(x, self.weights, self.biases,
                                   dilation=self.dilation)
        # back to NCHW to match the PyTorch module's output convention
        return jnp.transpose(x, (0, 3, 1, 2))


if __name__ == "__main__":
    key = jax.random.PRNGKey(0)
    k_feat, k_params = jax.random.split(key)

    # Small synthetic config (cfg.MODEL.ROI_MASK_HEAD.*)
    in_channels = 8          # FPN channels
    conv_layers = (16, 16)   # CONV_LAYERS
    resolution = 8           # POOLER_RESOLUTION
    scales = (0.25,)         # POOLER_SCALES (single level)
    sampling_ratio = 2       # POOLER_SAMPLING_RATIO
    dilation = 1             # DILATION

    # FPN feature map (NCHW) for 2 images
    N, Hf, Wf = 2, 32, 32
    features = jax.random.normal(k_feat, (N, in_channels, Hf, Wf), jnp.float32)

    # Proposals as ROI format: [batch_idx, x1, y1, x2, y2] in image coordinates.
    rois = jnp.array([
        [0.0,  10.0,  12.0,  70.0,  60.0],
        [0.0,  30.0,  20.0, 100.0,  90.0],
        [0.0,   0.0,   0.0,  50.0,  50.0],
        [1.0,  15.0,  25.0,  95.0, 110.0],
        [1.0,  40.0,  10.0, 120.0,  80.0],
    ], dtype=jnp.float32)

    extractor = MaskRCNNFPNFeatureExtractor(
        k_params, in_channels, conv_layers, resolution,
        scales, sampling_ratio, dilation)

    fwd = jax.jit(extractor.__call__)
    out = fwd(features, rois)
    out = jax.block_until_ready(out)

    assert out.shape == (rois.shape[0], conv_layers[-1], resolution, resolution)
    assert bool(jnp.all(out >= 0.0))   # ReLU output
    print("KERNEL_OK")
</pallas_src>

<mosaic_0001>
module attributes {stable_mosaic.version = 11 : i64} {
  func.func @kernel(%arg0: i32, %arg1: memref<1x8x64xf32, #tpu.memory_space<vmem>>, %arg2: memref<8x1xf32, #tpu.memory_space<vmem>>, %arg3: memref<8x1xf32, #tpu.memory_space<vmem>>, %arg4: memref<64x128xbf16, #tpu.memory_space<vmem>>, %arg5: memref<64x128xbf16, #tpu.memory_space<vmem>>, %arg6: memref<64x128xbf16, #tpu.memory_space<vmem>>, %arg7: memref<1x128xf32, #tpu.memory_space<vmem>>, %arg8: memref<128x128xbf16, #tpu.memory_space<vmem>>, %arg9: memref<128x128xbf16, #tpu.memory_space<vmem>>, %arg10: memref<128x128xbf16, #tpu.memory_space<vmem>>, %arg11: memref<1x128xf32, #tpu.memory_space<vmem>>, %arg12: memref<1x8x128xf32, #tpu.memory_space<vmem>>) attributes {dimension_semantics = [#tpu.dimension_semantics<parallel>], iteration_bounds = array<i64: 5>, scalar_prefetch = 0 : i64, scratch_operands = 0 : i64, tpu.core_type = #tpu.core_type<tc>, window_params = [{transform_indices = @transform_0, window_bounds = array<i64: 1, 8, 64>}, {pipeline_mode = #tpu.pipeline_mode<synchronous>, transform_indices = @transform_1, window_bounds = array<i64: 8, 1>}, {pipeline_mode = #tpu.pipeline_mode<synchronous>, transform_indices = @transform_2, window_bounds = array<i64: 8, 1>}, {pipeline_mode = #tpu.pipeline_mode<synchronous>, transform_indices = @transform_3, window_bounds = array<i64: 64, 128>}, {pipeline_mode = #tpu.pipeline_mode<synchronous>, transform_indices = @transform_4, window_bounds = array<i64: 64, 128>}, {pipeline_mode = #tpu.pipeline_mode<synchronous>, transform_indices = @transform_5, window_bounds = array<i64: 64, 128>}, {pipeline_mode = #tpu.pipeline_mode<synchronous>, transform_indices = @transform_6, window_bounds = array<i64: 1, 128>}, {pipeline_mode = #tpu.pipeline_mode<synchronous>, transform_indices = @transform_7, window_bounds = array<i64: 128, 128>}, {pipeline_mode = #tpu.pipeline_mode<synchronous>, transform_indices = @transform_8, window_bounds = array<i64: 128, 128>}, {pipeline_mode = #tpu.pipeline_mode<synchronous>, transform_indices = @transform_9, window_bounds = array<i64: 128, 128>}, {pipeline_mode = #tpu.pipeline_mode<synchronous>, transform_indices = @transform_10, window_bounds = array<i64: 1, 128>}, {transform_indices = @transform_11, window_bounds = array<i64: 1, 8, 128>}]} {
    %c0 = arith.constant 0 : index
    %c0_0 = arith.constant 0 : index
    %0 = vector.load %arg2[%c0, %c0_0] : memref<8x1xf32, #tpu.memory_space<vmem>>, vector<8x1xf32>
    %c0_1 = arith.constant 0 : index
    %c0_2 = arith.constant 0 : index
    %1 = vector.load %arg3[%c0_1, %c0_2] : memref<8x1xf32, #tpu.memory_space<vmem>>, vector<8x1xf32>
    %c0_3 = arith.constant 0 : index
    %c0_4 = arith.constant 0 : index
    %c0_5 = arith.constant 0 : index
    %2 = vector.load %arg1[%c0_3, %c0_4, %c0_5] : memref<1x8x64xf32, #tpu.memory_space<vmem>>, vector<1x8x64xf32>
    %3 = vector.shape_cast %2 : vector<1x8x64xf32> to vector<8x64xf32>
    %4 = arith.truncf %3 : vector<8x64xf32> to vector<8x64xbf16>
    %c0_6 = arith.constant 0 : index
    %c0_7 = arith.constant 0 : index
    %5 = vector.load %arg4[%c0_6, %c0_7] : memref<64x128xbf16, #tpu.memory_space<vmem>>, vector<64x128xbf16>
    %c0_8 = arith.constant 0 : index
    %c0_9 = arith.constant 0 : index
    %6 = vector.load %arg5[%c0_8, %c0_9] : memref<64x128xbf16, #tpu.memory_space<vmem>>, vector<64x128xbf16>
    %c0_10 = arith.constant 0 : index
    %c0_11 = arith.constant 0 : index
    %7 = vector.load %arg6[%c0_10, %c0_11] : memref<64x128xbf16, #tpu.memory_space<vmem>>, vector<64x128xbf16>
    %c0_12 = arith.constant 0 : index
    %c0_13 = arith.constant 0 : index
    %8 = vector.load %arg7[%c0_12, %c0_13] : memref<1x128xf32, #tpu.memory_space<vmem>>, vector<1x128xf32>
    %cst = arith.constant dense<0.000000e+00> : vector<8x128xf32>
    %9 = tpu.matmul %4, %6, %cst {dimension_numbers = #tpu.dot_dimension_numbers<[1], [0], [0], [1], [0, 0, 1, 1], [], []>} : vector<8x64xbf16>, vector<64x128xbf16>, vector<8x128xf32> -> vector<8x128xf32>
    %cst_14 = arith.constant dense<0.000000e+00> : vector<8x128xf32>
    %10 = tpu.matmul %4, %5, %cst_14 {dimension_numbers = #tpu.dot_dimension_numbers<[1], [0], [0], [1], [0, 0, 1, 1], [], []>} : vector<8x64xbf16>, vector<64x128xbf16>, vector<8x128xf32> -> vector<8x128xf32>
    %cst_15 = arith.constant dense<0.000000e+00> : vector<8x128xf32>
    %11 = tpu.matmul %4, %7, %cst_15 {dimension_numbers = #tpu.dot_dimension_numbers<[1], [0], [0], [1], [0, 0, 1, 1], [], []>} : vector<8x64xbf16>, vector<64x128xbf16>, vector<8x128xf32> -> vector<8x128xf32>
    %c1_i32 = arith.constant 1 : i32
    %12 = tpu.dynamic_rotate %10 by %c1_i32 dim 0 : vector<8x128xf32>, i32 -> vector<8x128xf32>
    %13 = vector.broadcast %0 : vector<8x1xf32> to vector<8x128xf32>
    %14 = arith.mulf %12, %13 : vector<8x128xf32>
    %15 = arith.addf %9, %14 : vector<8x128xf32>
    %c7_i32 = arith.constant 7 : i32
    %16 = tpu.dynamic_rotate %11 by %c7_i32 dim 0 : vector<8x128xf32>, i32 -> vector<8x128xf32>
    %17 = vector.broadcast %1 : vector<8x1xf32> to vector<8x128xf32>
    %18 = arith.mulf %16, %17 : vector<8x128xf32>
    %19 = arith.addf %15, %18 : vector<8x128xf32>
    %20 = vector.broadcast %8 : vector<1x128xf32> to vector<8x128xf32>
    %21 = arith.addf %19, %20 : vector<8x128xf32>
    %cst_16 = arith.constant 0.000000e+00 : f32
    %22 = vector.broadcast %cst_16 : f32 to vector<8x128xf32>
    %23 = arith.maximumf %21, %22 : vector<8x128xf32>
    %24 = arith.truncf %23 : vector<8x128xf32> to vector<8x128xbf16>
    %c0_17 = arith.constant 0 : index
    %c0_18 = arith.constant 0 : index
    %25 = vector.load %arg8[%c0_17, %c0_18] : memref<128x128xbf16, #tpu.memory_space<vmem>>, vector<128x128xbf16>
    %c0_19 = arith.constant 0 : index
    %c0_20 = arith.constant 0 : index
    %26 = vector.load %arg9[%c0_19, %c0_20] : memref<128x128xbf16, #tpu.memory_space<vmem>>, vector<128x128xbf16>
    %c0_21 = arith.constant 0 : index
    %c0_22 = arith.constant 0 : index
    %27 = vector.load %arg10[%c0_21, %c0_22] : memref<128x128xbf16, #tpu.memory_space<vmem>>, vector<128x128xbf16>
    %c0_23 = arith.constant 0 : index
    %c0_24 = arith.constant 0 : index
    %28 = vector.load %arg11[%c0_23, %c0_24] : memref<1x128xf32, #tpu.memory_space<vmem>>, vector<1x128xf32>
    %cst_25 = arith.constant dense<0.000000e+00> : vector<8x128xf32>
    %29 = tpu.matmul %24, %26, %cst_25 {dimension_numbers = #tpu.dot_dimension_numbers<[1], [0], [0], [1], [0, 0, 1, 1], [], []>} : vector<8x128xbf16>, vector<128x128xbf16>, vector<8x128xf32> -> vector<8x128xf32>
    %cst_26 = arith.constant dense<0.000000e+00> : vector<8x128xf32>
    %30 = tpu.matmul %24, %25, %cst_26 {dimension_numbers = #tpu.dot_dimension_numbers<[1], [0], [0], [1], [0, 0, 1, 1], [], []>} : vector<8x128xbf16>, vector<128x128xbf16>, vector<8x128xf32> -> vector<8x128xf32>
    %cst_27 = arith.constant dense<0.000000e+00> : vector<8x128xf32>
    %31 = tpu.matmul %24, %27, %cst_27 {dimension_numbers = #tpu.dot_dimension_numbers<[1], [0], [0], [1], [0, 0, 1, 1], [], []>} : vector<8x128xbf16>, vector<128x128xbf16>, vector<8x128xf32> -> vector<8x128xf32>
    %c1_i32_28 = arith.constant 1 : i32
    %32 = tpu.dynamic_rotate %30 by %c1_i32_28 dim 0 : vector<8x128xf32>, i32 -> vector<8x128xf32>
    %33 = vector.broadcast %0 : vector<8x1xf32> to vector<8x128xf32>
    %34 = arith.mulf %32, %33 : vector<8x128xf32>
    %35 = arith.addf %29, %34 : vector<8x128xf32>
    %c7_i32_29 = arith.constant 7 : i32
    %36 = tpu.dynamic_rotate %31 by %c7_i32_29 dim 0 : vector<8x128xf32>, i32 -> vector<8x128xf32>
    %37 = vector.broadcast %1 : vector<8x1xf32> to vector<8x128xf32>
    %38 = arith.mulf %36, %37 : vector<8x128xf32>
    %39 = arith.addf %35, %38 : vector<8x128xf32>
    %40 = vector.broadcast %28 : vector<1x128xf32> to vector<8x128xf32>
    %41 = arith.addf %39, %40 : vector<8x128xf32>
    %cst_30 = arith.constant 0.000000e+00 : f32
    %42 = vector.broadcast %cst_30 : f32 to vector<8x128xf32>
    %43 = arith.maximumf %41, %42 : vector<8x128xf32>
    %44 = vector.shape_cast %43 : vector<8x128xf32> to vector<1x8x128xf32>
    %c0_31 = arith.constant 0 : index
    %c0_32 = arith.constant 0 : index
    %c0_33 = arith.constant 0 : index
    %45 = vector.load %arg12[%c0_31, %c0_32, %c0_33] : memref<1x8x128xf32, #tpu.memory_space<vmem>>, vector<1x8x128xf32>
    tpu.vector_store %arg12[%c0_31, %c0_32, %c0_33], %44 {strides = array<i32>} : memref<1x8x128xf32, #tpu.memory_space<vmem>>, vector<1x8x128xf32>,
    return
  }
  func.func @transform_0(%arg0: i32) -> (i32, i32, i32) {
    %c0_i32 = arith.constant 0 : i32
    %c0_i32_0 = arith.constant 0 : i32
    %c0_i32_1 = arith.constant 0 : i32
    return %arg0, %c0_i32, %c0_i32_0 : i32, i32, i32
  }
  func.func @transform_1(%arg0: i32) -> (i32, i32) {
    %c0_i32 = arith.constant 0 : i32
    %c0_i32_0 = arith.constant 0 : i32
    %c0_i32_1 = arith.constant 0 : i32
    return %c0_i32, %c0_i32_0 : i32, i32
  }
  func.func @transform_2(%arg0: i32) -> (i32, i32) {
    %c0_i32 = arith.constant 0 : i32
    %c0_i32_0 = arith.constant 0 : i32
    %c0_i32_1 = arith.constant 0 : i32
    return %c0_i32, %c0_i32_0 : i32, i32
  }
  func.func @transform_3(%arg0: i32) -> (i32, i32) {
    %c0_i32 = arith.constant 0 : i32
    %c0_i32_0 = arith.constant 0 : i32
    %c0_i32_1 = arith.constant 0 : i32
    return %c0_i32, %c0_i32_0 : i32, i32
  }
  func.func @transform_4(%arg0: i32) -> (i32, i32) {
    %c0_i32 = arith.constant 0 : i32
    %c0_i32_0 = arith.constant 0 : i32
    %c0_i32_1 = arith.constant 0 : i32
    return %c0_i32, %c0_i32_0 : i32, i32
  }
  func.func @transform_5(%arg0: i32) -> (i32, i32) {
    %c0_i32 = arith.constant 0 : i32
    %c0_i32_0 = arith.constant 0 : i32
    %c0_i32_1 = arith.constant 0 : i32
    return %c0_i32, %c0_i32_0 : i32, i32
  }
  func.func @transform_6(%arg0: i32) -> (i32, i32) {
    %c0_i32 = arith.constant 0 : i32
    %c0_i32_0 = arith.constant 0 : i32
    %c0_i32_1 = arith.constant 0 : i32
    return %c0_i32, %c0_i32_0 : i32, i32
  }
  func.func @transform_7(%arg0: i32) -> (i32, i32) {
    %c0_i32 = arith.constant 0 : i32
    %c0_i32_0 = arith.constant 0 : i32
    %c0_i32_1 = arith.constant 0 : i32
    return %c0_i32, %c0_i32_0 : i32, i32
  }
  func.func @transform_8(%arg0: i32) -> (i32, i32) {
    %c0_i32 = arith.constant 0 : i32
    %c0_i32_0 = arith.constant 0 : i32
    %c0_i32_1 = arith.constant 0 : i32
    return %c0_i32, %c0_i32_0 : i32, i32
  }
  func.func @transform_9(%arg0: i32) -> (i32, i32) {
    %c0_i32 = arith.constant 0 : i32
    %c0_i32_0 = arith.constant 0 : i32
    %c0_i32_1 = arith.constant 0 : i32
    return %c0_i32, %c0_i32_0 : i32, i32
  }
  func.func @transform_10(%arg0: i32) -> (i32, i32) {
    %c0_i32 = arith.constant 0 : i32
    %c0_i32_0 = arith.constant 0 : i32
    %c0_i32_1 = arith.constant 0 : i32
    return %c0_i32, %c0_i32_0 : i32, i32
  }
  func.func @transform_11(%arg0: i32) -> (i32, i32, i32) {
    %c0_i32 = arith.constant 0 : i32
    %c0_i32_0 = arith.constant 0 : i32
    %c0_i32_1 = arith.constant 0 : i32
    return %arg0, %c0_i32, %c0_i32_0 : i32, i32, i32
  }
}

</mosaic_0001>

<bundles_post_ra>
// kernel: squeeze.16
= control target key start
LH: loop header
LB: loop body
LE: loop exit
PB: predicated region body
PF: predicated region fallthrough
CT: control target
= control target key end

     0   :  { %vm964_vm0 = vcmask 1047556   ;;  %s2095_s11 = smov 112   ;;  %s2098_s14 = smov 64   ;;  %vm966_vm1 = vcmask 130048   ;;  %vm1039_vm2 = vcmask 1048448   ;;  %vm1126_vm3 = vcmask 917248   ;;  %s2376_s0 = inlined_call_operand.vmem [shape: bf16[1,8,8,8,16], index: 0, kind: input, shape index: {}]   ;;  %s2377_s1 = inlined_call_operand.vmem [shape: bf16[64,128], index: 1, kind: output, shape index: {}]  }
   0x1   :  { %v1926_v0 = vld [vmem:[%s2376_s0 + $0x98] sm:$0xff]   ;;  %v1927_v1 = vld [vmem:[%s2376_s0 + $0x90] sm:$0xff]   ;;  %v1928_v2 = vld [vmem:[%s2376_s0 + $0x88] sm:$0xff]   ;;  %s2099_s15 = smov 48   ;;  %s2100_s16 = smov 32   ;;  %vm1213_vm4 = vcmask 786048  }
   0x2   :  { %v1816_v3 = vunpack.c.l.bf16 %v1926_v0  ;;  %v1817_v4 = vunpack.c.h.bf16 %v1926_v0  ;;  %v1821_v5 = vunpack.c.h.bf16 %v1927_v1  ;;  %v1820_v6 = vunpack.c.l.bf16 %v1927_v1  ;;  %v1929_v7 = vld [vmem:[%s2376_s0 + $0x80] sm:$0xff]   ;;  %v1942_v10 = vld [vmem:[%s2376_s0 + $0x18] sm:$0xff]   ;;  %v1943_v13 = vld [vmem:[%s2376_s0 + $0x10] sm:$0xff]   ;;  %s2101_s17 = smov 16  }
   0x3   :  { %v1825_v8 = vunpack.c.h.bf16 %v1928_v2  ;;  %v1824_v9 = vunpack.c.l.bf16 %v1928_v2  ;;  %v1829_v11 = vunpack.c.h.bf16 %v1929_v7  ;;  %v1828_v12 = vunpack.c.l.bf16 %v1929_v7  ;;  %v1944_v16 = vld [vmem:[%s2376_s0 + $0x8] sm:$0xff]   ;;  %v1891_v19 = vld [vmem:[%s2376_s0] sm:$0xff]   ;;  %v1918_v22 = vld [vmem:[%s2376_s0 + $0xd8] sm:$0xff]  }
   0x4   :  { %378 = vst [vmem:[#allocation1 + $0x138] sm:$0xff] %v1817_v4  ;;  %v1881_v14 = vunpack.c.h.bf16 %v1942_v10  ;;  %v1880_v15 = vunpack.c.l.bf16 %v1942_v10  ;;  %v1885_v17 = vunpack.c.h.bf16 %v1943_v13  ;;  %v1884_v18 = vunpack.c.l.bf16 %v1943_v13  ;;  %v1919_v25 = vld [vmem:[%s2376_s0 + $0xd0] sm:$0xff]   ;;  %v1920_v28 = vld [vmem:[%s2376_s0 + $0xc8] sm:$0xff]   ;;  %v1921_v31 = vld [vmem:[%s2376_s0 + $0xc0] sm:$0xff]  }
   0x5   :  { %393 = vst [vmem:[#allocation1 + $0x130] sm:$0xff] %v1816_v3  ;;  %v1889_v20 = vunpack.c.h.bf16 %v1944_v16  ;;  %v1888_v21 = vunpack.c.l.bf16 %v1944_v16  ;;  %v1893_v23 = vunpack.c.h.bf16 %v1891_v19  ;;  %v1892_v24 = vunpack.c.l.bf16 %v1891_v19  ;;  %v1934_v35 = vld [vmem:[%s2376_s0 + $0x58] sm:$0xff]   ;;  %v1935_v39 = vld [vmem:[%s2376_s0 + $0x50] sm:$0xff]   ;;  %v1936_v44 = vld [vmem:[%s2376_s0 + $0x48] sm:$0xff]  }
   0x6   :  { %408 = vst [vmem:[#allocation1 + $0x128] sm:$0xff] %v1821_v5  ;;  %v1785_v26 = vunpack.c.h.bf16 %v1918_v22  ;;  %v1784_v27 = vunpack.c.l.bf16 %v1918_v22  ;;  %v1789_v29 = vunpack.c.h.bf16 %v1919_v25  ;;  %v1788_v30 = vunpack.c.l.bf16 %v1919_v25  ;;  %v1937_v49 = vld [vmem:[%s2376_s0 + $0x40] sm:$0xff]   ;;  %v1922_v53 = vld [vmem:[%s2376_s0 + $0xb8] sm:$0xff]   ;;  %v1923_v56 = vld [vmem:[%s2376_s0 + $0xb0] sm:$0xff]  }
   0x7   :  { %423 = vst [vmem:[#allocation1 + $0x120] sm:$0xff] %v1820_v6  ;;  %v1793_v32 = vunpack.c.h.bf16 %v1920_v28  ;;  %v1792_v34 = vunpack.c.l.bf16 %v1920_v28  ;;  %v1797_v37 = vunpack.c.h.bf16 %v1921_v31  ;;  %v1796_v38 = vunpack.c.l.bf16 %v1921_v31  ;;  %v1924_v59 = vld [vmem:[%s2376_s0 + $0xa8] sm:$0xff]   ;;  %v1925_v62 = vld [vmem:[%s2376_s0 + $0xa0] sm:$0xff]   ;;  %v1938_v2 = vld [vmem:[%s2376_s0 + $0x38] sm:$0xff]  }
   0x8   :  { %438 = vst [vmem:[#allocation1 + $0x118] sm:$0xff] %v1825_v8  ;;  %v1849_v41 = vunpack.c.h.bf16 %v1934_v35  ;;  %v1848_v43 = vunpack.c.l.bf16 %v1934_v35  ;;  %v1853_v46 = vunpack.c.h.bf16 %v1935_v39  ;;  %v1852_v48 = vunpack.c.l.bf16 %v1935_v39  ;;  %v1939_v6 = vld [vmem:[%s2376_s0 + $0x30] sm:$0xff]   ;;  %v1941_v16 = vld [vmem:[%s2376_s0 + $0x20] sm:$0xff]  }
   0x9   :  { %453 = vst [vmem:[#allocation1 + $0x110] sm:$0xff] %v1824_v9  ;;  %v1857_v51 = vunpack.c.h.bf16 %v1936_v44  ;;  %v1856_v52 = vunpack.c.l.bf16 %v1936_v44  ;;  %v1861_v54 = vunpack.c.h.bf16 %v1937_v49  ;;  %v1860_v55 = vunpack.c.l.bf16 %v1937_v49  ;;  %v1933_v49 = vld [vmem:[%s2376_s0 + $0x60] sm:$0xff]  }
   0xa   :  { %468 = vst [vmem:[#allocation1 + $0x108] sm:$0xff] %v1829_v11  ;;  %v1801_v57 = vunpack.c.h.bf16 %v1922_v53  ;;  %v1800_v58 = vunpack.c.l.bf16 %v1922_v53  ;;  %v1805_v60 = vunpack.c.h.bf16 %v1923_v56  ;;  %v1804_v61 = vunpack.c.l.bf16 %v1923_v56  ;;  %v1940_v11 = vld [vmem:[%s2376_s0 + $0x28] sm:$0xff]  }
   0xb   :  { %483 = vst [vmem:[#allocation1 + $0x100] sm:$0xff] %v1828_v12  ;;  %v1809_v63 = vunpack.c.h.bf16 %v1924_v59  ;;  %v1808_v1 = vunpack.c.l.bf16 %v1924_v59  ;;  %v1813_v4 = vunpack.c.h.bf16 %v1925_v62  ;;  %v1812_v5 = vunpack.c.l.bf16 %v1925_v62 }
   0xc   :  { %858 = vst [vmem:[#allocation1 + $0x38] sm:$0xff] %v1881_v14  ;;  %v1865_v8 = vunpack.c.h.bf16 %v1938_v2  ;;  %v1864_v10 = vunpack.c.l.bf16 %v1938_v2  ;;  %v1869_v13 = vunpack.c.h.bf16 %v1939_v6  ;;  %v1872_v19 = vunpack.c.l.bf16 %v1940_v11 }
   0xd   :  { %873 = vst [vmem:[#allocation1 + $0x30] sm:$0xff] %v1880_v15  ;;  %v1868_v15 = vunpack.c.l.bf16 %v1939_v6  ;;  %v1876_v22 = vunpack.c.l.bf16 %v1941_v16  ;;  %v1844_v56 = vunpack.c.l.bf16 %v1933_v49  ;;  %vm1300_vm5 = vcmask 654848  }
   0xe   :  { %888 = vst [vmem:[#allocation1 + $0x28] sm:$0xff] %v1885_v17  ;;  %v1044_v33 = vld [vmem:[#allocation1 + $0x107] ss:$8 sm:$0xf0]   ;;  %vm1387_vm6 = vcmask 523648   ;;  %vm1474_vm7 = vcmask 392448  }
   0xf   :  { %903 = vst [vmem:[#allocation1 + $0x20] sm:$0xff] %v1884_v18  ;;  %v1873_v18 = vunpack.c.h.bf16 %v1940_v11  ;;  %vm1561_vm8 = vcmask 261248  }
  0x10   :  { %918 = vst [vmem:[#allocation1 + $0x18] sm:$0xff] %v1889_v20  ;;  %v1914_v20 = vld [vmem:[%s2376_s0 + $0xf8] sm:$0xff]  }
  0x11   :  { %933 = vst [vmem:[#allocation1 + $0x10] sm:$0xff] %v1888_v21  ;;  %v1877_v21 = vunpack.c.h.bf16 %v1941_v16  ;;  %v1768_v25 = vunpack.c.l.bf16 %v1914_v20 }
  0x12   :  { %948 = vst [vmem:[#allocation1 + $0x8] sm:$0xff] %v1893_v23  ;;  %v1042_v36 = vld [vmem:[#allocation1 + $0x107] ss:$8 sm:$0xf]  }
  0x13   :  { %961 = vst [vmem:[#allocation1] sm:$0xff] %v1892_v24  ;;  %v1046_v42 = vsel %vm964_vm0, %v1044_v33, %v1042_v36  ;;  %v1915_v23 = vld [vmem:[%s2376_s0 + $0xf0] sm:$0xff]   ;;  %v1769_v24 = vunpack.c.h.bf16 %v1914_v20  ;;  %v1930_v33 = vld [vmem:[%s2376_s0 + $0x78] sm:$0xff]  }
  0x14   :  { %138 = vst [vmem:[#allocation1 + $0x1b8] sm:$0xff] %v1785_v26  ;;  %v1916_v26 = vld [vmem:[%s2376_s0 + $0xe8] sm:$0xff]   ;;  %v1772_v28 = vunpack.c.l.bf16 %v1915_v23  ;;  %v1833_v39 = vunpack.c.h.bf16 %v1930_v33 }
  0x15   :  { %153 = vst [vmem:[#allocation1 + $0x1b0] sm:$0xff] %v1784_v27  ;;  %v1773_v27 = vunpack.c.h.bf16 %v1915_v23  ;;  %v1303_v20 = vld [vmem:[#allocation1 + $0x104] ss:$8 sm:$0xf]  }
  0x16   :  { %168 = vst [vmem:[#allocation1 + $0x1a8] sm:$0xff] %v1789_v29  ;;  %v1034_v40 = vld [vmem:[#allocation1 + $0x7] ss:$8 sm:$0xf0]  }
  0x17   :  { %183 = vst [vmem:[#allocation1 + $0x1a0] sm:$0xff] %v1788_v30  ;;  %v1917_v29 = vld [vmem:[%s2376_s0 + $0xe0] sm:$0xff]   ;;  %v1777_v30 = vunpack.c.h.bf16 %v1916_v26 }
  0x18   :  { %198 = vst [vmem:[#allocation1 + $0x198] sm:$0xff] %v1793_v32  ;;  %v1776_v32 = vunpack.c.l.bf16 %v1916_v26  ;;  %v1781_v35 = vunpack.c.h.bf16 %v1917_v29  ;;  %v1780_v36 = vunpack.c.l.bf16 %v1917_v29  ;;  %v1305_v23 = vld [vmem:[#allocation1 + $0x104] ss:$8 sm:$0xf0]  }
  0x19   :  { %213 = vst [vmem:[#allocation1 + $0x190] sm:$0xff] %v1792_v34 }
  0x1a   :  { %v1032_v45 = vld [vmem:[#allocation1 + $0x7] ss:$8 sm:$0xf]   ;;  %228 = vst [vmem:[#allocation1 + $0x188] sm:$0xff] %v1797_v37 }
  0x1b   :  { %v1036_v47 = vsel %vm964_vm0, %v1034_v40, %v1032_v45  ;;  %243 = vst [vmem:[#allocation1 + $0x180] sm:$0xff] %v1796_v38  ;;  %v1931_v37 = vld [vmem:[%s2376_s0 + $0x70] sm:$0xff]  }
  0x1c   :  { %v1955_v50 = vpack.i.bf16 %v1046_v42, %v1036_v47  ;;  %618 = vst [vmem:[#allocation1 + $0xb8] sm:$0xff] %v1849_v41  ;;  %v1832_v41 = vunpack.c.l.bf16 %v1930_v33  ;;  %v1932_v42 = vld [vmem:[%s2376_s0 + $0x68] sm:$0xff]   ;;  %v1837_v44 = vunpack.c.h.bf16 %v1931_v37  ;;  %s2096_s0 = smov 96  }
  0x1d   :  { %633 = vst [vmem:[#allocation1 + $0xb0] sm:$0xff] %v1848_v43 }
  0x1e   :  { %1956 = vrot.lane.b32.xlu0 %v1955_v50, %s2095_s11  ;;  %648 = vst [vmem:[#allocation1 + $0xa8] sm:$0xff] %v1853_v46  ;;  %v1088_v0 = vld [vmem:[#allocation1 + $0x187] ss:$8 sm:$0xf0]  }
  0x1f   :  { %663 = vst [vmem:[#allocation1 + $0xa0] sm:$0xff] %v1852_v48  ;;  %v1836_v48 = vunpack.c.l.bf16 %v1931_v37  ;;  %v1175_v53 = vld [vmem:[#allocation1 + $0x186] ss:$8 sm:$0xf0]  }
  0x20   :  { %678 = vst [vmem:[#allocation1 + $0x98] sm:$0xff] %v1857_v51 }
  0x21   :  { %693 = vst [vmem:[#allocation1 + $0x90] sm:$0xff] %v1856_v52  ;;  %v1841_v52 = vunpack.c.h.bf16 %v1932_v42 }
  0x22   :  { %708 = vst [vmem:[#allocation1 + $0x88] sm:$0xff] %v1861_v54  ;;  %v1086_v3 = vld [vmem:[#allocation1 + $0x187] ss:$8 sm:$0xf]   ;;  %v1840_v54 = vunpack.c.l.bf16 %v1932_v42 }
  0x23   :  { %723 = vst [vmem:[#allocation1 + $0x80] sm:$0xff] %v1860_v55  ;;  %v1090_v9 = vsel %vm964_vm0, %v1088_v0, %v1086_v3  ;;  %v1173_v50 = vld [vmem:[#allocation1 + $0x186] ss:$8 sm:$0xf]   ;;  %v1845_v55 = vunpack.c.h.bf16 %v1933_v49 }
  0x24   :  { %258 = vst [vmem:[#allocation1 + $0x178] sm:$0xff] %v1801_v57  ;;  %v1119_v0 = vld [vmem:[#allocation1 + $0x6] ss:$8 sm:$0xf]  }
  0x25   :  { %273 = vst [vmem:[#allocation1 + $0x170] sm:$0xff] %v1800_v58  ;;  %v1177_v58 = vsel %vm964_vm0, %v1175_v53, %v1173_v50  ;;  %v1129_v3 = vld [vmem:[#allocation1 + $0x106] ss:$8 sm:$0xf]  }
  0x26   :  { %288 = vst [vmem:[#allocation1 + $0x168] sm:$0xff] %v1805_v60  ;;  %v1077_v7 = vld [vmem:[#allocation1 + $0x87] ss:$8 sm:$0xf0]  }
  0x27   :  { %303 = vst [vmem:[#allocation1 + $0x160] sm:$0xff] %v1804_v61  ;;  %v1164_v46 = vld [vmem:[#allocation1 + $0x86] ss:$8 sm:$0xf0]  }
  0x28   :  { %318 = vst [vmem:[#allocation1 + $0x158] sm:$0xff] %v1809_v63 }
  0x29   :  { %333 = vst [vmem:[#allocation1 + $0x150] sm:$0xff] %v1808_v1  ;;  %v1121_v1 = vld [vmem:[#allocation1 + $0x6] ss:$8 sm:$0xf0]  }
  0x2a   :  { %v1075_v12 = vld [vmem:[#allocation1 + $0x87] ss:$8 sm:$0xf]   ;;  %348 = vst [vmem:[#allocation1 + $0x148] sm:$0xff] %v1813_v4  ;;  %v1123_v2 = vsel %vm964_vm0, %v1121_v1, %v1119_v0 }
  0x2b   :  { %v1079_v14 = vsel %vm964_vm0, %v1077_v7, %v1075_v12  ;;  %363 = vst [vmem:[#allocation1 + $0x140] sm:$0xff] %v1812_v5  ;;  %v1162_v45 = vld [vmem:[#allocation1 + $0x86] ss:$8 sm:$0xf]  }
  0x2c   :  { %v1965_v17 = vpack.i.bf16 %v1090_v9, %v1079_v14  ;;  %738 = vst [vmem:[#allocation1 + $0x78] sm:$0xff] %v1865_v8  ;;  %v1166_v57 = vsel %vm964_vm0, %v1164_v46, %v1162_v45  ;;  %v1131_v4 = vld [vmem:[#allocation1 + $0x106] ss:$8 sm:$0xf0]  }
  0x2d   :  { %753 = vst [vmem:[#allocation1 + $0x70] sm:$0xff] %v1864_v10  ;;  %v1985_v59 = vpack.i.bf16 %v1177_v58, %v1166_v57  ;;  %v1133_v7 = vsel %vm964_vm0, %v1131_v4, %v1129_v3  ;;  %v1249_v37 = vld [vmem:[#allocation1 + $0x85] ss:$8 sm:$0xf]  }
  0x2e   :  { %1966 = vrot.lane.b32.xlu1 %v1965_v17, %s2095_s11  ;;  %768 = vst [vmem:[#allocation1 + $0x68] sm:$0xff] %v1869_v13  ;;  %v1066_v31 = vld [vmem:[#allocation1 + $0x147] ss:$8 sm:$0xf0]   ;;  %v1975_v10 = vpack.i.bf16 %v1133_v7, %v1123_v2 }
  0x2f   :  { %783 = vst [vmem:[#allocation1 + $0x60] sm:$0xff] %v1868_v15  ;;  %v1240_v62 = vld [vmem:[#allocation1 + $0x145] ss:$8 sm:$0xf0]  }
  0x30   :  { %798 = vst [vmem:[#allocation1 + $0x58] sm:$0xff] %v1873_v18  ;;  %1976 = vrot.lane.b32.xlu2 %v1975_v10, %s2096_s0  ;;  %v1293_v18 = vld [vmem:[#allocation1 + $0x4] ss:$8 sm:$0xf]  }
  0x31   :  { %813 = vst [vmem:[#allocation1 + $0x50] sm:$0xff] %v1872_v19  ;;  %v1295_v19 = vld [vmem:[#allocation1 + $0x4] ss:$8 sm:$0xf0]  }
  0x32   :  { %828 = vst [vmem:[#allocation1 + $0x48] sm:$0xff] %v1877_v21  ;;  %v1064_v34 = vld [vmem:[#allocation1 + $0x147] ss:$8 sm:$0xf]   ;;  %v1297_v33 = vsel %vm964_vm0, %v1295_v19, %v1293_v18 }
  0x33   :  { %843 = vst [vmem:[#allocation1 + $0x40] sm:$0xff] %v1876_v22  ;;  %v1068_v40 = vsel %vm964_vm0, %v1066_v31, %v1064_v34  ;;  %v1238_v61 = vld [vmem:[#allocation1 + $0x145] ss:$8 sm:$0xf]   ;;  %v1307_v34 = vsel %vm964_vm0, %v1305_v23, %v1303_v20 }
  0x34   :  { %18 = vst [vmem:[#allocation1 + $0x1f8] sm:$0xff] %v1769_v24  ;;  %v1242_v9 = vsel %vm964_vm0, %v1240_v62, %v1238_v61  ;;  %v1153_v29 = vld [vmem:[#allocation1 + $0x146] ss:$8 sm:$0xf0]  }
  0x35   :  { %33 = vst [vmem:[#allocation1 + $0x1f0] sm:$0xff] %v1768_v25  ;;  %v1208_v45 = vld [vmem:[#allocation1 + $0x5] ss:$8 sm:$0xf0]  }
  0x36   :  { %48 = vst [vmem:[#allocation1 + $0x1e8] sm:$0xff] %v1773_v27  ;;  %v1055_v38 = vld [vmem:[#allocation1 + $0x47] ss:$8 sm:$0xf0]  }
  0x37   :  { %63 = vst [vmem:[#allocation1 + $0x1e0] sm:$0xff] %v1772_v28  ;;  %v1229_v60 = vld [vmem:[#allocation1 + $0x45] ss:$8 sm:$0xf0]  }
  0x38   :  { %78 = vst [vmem:[#allocation1 + $0x1d8] sm:$0xff] %v1777_v30  ;;  %v1142_v26 = vld [vmem:[#allocation1 + $0x46] ss:$8 sm:$0xf0]  }
  0x39   :  { %93 = vst [vmem:[#allocation1 + $0x1d0] sm:$0xff] %v1776_v32  ;;  %v1151_v28 = vld [vmem:[#allocation1 + $0x146] ss:$8 sm:$0xf]  }
  0x3a   :  { %v1053_v43 = vld [vmem:[#allocation1 + $0x47] ss:$8 sm:$0xf]   ;;  %108 = vst [vmem:[#allocation1 + $0x1c8] sm:$0xff] %v1781_v35  ;;  %v1155_v31 = vsel %vm964_vm0, %v1153_v29, %v1151_v28 }
  0x3b   :  { %v1057_v47 = vsel %vm964_vm0, %v1055_v38, %v1053_v43  ;;  %123 = vst [vmem:[#allocation1 + $0x1c0] sm:$0xff] %v1780_v36  ;;  %v1227_v63 = vld [vmem:[#allocation1 + $0x45] ss:$8 sm:$0xf]  }
  0x3c   :  { %v1960_v51 = vpack.i.bf16 %v1068_v40, %v1057_v47  ;;  %498 = vst [vmem:[#allocation1 + $0xf8] sm:$0xff] %v1833_v39  ;;  %v1231_v8 = vsel %vm964_vm0, %v1229_v60, %v1227_v63  ;;  %v1140_v25 = vld [vmem:[#allocation1 + $0x46] ss:$8 sm:$0xf]  }
  0x3d   :  { %513 = vst [vmem:[#allocation1 + $0xf0] sm:$0xff] %v1832_v41  ;;  %v2000_v17 = vpack.i.bf16 %v1242_v9, %v1231_v8  ;;  %v1144_v27 = vsel %vm964_vm0, %v1142_v26, %v1140_v25  ;;  %v1251_v38 = vld [vmem:[#allocation1 + $0x85] ss:$8 sm:$0xf0]   ;;  %v2015_v41 = vpack.i.bf16 %v1307_v34, %v1297_v33 }
  0x3e   :  { %1961 = vrot.lane.b32.xlu0 %v1960_v51, %s2095_s11  ;;  %528 = vst [vmem:[#allocation1 + $0xe8] sm:$0xff] %v1837_v44  ;;  %v1110_v6 = vld [vmem:[#allocation1 + $0x1c7] ss:$8 sm:$0xf0]   ;;  %v1980_v35 = vpack.i.bf16 %v1155_v31, %v1144_v27  ;;  %v1253_v53 = vsel %vm964_vm0, %v1251_v38, %v1249_v37 }
  0x3f   :  { %543 = vst [vmem:[#allocation1 + $0xe0] sm:$0xff] %v1836_v48  ;;  %v1197_v14 = vld [vmem:[#allocation1 + $0x1c6] ss:$8 sm:$0xf0]  }
  0x40   :  { %558 = vst [vmem:[#allocation1 + $0xd8] sm:$0xff] %v1841_v52  ;;  %1981 = vrot.lane.b32.xlu2 %v1980_v35, %s2096_s0  ;;  %v1260_v39 = vld [vmem:[#allocation1 + $0x185] ss:$8 sm:$0xf]  }
  0x41   :  { %573 = vst [vmem:[#allocation1 + $0xd0] sm:$0xff] %v1840_v54  ;;  %v1262_v40 = vld [vmem:[#allocation1 + $0x185] ss:$8 sm:$0xf0]  }
  0x42   :  { %588 = vst [vmem:[#allocation1 + $0xc8] sm:$0xff] %v1845_v55  ;;  %v1108_v5 = vld [vmem:[#allocation1 + $0x1c7] ss:$8 sm:$0xf]   ;;  %v1264_v54 = vsel %vm964_vm0, %v1262_v40, %v1260_v39 }
  0x43   :  { %603 = vst [vmem:[#allocation1 + $0xc0] sm:$0xff] %v1844_v56  ;;  %v1112_v12 = vsel %vm964_vm0, %v1110_v6, %v1108_v5  ;;  %v1195_v13 = vld [vmem:[#allocation1 + $0x1c6] ss:$8 sm:$0xf]   ;;  %v2005_v57 = vpack.i.bf16 %v1264_v54, %v1253_v53 }
  0x44   :  { %v1199_v30 = vsel %vm964_vm0, %v1197_v14, %v1195_v13  ;;  %v1206_v44 = vld [vmem:[#allocation1 + $0x5] ss:$8 sm:$0xf]   ;;  %v1369_v49 = vld [vmem:[#allocation1 + $0x1c4] ss:$8 sm:$0xf]  }
  0x45   :  { %v1210_v46 = vsel %vm964_vm0, %v1208_v45, %v1206_v44  ;;  %v1216_v47 = vld [vmem:[#allocation1 + $0x105] ss:$8 sm:$0xf]   ;;  %v1371_v50 = vld [vmem:[#allocation1 + $0x1c4] ss:$8 sm:$0xf0]  }
  0x46   :  { %1986 = vrot.lane.b32.xlu0 %v1985_v59, %s2096_s0  ;;  %v1099_v11 = vld [vmem:[#allocation1 + $0xc7] ss:$8 sm:$0xf0]   ;;  %v1186_v16 = vld [vmem:[#allocation1 + $0xc6] ss:$8 sm:$0xf0]   ;;  %v1373_v56 = vsel %vm964_vm0, %v1371_v50, %v1369_v49 }
  0x47   :  { %v1360_v43 = vld [vmem:[#allocation1 + $0xc4] ss:$8 sm:$0xf0]   ;;  %v1218_v48 = vld [vmem:[#allocation1 + $0x105] ss:$8 sm:$0xf0]  }
  0x48   :  { %v1220_v51 = vsel %vm964_vm0, %v1218_v48, %v1216_v47  ;;  %v1314_v58 = vld [vmem:[#allocation1 + $0x44] ss:$8 sm:$0xf]   ;;  %v1423_v63 = vld [vmem:[#allocation1 + $0x83] ss:$8 sm:$0xf]  }
  0x49   :  { %v1995_v52 = vpack.i.bf16 %v1220_v51, %v1210_v46  ;;  %v1316_v59 = vld [vmem:[#allocation1 + $0x44] ss:$8 sm:$0xf0]   ;;  %v1425_v0 = vld [vmem:[#allocation1 + $0x83] ss:$8 sm:$0xf0]  }
  0x4a   :  { %v1097_v15 = vld [vmem:[#allocation1 + $0xc7] ss:$8 sm:$0xf]   ;;  %v1184_v22 = vld [vmem:[#allocation1 + $0xc6] ss:$8 sm:$0xf]   ;;  %v1318_v10 = vsel %vm964_vm0, %v1316_v59, %v1314_v58 }
  0x4b   :  { %v1101_v21 = vsel %vm964_vm0, %v1099_v11, %v1097_v15  ;;  %v1188_v32 = vsel %vm964_vm0, %v1186_v16, %v1184_v22  ;;  %v1358_v42 = vld [vmem:[#allocation1 + $0xc4] ss:$8 sm:$0xf]   ;;  %v1271_v1 = vld [vmem:[#allocation1 + $0xc5] ss:$8 sm:$0xf]  }
  0x4c   :  { %v1970_v24 = vpack.i.bf16 %v1112_v12, %v1101_v21  ;;  %v1990_v36 = vpack.i.bf16 %v1199_v30, %v1188_v32  ;;  %v1362_v55 = vsel %vm964_vm0, %v1360_v43, %v1358_v42  ;;  %v1325_v60 = vld [vmem:[#allocation1 + $0x144] ss:$8 sm:$0xf]   ;;  %v1273_v2 = vld [vmem:[#allocation1 + $0xc5] ss:$8 sm:$0xf0]   ;;  %v1427_v12 = vsel %vm964_vm0, %v1425_v0, %v1423_v63 }
  0x4d   :  { %v1327_v61 = vld [vmem:[#allocation1 + $0x144] ss:$8 sm:$0xf0]   ;;  %v2030_v62 = vpack.i.bf16 %v1373_v56, %v1362_v55  ;;  %v1275_v3 = vsel %vm964_vm0, %v1273_v2, %v1271_v1  ;;  %v1282_v4 = vld [vmem:[#allocation1 + $0x1c5] ss:$8 sm:$0xf]  }
  0x4e   :  { %1971 = vrot.lane.b32.xlu1 %v1970_v24, %s2095_s11  ;;  %s2097_s11 = smov 80   ;;  %v1284_v5 = vld [vmem:[#allocation1 + $0x1c5] ss:$8 sm:$0xf0]   ;;  %v1329_v11 = vsel %vm964_vm0, %v1327_v61, %v1325_v60 }
  0x4f   :  { %2001 = vrot.lane.b32.xlu0 %v2000_v17, %s2097_s11  ;;  %1996 = vrot.lane.b32.xlu2 %v1995_v52, %s2097_s11  ;;  %v1434_v6 = vld [vmem:[#allocation1 + $0x183] ss:$8 sm:$0xf]   ;;  %v1286_v8 = vsel %vm964_vm0, %v1284_v5, %v1282_v4  ;;  %v1336_v14 = vld [vmem:[#allocation1 + $0x84] ss:$8 sm:$0xf]   ;;  %v2020_v18 = vpack.i.bf16 %v1329_v11, %v1318_v10 }
  0x50   :  { %v1436_v7 = vld [vmem:[#allocation1 + $0x183] ss:$8 sm:$0xf0]   ;;  %v2010_v9 = vpack.i.bf16 %v1286_v8, %v1275_v3  ;;  %v1338_v15 = vld [vmem:[#allocation1 + $0x84] ss:$8 sm:$0xf0]  }
  0x51   :  { %v1438_v13 = vsel %vm964_vm0, %v1436_v7, %v1434_v6  ;;  %v1347_v16 = vld [vmem:[#allocation1 + $0x184] ss:$8 sm:$0xf]   ;;  %v1380_v19 = vld [vmem:[#allocation1 + $0x3] ss:$8 sm:$0xf]   ;;  %v1340_v24 = vsel %vm964_vm0, %v1338_v15, %v1336_v14 }
  0x52   :  { %v1349_v17 = vld [vmem:[#allocation1 + $0x184] ss:$8 sm:$0xf0]   ;;  %v1382_v20 = vld [vmem:[#allocation1 + $0x3] ss:$8 sm:$0xf0]   ;;  %v2045_v23 = vpack.i.bf16 %v1438_v13, %v1427_v12 }
  0x53   :  { %v1390_v21 = vld [vmem:[#allocation1 + $0x103] ss:$8 sm:$0xf]   ;;  %v1351_v25 = vsel %vm964_vm0, %v1349_v17, %v1347_v16  ;;  %v1488_v26 = vld [vmem:[#allocation1 + $0x42] ss:$8 sm:$0xf]   ;;  %v1384_v31 = vsel %vm964_vm0, %v1382_v20, %v1380_v19 }
  0x54   :  { %v1392_v22 = vld [vmem:[#allocation1 + $0x103] ss:$8 sm:$0xf0]   ;;  %v1490_v27 = vld [vmem:[#allocation1 + $0x42] ss:$8 sm:$0xf0]   ;;  %v2025_v30 = vpack.i.bf16 %v1351_v25, %v1340_v24 }
  0x55   :  { %v1499_v28 = vld [vmem:[#allocation1 + $0x142] ss:$8 sm:$0xf]   ;;  %v1394_v32 = vsel %vm964_vm0, %v1392_v22, %v1390_v21  ;;  %v1492_v33 = vsel %vm964_vm0, %v1490_v27, %v1488_v26  ;;  %v1401_v35 = vld [vmem:[#allocation1 + $0x43] ss:$8 sm:$0xf]  }
  0x56   :  { %1991 = vrot.lane.b32.xlu1 %v1990_v36, %s2096_s0  ;;  %v1501_v29 = vld [vmem:[#allocation1 + $0x142] ss:$8 sm:$0xf0]   ;;  %v1403_v36 = vld [vmem:[#allocation1 + $0x43] ss:$8 sm:$0xf0]   ;;  %v2035_v39 = vpack.i.bf16 %v1394_v32, %v1384_v31 }
  0x57   :  { %2016 = vrot.lane.b32.xlu0 %v2015_v41, %s2098_s14  ;;  %2011 = vrot.lane.b32.xlu2 %v2010_v9, %s2097_s11  ;;  %v1503_v34 = vsel %vm964_vm0, %v1501_v29, %v1499_v28  ;;  %v1412_v37 = vld [vmem:[#allocation1 + $0x143] ss:$8 sm:$0xf]   ;;  %v1405_v45 = vsel %vm964_vm0, %v1403_v36, %v1401_v35  ;;  %v1554_v47 = vld [vmem:[#allocation1 + $0x1] ss:$8 sm:$0xf]  }
  0x58   :  { %v1414_v38 = vld [vmem:[#allocation1 + $0x143] ss:$8 sm:$0xf0]   ;;  %v2060_v44 = vpack.i.bf16 %v1503_v34, %v1492_v33  ;;  %v1556_v48 = vld [vmem:[#allocation1 + $0x1] ss:$8 sm:$0xf0]  }
  0x59   :  { %v1445_v40 = vld [vmem:[#allocation1 + $0xc3] ss:$8 sm:$0xf]   ;;  %v1416_v46 = vsel %vm964_vm0, %v1414_v38, %v1412_v37  ;;  %v1564_v49 = vld [vmem:[#allocation1 + $0x101] ss:$8 sm:$0xf]   ;;  %v1558_v56 = vsel %vm964_vm0, %v1556_v48, %v1554_v47 }
  0x5a   :  { %v1447_v41 = vld [vmem:[#allocation1 + $0xc3] ss:$8 sm:$0xf0]   ;;  %v1566_v50 = vld [vmem:[#allocation1 + $0x101] ss:$8 sm:$0xf0]   ;;  %v2040_v51 = vpack.i.bf16 %v1416_v46, %v1405_v45 }
  0x5b   :  { %v1456_v42 = vld [vmem:[#allocation1 + $0x1c3] ss:$8 sm:$0xf]   ;;  %v1467_v52 = vld [vmem:[#allocation1 + $0x2] ss:$8 sm:$0xf]   ;;  %v1449_v54 = vsel %vm964_vm0, %v1447_v41, %v1445_v40 }
  0x5c   :  { %v1458_v43 = vld [vmem:[#allocation1 + $0x1c3] ss:$8 sm:$0xf0]   ;;  %v1469_v53 = vld [vmem:[#allocation1 + $0x2] ss:$8 sm:$0xf0]  }
  0x5d   :  { %v1460_v55 = vsel %vm964_vm0, %v1458_v43, %v1456_v42  ;;  %v1477_v58 = vld [vmem:[#allocation1 + $0x102] ss:$8 sm:$0xf]   ;;  %v962_v60 = vld [vmem:[#allocation1] ss:$8 sm:$0xf]   ;;  %v1471_v8 = vsel %vm964_vm0, %v1469_v53, %v1467_v52 }
  0x5e   :  { %2006 = vrot.lane.b32.xlu1 %v2005_v57, %s2097_s11  ;;  %v1568_v57 = vsel %vm964_vm0, %v1566_v50, %v1564_v49  ;;  %v1479_v59 = vld [vmem:[#allocation1 + $0x102] ss:$8 sm:$0xf0]   ;;  %v963_v61 = vld [vmem:[#allocation1] ss:$8 sm:$0xf0]   ;;  %v2050_v0 = vpack.i.bf16 %v1460_v55, %v1449_v54 }
  0x5f   :  { %2031 = vrot.lane.b32.xlu0 %v2030_v62, %s2098_s14  ;;  %2026 = vrot.lane.b32.xlu2 %v2025_v30, %s2098_s14  ;;  %v965_v62 = vsel %vm964_vm0, %v963_v61, %v962_v60  ;;  %v996_v63 = vld [vmem:[#allocation1 + $0x100] ss:$8 sm:$0xf]   ;;  %v1510_v1 = vld [vmem:[#allocation1 + $0x82] ss:$8 sm:$0xf]   ;;  %v2075_v5 = vpack.i.bf16 %v1568_v57, %v1558_v56  ;;  %v1481_v9 = vsel %vm964_vm0, %v1479_v59, %v1477_v58 }
  0x60   :  { %v1512_v2 = vld [vmem:[#allocation1 + $0x82] ss:$8 sm:$0xf0]   ;;  %v1619_v6 = vld [vmem:[#allocation1 + $0xc1] ss:$8 sm:$0xf]   ;;  %v2055_v15 = vpack.i.bf16 %v1481_v9, %v1471_v8 }
  0x61   :  { %v1521_v3 = vld [vmem:[#allocation1 + $0x182] ss:$8 sm:$0xf]   ;;  %v1621_v7 = vld [vmem:[#allocation1 + $0xc1] ss:$8 sm:$0xf0]   ;;  %v1514_v21 = vsel %vm964_vm0, %v1512_v2, %v1510_v1 }
  0x62   :  { %v1523_v4 = vld [vmem:[#allocation1 + $0x182] ss:$8 sm:$0xf0]   ;;  %967 = vst.msk [vmem:[#allocation0] sm:$0xff] %vm966_vm1, %v965_v62  }
  0x63   :  { %v998_v10 = vld [vmem:[#allocation1 + $0x100] ss:$8 sm:$0xf0]   ;;  %v1630_v11 = vld [vmem:[#allocation1 + $0x1c1] ss:$8 sm:$0xf]   ;;  %v1525_v22 = vsel %vm964_vm0, %v1523_v4, %v1521_v3 }
  0x64   :  { %v1632_v12 = vld [vmem:[#allocation1 + $0x1c1] ss:$8 sm:$0xf0]   ;;  %v1000_v13 = vsel %vm964_vm0, %v998_v10, %v996_v63  ;;  %v978_v14 = vld [vmem:[#allocation1 + $0x80] ss:$8 sm:$0xf]   ;;  %v2065_v26 = vpack.i.bf16 %v1525_v22, %v1514_v21 }
  0x65   :  { %1003 = vst.msk [vmem:[#allocation0 + $0x20] sm:$0xff] %vm966_vm1, %v1000_v13   ;;  %v1532_v16 = vld [vmem:[#allocation1 + $0xc2] ss:$8 sm:$0xf]   ;;  %v1634_v24 = vsel %vm964_vm0, %v1632_v12, %v1630_v11 }
  0x66   :  { %2021 = vrot.lane.b32.xlu1 %v2020_v18, %s2098_s14  ;;  %v980_v17 = vld [vmem:[#allocation1 + $0x80] ss:$8 sm:$0xf0]   ;;  %v1534_v18 = vld [vmem:[#allocation1 + $0xc2] ss:$8 sm:$0xf0]  }
  0x67   :  { %2046 = vrot.lane.b32.xlu0 %v2045_v23, %s2099_s15  ;;  %2041 = vrot.lane.b32.xlu2 %v2040_v51, %s2099_s15  ;;  %v1543_v19 = vld [vmem:[#allocation1 + $0x1c2] ss:$8 sm:$0xf]   ;;  %v982_v20 = vsel %vm964_vm0, %v980_v17, %v978_v14  ;;  %v1623_v23 = vsel %vm964_vm0, %v1621_v7, %v1619_v6  ;;  %v1536_v28 = vsel %vm964_vm0, %v1534_v18, %v1532_v16  ;;  %v1575_v30 = vld [vmem:[#allocation1 + $0x41] ss:$8 sm:$0xf]  }
  0x68   :  { %v1545_v25 = vld [vmem:[#allocation1 + $0x1c2] ss:$8 sm:$0xf0]   ;;  %985 = vst.msk [vmem:[#allocation0 + $0x10] sm:$0xff] %vm966_vm1, %v982_v20   ;;  %v2090_v27 = vpack.i.bf16 %v1634_v24, %v1623_v23 }
  0x69   :  { %v1547_v29 = vsel %vm964_vm0, %v1545_v25, %v1543_v19  ;;  %v1577_v31 = vld [vmem:[#allocation1 + $0x41] ss:$8 sm:$0xf0]   ;;  %v1014_v41 = vld [vmem:[#allocation1 + $0x180] ss:$8 sm:$0xf]  }
  0x6a   :  { %v1586_v32 = vld [vmem:[#allocation1 + $0x141] ss:$8 sm:$0xf]   ;;  %v2070_v34 = vpack.i.bf16 %v1547_v29, %v1536_v28  ;;  %v1579_v38 = vsel %vm964_vm0, %v1577_v31, %v1575_v30  ;;  %v1016_v42 = vld [vmem:[#allocation1 + $0x180] ss:$8 sm:$0xf0]  }
  0x6b   :  { %v1588_v33 = vld [vmem:[#allocation1 + $0x141] ss:$8 sm:$0xf0]   ;;  %v1018_v46 = vsel %vm964_vm0, %v1016_v42, %v1014_v41  ;;  %v969_v48 = vld [vmem:[#allocation1 + $0x40] ss:$8 sm:$0xf]  }
  0x6c   :  { %v1597_v35 = vld [vmem:[#allocation1 + $0x81] ss:$8 sm:$0xf]   ;;  %1021 = vst.msk [vmem:[#allocation0 + $0x30] sm:$0xff] %vm966_vm1, %v1018_v46  }
  0x6d   :  { %v1599_v36 = vld [vmem:[#allocation1 + $0x81] ss:$8 sm:$0xf0]   ;;  %v971_v49 = vld [vmem:[#allocation1 + $0x40] ss:$8 sm:$0xf0]  }
  0x6e   :  { %2036 = vrot.lane.b32.xlu1 %v2035_v39, %s2099_s15  ;;  %v1608_v37 = vld [vmem:[#allocation1 + $0x181] ss:$8 sm:$0xf]   ;;  %v1590_v39 = vsel %vm964_vm0, %v1588_v33, %v1586_v32  ;;  %v973_v50 = vsel %vm964_vm0, %v971_v49, %v969_v48  ;;  %v1005_v51 = vld [vmem:[#allocation1 + $0x140] ss:$8 sm:$0xf]  }
  0x6f   :  { %2061 = vrot.lane.b32.xlu0 %v2060_v44, %s2100_s16  ;;  %2056 = vrot.lane.b32.xlu2 %v2055_v15, %s2100_s16  ;;  %v1610_v40 = vld [vmem:[#allocation1 + $0x181] ss:$8 sm:$0xf0]   ;;  %v2080_v43 = vpack.i.bf16 %v1590_v39, %v1579_v38  ;;  %v1601_v44 = vsel %vm964_vm0, %v1599_v36, %v1597_v35  ;;  %976 = vst.msk [vmem:[#allocation0 + $0x8] sm:$0xff] %vm966_vm1, %v973_v50  }
  0x70   :  { %v1612_v45 = vsel %vm964_vm0, %v1610_v40, %v1608_v37  ;;  %v1007_v55 = vld [vmem:[#allocation1 + $0x140] ss:$8 sm:$0xf0]  }
  0x71   :  { %v2085_v47 = vpack.i.bf16 %v1612_v45, %v1601_v44  ;;  %v1009_v56 = vsel %vm964_vm0, %v1007_v55, %v1005_v51  ;;  %v987_v57 = vld [vmem:[#allocation1 + $0xc0] ss:$8 sm:$0xf]  }
  0x72   :  { %1012 = vst.msk [vmem:[#allocation0 + $0x28] sm:$0xff] %vm966_vm1, %v1009_v56   ;;  %v989_v58 = vld [vmem:[#allocation1 + $0xc0] ss:$8 sm:$0xf0]  }
  0x73   :  { %v991_v59 = vsel %vm964_vm0, %v989_v58, %v987_v57  ;;  %v1023_v60 = vld [vmem:[#allocation1 + $0x1c0] ss:$8 sm:$0xf]  }
  0x74   :  { %994 = vst.msk [vmem:[#allocation0 + $0x18] sm:$0xff] %vm966_vm1, %v991_v59  }
  0x76   :  { %2051 = vrot.lane.b32.xlu1 %v2050_v0, %s2099_s15  ;;  %v1025_v0 = vld [vmem:[#allocation1 + $0x1c0] ss:$8 sm:$0xf0]  }
  0x77   :  { %2076 = vrot.lane.b32.xlu0 %v2075_v5, %s2101_s17  ;;  %2071 = vrot.lane.b32.xlu2 %v2070_v34, %s2100_s16  ;;  %v1027_v1 = vsel %vm964_vm0, %v1025_v0, %v1023_v60 }
  0x78   :  { %1030 = vst.msk [vmem:[#allocation0 + $0x38] sm:$0xff] %vm966_vm1, %v1027_v1  }
  0x7e   :  { %2066 = vrot.lane.b32.xlu1 %v2065_v26, %s2100_s16 }
  0x7f   :  { %2091 = vrot.lane.b32.xlu0 %v2090_v27, %s2101_s17  ;;  %2086 = vrot.lane.b32.xlu2 %v2085_v47, %s2101_s17 }
  0x86   :  { %2081 = vrot.lane.b32.xlu1 %v2080_v43, %s2101_s17 }
  0x8a   :  { %v1977_v2 = vpop.permute.xlu2 %1976 }
  0x8b   :  { %v1979_v3 = vunpack.i.h.bf16 %v1977_v2  ;;  %v1978_v4 = vunpack.i.l.bf16 %v1977_v2 }
  0x90   :  { %v1957_v52 = vpop.permute.xlu0 %1956 }
  0x91   :  { %v1959_v53 = vunpack.i.h.bf16 %v1957_v52  ;;  %v1958_v54 = vunpack.i.l.bf16 %v1957_v52 }
  0x93   :  { %1040 = vst.msk [vmem:[#allocation0] sm:$0xff] %vm1039_vm2, %v1958_v54  }
  0x94   :  { %1051 = vst.msk [vmem:[#allocation0 + $0x20] sm:$0xff] %vm1039_vm2, %v1959_v53  }
  0x95   :  { %1127 = vst.msk [vmem:[#allocation0] sm:$0xff] %vm1126_vm3, %v1978_v4  }
  0x96   :  { %1138 = vst.msk [vmem:[#allocation0 + $0x20] sm:$0xff] %vm1126_vm3, %v1979_v3  }
  0x9a   :  { %v1982_v5 = vpop.permute.xlu2 %1981 }
  0x9b   :  { %v1983_v9 = vunpack.i.l.bf16 %v1982_v5  ;;  %v1984_v10 = vunpack.i.h.bf16 %v1982_v5 }
  0xa0   :  { %v1967_v61 = vpop.permute.xlu1 %1966 }
  0xa1   :  { %v1969_v62 = vunpack.i.h.bf16 %v1967_v61  ;;  %v1968_v63 = vunpack.i.l.bf16 %v1967_v61 }
  0xa3   :  { %1084 = vst.msk [vmem:[#allocation0 + $0x10] sm:$0xff] %vm1039_vm2, %v1968_v63  }
  0xa4   :  { %1095 = vst.msk [vmem:[#allocation0 + $0x30] sm:$0xff] %vm1039_vm2, %v1969_v62  }
  0xa9   :  { %v1997_v11 = vpop.permute.xlu2 %1996 }
  0xaa   :  { %v1999_v12 = vunpack.i.h.bf16 %v1997_v11  ;;  %v1998_v13 = vunpack.i.l.bf16 %v1997_v11 }
  0xac   :  { %1225 = vst.msk [vmem:[#allocation0 + $0x20] sm:$0xff] %vm1213_vm4, %v1999_v12  }
  0xad   :  { %1214 = vst.msk [vmem:[#allocation0] sm:$0xff] %vm1213_vm4, %v1998_v13  }
  0xb0   :  { %v1962_v6 = vpop.permute.xlu0 %1961 }
  0xb1   :  { %v1964_v7 = vunpack.i.h.bf16 %v1962_v6  ;;  %v1963_v8 = vunpack.i.l.bf16 %v1962_v6  ;;  %v2012_v17 = vpop.permute.xlu2 %2011 }
  0xb2   :  { %v2013_v31 = vunpack.i.l.bf16 %v2012_v17  ;;  %v2014_v33 = vunpack.i.h.bf16 %v2012_v17 }
  0xb3   :  { %1062 = vst.msk [vmem:[#allocation0 + $0x8] sm:$0xff] %vm1039_vm2, %v1963_v8  }
  0xb4   :  { %1073 = vst.msk [vmem:[#allocation0 + $0x28] sm:$0xff] %vm1039_vm2, %v1964_v7  }
  0xb5   :  { %1149 = vst.msk [vmem:[#allocation0 + $0x8] sm:$0xff] %vm1126_vm3, %v1983_v9  }
  0xb6   :  { %1160 = vst.msk [vmem:[#allocation0 + $0x28] sm:$0xff] %vm1126_vm3, %v1984_v10  }
  0xb8   :  { %v1987_v14 = vpop.permute.xlu0 %1986 }
  0xb9   :  { %v1989_v15 = vunpack.i.h.bf16 %v1987_v14  ;;  %v1988_v16 = vunpack.i.l.bf16 %v1987_v14  ;;  %v2027_v24 = vpop.permute.xlu2 %2026 }
  0xba   :  { %v2028_v40 = vunpack.i.l.bf16 %v2027_v24  ;;  %v2029_v42 = vunpack.i.h.bf16 %v2027_v24 }
  0xbb   :  { %1171 = vst.msk [vmem:[#allocation0 + $0x10] sm:$0xff] %vm1126_vm3, %v1988_v16  }
  0xbc   :  { %1182 = vst.msk [vmem:[#allocation0 + $0x30] sm:$0xff] %vm1126_vm3, %v1989_v15  }
  0xc0   :  { %v1972_v18 = vpop.permute.xlu1 %1971 }
  0xc1   :  { %v2002_v19 = vpop.permute.xlu0 %2001  ;;  %v1974_v20 = vunpack.i.h.bf16 %v1972_v18  ;;  %v1973_v21 = vunpack.i.l.bf16 %v1972_v18  ;;  %v2042_v32 = vpop.permute.xlu2 %2041 }
  0xc2   :  { %v2004_v22 = vunpack.i.h.bf16 %v2002_v19  ;;  %v2003_v23 = vunpack.i.l.bf16 %v2002_v19  ;;  %v2043_v49 = vunpack.i.l.bf16 %v2042_v32  ;;  %v2044_v51 = vunpack.i.h.bf16 %v2042_v32 }
  0xc3   :  { %1106 = vst.msk [vmem:[#allocation0 + $0x18] sm:$0xff] %vm1039_vm2, %v1973_v21  }
  0xc4   :  { %1117 = vst.msk [vmem:[#allocation0 + $0x38] sm:$0xff] %vm1039_vm2, %v1974_v20  }
  0xc5   :  { %1247 = vst.msk [vmem:[#allocation0 + $0x28] sm:$0xff] %vm1213_vm4, %v2004_v22  }
  0xc6   :  { %1236 = vst.msk [vmem:[#allocation0 + $0x8] sm:$0xff] %vm1213_vm4, %v2003_v23  }
  0xc8   :  { %v1992_v25 = vpop.permute.xlu1 %1991 }
  0xc9   :  { %v2017_v26 = vpop.permute.xlu0 %2016  ;;  %v1994_v27 = vunpack.i.h.bf16 %v1992_v25  ;;  %v1993_v28 = vunpack.i.l.bf16 %v1992_v25  ;;  %v2057_v41 = vpop.permute.xlu2 %2056 }
  0xca   :  { %v2019_v29 = vunpack.i.h.bf16 %v2017_v26  ;;  %v2018_v30 = vunpack.i.l.bf16 %v2017_v26  ;;  %v2058_v58 = vunpack.i.l.bf16 %v2057_v41  ;;  %v2059_v60 = vunpack.i.h.bf16 %v2057_v41 }
  0xcb   :  { %1193 = vst.msk [vmem:[#allocation0 + $0x18] sm:$0xff] %vm1126_vm3, %v1993_v28  }
  0xcc   :  { %1204 = vst.msk [vmem:[#allocation0 + $0x38] sm:$0xff] %vm1126_vm3, %v1994_v27  }
  0xcd   :  { %1312 = vst.msk [vmem:[#allocation0 + $0x20] sm:$0xff] %vm1300_vm5, %v2019_v29  }
  0xce   :  { %1301 = vst.msk [vmem:[#allocation0] sm:$0xff] %vm1300_vm5, %v2018_v30  }
  0xcf   :  { %1280 = vst.msk [vmem:[#allocation0 + $0x18] sm:$0xff] %vm1213_vm4, %v2013_v31  }
  0xd0   :  { %v2007_v34 = vpop.permute.xlu1 %2006  ;;  %1291 = vst.msk [vmem:[#allocation0 + $0x38] sm:$0xff] %vm1213_vm4, %v2014_v33  }
  0xd1   :  { %v2032_v35 = vpop.permute.xlu0 %2031  ;;  %v2009_v36 = vunpack.i.h.bf16 %v2007_v34  ;;  %v2008_v37 = vunpack.i.l.bf16 %v2007_v34  ;;  %v2072_v50 = vpop.permute.xlu2 %2071 }
  0xd2   :  { %v2033_v38 = vunpack.i.l.bf16 %v2032_v35  ;;  %v2034_v39 = vunpack.i.h.bf16 %v2032_v35  ;;  %v2073_v3 = vunpack.i.l.bf16 %v2072_v50  ;;  %v2074_v4 = vunpack.i.h.bf16 %v2072_v50 }
  0xd3   :  { %1269 = vst.msk [vmem:[#allocation0 + $0x30] sm:$0xff] %vm1213_vm4, %v2009_v36  }
  0xd4   :  { %1258 = vst.msk [vmem:[#allocation0 + $0x10] sm:$0xff] %vm1213_vm4, %v2008_v37  }
  0xd5   :  { %1367 = vst.msk [vmem:[#allocation0 + $0x18] sm:$0xff] %vm1300_vm5, %v2033_v38  }
  0xd6   :  { %1378 = vst.msk [vmem:[#allocation0 + $0x38] sm:$0xff] %vm1300_vm5, %v2034_v39  }
  0xd7   :  { %1345 = vst.msk [vmem:[#allocation0 + $0x10] sm:$0xff] %vm1300_vm5, %v2028_v40  }
  0xd8   :  { %v2022_v43 = vpop.permute.xlu1 %2021  ;;  %1356 = vst.msk [vmem:[#allocation0 + $0x30] sm:$0xff] %vm1300_vm5, %v2029_v42  }
  0xd9   :  { %v2047_v44 = vpop.permute.xlu0 %2046  ;;  %v2024_v45 = vunpack.i.h.bf16 %v2022_v43  ;;  %v2023_v46 = vunpack.i.l.bf16 %v2022_v43  ;;  %v2087_v59 = vpop.permute.xlu2 %2086 }
  0xda   :  { %v2048_v47 = vunpack.i.l.bf16 %v2047_v44  ;;  %v2049_v48 = vunpack.i.h.bf16 %v2047_v44  ;;  %v2088_v11 = vunpack.i.l.bf16 %v2087_v59  ;;  %v2089_v12 = vunpack.i.h.bf16 %v2087_v59 }
  0xdb   :  { %1334 = vst.msk [vmem:[#allocation0 + $0x28] sm:$0xff] %vm1300_vm5, %v2024_v45  }
  0xdc   :  { %1323 = vst.msk [vmem:[#allocation0 + $0x8] sm:$0xff] %vm1300_vm5, %v2023_v46  }
  0xdd   :  { %1432 = vst.msk [vmem:[#allocation0 + $0x10] sm:$0xff] %vm1387_vm6, %v2048_v47  }
  0xde   :  { %1443 = vst.msk [vmem:[#allocation0 + $0x30] sm:$0xff] %vm1387_vm6, %v2049_v48  }
  0xdf   :  { %1410 = vst.msk [vmem:[#allocation0 + $0x8] sm:$0xff] %vm1387_vm6, %v2043_v49  }
  0xe0   :  { %v2037_v52 = vpop.permute.xlu1 %2036  ;;  %1421 = vst.msk [vmem:[#allocation0 + $0x28] sm:$0xff] %vm1387_vm6, %v2044_v51  }
  0xe1   :  { %v2062_v53 = vpop.permute.xlu0 %2061  ;;  %v2039_v54 = vunpack.i.h.bf16 %v2037_v52  ;;  %v2038_v55 = vunpack.i.l.bf16 %v2037_v52 }
  0xe2   :  { %v2063_v56 = vunpack.i.l.bf16 %v2062_v53  ;;  %v2064_v57 = vunpack.i.h.bf16 %v2062_v53 }
  0xe3   :  { %1399 = vst.msk [vmem:[#allocation0 + $0x20] sm:$0xff] %vm1387_vm6, %v2039_v54  }
  0xe4   :  { %1388 = vst.msk [vmem:[#allocation0] sm:$0xff] %vm1387_vm6, %v2038_v55  }
  0xe5   :  { %1497 = vst.msk [vmem:[#allocation0 + $0x8] sm:$0xff] %vm1474_vm7, %v2063_v56  }
  0xe6   :  { %1508 = vst.msk [vmem:[#allocation0 + $0x28] sm:$0xff] %vm1474_vm7, %v2064_v57  }
  0xe7   :  { %1475 = vst.msk [vmem:[#allocation0] sm:$0xff] %vm1474_vm7, %v2058_v58  }
  0xe8   :  { %v2052_v61 = vpop.permute.xlu1 %2051  ;;  %1486 = vst.msk [vmem:[#allocation0 + $0x20] sm:$0xff] %vm1474_vm7, %v2059_v60  }
  0xe9   :  { %v2077_v62 = vpop.permute.xlu0 %2076  ;;  %v2054_v63 = vunpack.i.h.bf16 %v2052_v61  ;;  %v2053_v0 = vunpack.i.l.bf16 %v2052_v61 }
  0xea   :  { %v2078_v1 = vunpack.i.l.bf16 %v2077_v62  ;;  %v2079_v2 = vunpack.i.h.bf16 %v2077_v62 }
  0xeb   :  { %1454 = vst.msk [vmem:[#allocation0 + $0x18] sm:$0xff] %vm1387_vm6, %v2053_v0  }
  0xec   :  { %1465 = vst.msk [vmem:[#allocation0 + $0x38] sm:$0xff] %vm1387_vm6, %v2054_v63  }
  0xed   :  { %1562 = vst.msk [vmem:[#allocation0] sm:$0xff] %vm1561_vm8, %v2078_v1  }
  0xee   :  { %1573 = vst.msk [vmem:[#allocation0 + $0x20] sm:$0xff] %vm1561_vm8, %v2079_v2  }
  0xef   :  { %1541 = vst.msk [vmem:[#allocation0 + $0x18] sm:$0xff] %vm1474_vm7, %v2073_v3  }
  0xf0   :  { %v2067_v5 = vpop.permute.xlu1 %2066  ;;  %1552 = vst.msk [vmem:[#allocation0 + $0x38] sm:$0xff] %vm1474_vm7, %v2074_v4  }
  0xf1   :  { %v2092_v6 = vpop.permute.xlu0 %2091  ;;  %v2069_v7 = vunpack.i.h.bf16 %v2067_v5  ;;  %v2068_v8 = vunpack.i.l.bf16 %v2067_v5 }
  0xf2   :  { %v2093_v9 = vunpack.i.l.bf16 %v2092_v6  ;;  %v2094_v10 = vunpack.i.h.bf16 %v2092_v6 }
  0xf3   :  { %1519 = vst.msk [vmem:[#allocation0 + $0x10] sm:$0xff] %vm1474_vm7, %v2068_v8  }
  0xf4   :  { %1530 = vst.msk [vmem:[#allocation0 + $0x30] sm:$0xff] %vm1474_vm7, %v2069_v7   ;;  %v1642_v21 = vld [vmem:[#allocation0] sm:$0xff] }
  0xf5   :  { %1628 = vst.msk [vmem:[#allocation0 + $0x18] sm:$0xff] %vm1561_vm8, %v2093_v9   ;;  %v1669_v23 = vld [vmem:[#allocation0 + $0x20] sm:$0xff] }
  0xf6   :  { %1639 = vst.msk [vmem:[#allocation0 + $0x38] sm:$0xff] %vm1561_vm8, %v2094_v10  }
  0xf7   :  { %1606 = vst.msk [vmem:[#allocation0 + $0x10] sm:$0xff] %vm1561_vm8, %v2088_v11  }
  0xf8   :  { %v2082_v13 = vpop.permute.xlu1 %2081  ;;  %1617 = vst.msk [vmem:[#allocation0 + $0x30] sm:$0xff] %vm1561_vm8, %v2089_v12  }
  0xf9   :  { %v2084_v14 = vunpack.i.h.bf16 %v2082_v13  ;;  %v2083_v15 = vunpack.i.l.bf16 %v2082_v13 }
  0xfb   :  { %1584 = vst.msk [vmem:[#allocation0 + $0x8] sm:$0xff] %vm1561_vm8, %v2083_v15  }
  0xfc   :  { %1595 = vst.msk [vmem:[#allocation0 + $0x28] sm:$0xff] %vm1561_vm8, %v2084_v14   ;;  %v1662_v16 = vld [vmem:[#allocation0 + $0x18] sm:$0xff] }
  0xfd   :  { %v1690_v17 = vld [vmem:[#allocation0 + $0x38] sm:$0xff] }
  0xfe   :  { %v1655_v18 = vld [vmem:[#allocation0 + $0x10] sm:$0xff] }
  0xff   :  { %v1683_v19 = vld [vmem:[#allocation0 + $0x30] sm:$0xff]  ;;  %v1902_v20 = vpack.c.bf16 %v1662_v16, %v1655_v18 }
 0x100   :  { %v1912_v22 = vpack.c.bf16 %v1690_v17, %v1683_v19 }
 0x101   :  { %1945 = vst [vmem:[%s2377_s1 + $0x8] sm:$0xff] %v1902_v20  }
 0x102   :  { %v1648_v24 = vld [vmem:[#allocation0 + $0x8] sm:$0xff]  ;;  %1947 = vst [vmem:[%s2377_s1 + $0x18] sm:$0xff] %v1912_v22  }
 0x103   :  { %v1897_v25 = vpack.c.bf16 %v1648_v24, %v1642_v21  ;;  %v1676_v26 = vld [vmem:[#allocation0 + $0x28] sm:$0xff] }
 0x104   :  { %v1907_v27 = vpack.c.bf16 %v1676_v26, %v1669_v23 }
 0x105   :  { %1898 = vst [vmem:[%s2377_s1] sm:$0xff] %v1897_v25  }
 0x106   :  { %1946 = vst [vmem:[%s2377_s1 + $0x10] sm:$0xff] %v1907_v27  }

// kernel: squeeze.19
= control target key start
LH: loop header
LB: loop body
LE: loop exit
PB: predicated region body
PF: predicated region fallthrough
CT: control target
= control target key end

     0   :  { %vm1924_vm0 = vcmask 1047556   ;;  %s4195_s11 = smov 112   ;;  %s4196_s28 = smov 96   ;;  %vm1926_vm1 = vcmask 130048   ;;  %vm2071_vm2 = vcmask 1048448   ;;  %vm2246_vm3 = vcmask 917248   ;;  %s4760_s0 = inlined_call_operand.vmem [shape: bf16[1,8,16,8,16], index: 0, kind: input, shape index: {}]   ;;  %s4761_s1 = inlined_call_operand.vmem [shape: bf16[128,128], index: 1, kind: output, shape index: {}]  }
   0x1   :  { %v3882_v0 = vld [vmem:[%s4760_s0 + $0x98] sm:$0xff]   ;;  %v3883_v1 = vld [vmem:[%s4760_s0 + $0x90] sm:$0xff]   ;;  %v3884_v2 = vld [vmem:[%s4760_s0 + $0x88] sm:$0xff]   ;;  %s4199_s23 = smov 48   ;;  %s4200_s24 = smov 32   ;;  %vm2421_vm4 = vcmask 786048  }
   0x2   :  { %v3720_v3 = vunpack.c.l.bf16 %v3882_v0  ;;  %v3721_v4 = vunpack.c.h.bf16 %v3882_v0  ;;  %v3725_v5 = vunpack.c.h.bf16 %v3883_v1  ;;  %v3724_v6 = vunpack.c.l.bf16 %v3883_v1  ;;  %v3885_v7 = vld [vmem:[%s4760_s0 + $0x80] sm:$0xff]   ;;  %v3898_v10 = vld [vmem:[%s4760_s0 + $0x18] sm:$0xff]   ;;  %v3899_v13 = vld [vmem:[%s4760_s0 + $0x10] sm:$0xff]   ;;  %s4201_s25 = smov 16  }
   0x3   :  { %v3729_v8 = vunpack.c.h.bf16 %v3884_v2  ;;  %v3728_v9 = vunpack.c.l.bf16 %v3884_v2  ;;  %v3733_v11 = vunpack.c.h.bf16 %v3885_v7  ;;  %v3732_v12 = vunpack.c.l.bf16 %v3885_v7  ;;  %v3900_v16 = vld [vmem:[%s4760_s0 + $0x8] sm:$0xff]   ;;  %v3795_v19 = vld [vmem:[%s4760_s0] sm:$0xff]   ;;  %v3878_v22 = vld [vmem:[%s4760_s0 + $0xb8] sm:$0xff]  }
   0x4   :  { %1338 = vst [vmem:[#allocation1 + $0x138] sm:$0xff] %v3721_v4  ;;  %v3785_v14 = vunpack.c.h.bf16 %v3898_v10  ;;  %v3784_v15 = vunpack.c.l.bf16 %v3898_v10  ;;  %v3789_v17 = vunpack.c.h.bf16 %v3899_v13  ;;  %v3788_v18 = vunpack.c.l.bf16 %v3899_v13  ;;  %v3879_v25 = vld [vmem:[%s4760_s0 + $0xb0] sm:$0xff]   ;;  %v3880_v28 = vld [vmem:[%s4760_s0 + $0xa8] sm:$0xff]   ;;  %v3881_v31 = vld [vmem:[%s4760_s0 + $0xa0] sm:$0xff]  }
   0x5   :  { %1353 = vst [vmem:[#allocation1 + $0x130] sm:$0xff] %v3720_v3  ;;  %v3793_v20 = vunpack.c.h.bf16 %v3900_v16  ;;  %v3792_v21 = vunpack.c.l.bf16 %v3900_v16  ;;  %v3797_v23 = vunpack.c.h.bf16 %v3795_v19  ;;  %v3796_v24 = vunpack.c.l.bf16 %v3795_v19  ;;  %v3894_v35 = vld [vmem:[%s4760_s0 + $0x38] sm:$0xff]   ;;  %v3895_v39 = vld [vmem:[%s4760_s0 + $0x30] sm:$0xff]   ;;  %v3896_v44 = vld [vmem:[%s4760_s0 + $0x28] sm:$0xff]  }
   0x6   :  { %1368 = vst [vmem:[#allocation1 + $0x128] sm:$0xff] %v3725_v5  ;;  %v3705_v26 = vunpack.c.h.bf16 %v3878_v22  ;;  %v3704_v27 = vunpack.c.l.bf16 %v3878_v22  ;;  %v3709_v29 = vunpack.c.h.bf16 %v3879_v25  ;;  %v3708_v30 = vunpack.c.l.bf16 %v3879_v25  ;;  %v3897_v49 = vld [vmem:[%s4760_s0 + $0x20] sm:$0xff]   ;;  %v3850_v53 = vld [vmem:[%s4760_s0 + $0x198] sm:$0xff]   ;;  %v3851_v56 = vld [vmem:[%s4760_s0 + $0x190] sm:$0xff]  }
   0x7   :  { %1383 = vst [vmem:[#allocation1 + $0x120] sm:$0xff] %v3724_v6  ;;  %v3713_v32 = vunpack.c.h.bf16 %v3880_v28  ;;  %v3712_v34 = vunpack.c.l.bf16 %v3880_v28  ;;  %v3717_v37 = vunpack.c.h.bf16 %v3881_v31  ;;  %v3716_v38 = vunpack.c.l.bf16 %v3881_v31  ;;  %v3852_v59 = vld [vmem:[%s4760_s0 + $0x188] sm:$0xff]   ;;  %v3853_v62 = vld [vmem:[%s4760_s0 + $0x180] sm:$0xff]   ;;  %v3866_v2 = vld [vmem:[%s4760_s0 + $0x118] sm:$0xff]  }
   0x8   :  { %1398 = vst [vmem:[#allocation1 + $0x118] sm:$0xff] %v3729_v8  ;;  %v3769_v41 = vunpack.c.h.bf16 %v3894_v35  ;;  %v3768_v43 = vunpack.c.l.bf16 %v3894_v35  ;;  %v3773_v46 = vunpack.c.h.bf16 %v3895_v39  ;;  %v3772_v48 = vunpack.c.l.bf16 %v3895_v39  ;;  %v3867_v6 = vld [vmem:[%s4760_s0 + $0x110] sm:$0xff]   ;;  %v3869_v16 = vld [vmem:[%s4760_s0 + $0x100] sm:$0xff]  }
   0x9   :  { %1413 = vst [vmem:[#allocation1 + $0x110] sm:$0xff] %v3728_v9  ;;  %v3777_v51 = vunpack.c.h.bf16 %v3896_v44  ;;  %v3776_v52 = vunpack.c.l.bf16 %v3896_v44  ;;  %v3781_v54 = vunpack.c.h.bf16 %v3897_v49  ;;  %v3780_v55 = vunpack.c.l.bf16 %v3897_v49 }
   0xa   :  { %1428 = vst [vmem:[#allocation1 + $0x108] sm:$0xff] %v3733_v11  ;;  %v3593_v57 = vunpack.c.h.bf16 %v3850_v53  ;;  %v3592_v58 = vunpack.c.l.bf16 %v3850_v53  ;;  %v3597_v60 = vunpack.c.h.bf16 %v3851_v56  ;;  %v3596_v61 = vunpack.c.l.bf16 %v3851_v56  ;;  %v3868_v11 = vld [vmem:[%s4760_s0 + $0x108] sm:$0xff]  }
   0xb   :  { %1443 = vst [vmem:[#allocation1 + $0x100] sm:$0xff] %v3732_v12  ;;  %v3601_v63 = vunpack.c.h.bf16 %v3852_v59  ;;  %v3600_v1 = vunpack.c.l.bf16 %v3852_v59  ;;  %v3605_v4 = vunpack.c.h.bf16 %v3853_v62  ;;  %v3604_v5 = vunpack.c.l.bf16 %v3853_v62 }
   0xc   :  { %1818 = vst [vmem:[#allocation1 + $0x38] sm:$0xff] %v3785_v14  ;;  %v3657_v8 = vunpack.c.h.bf16 %v3866_v2  ;;  %v3656_v10 = vunpack.c.l.bf16 %v3866_v2  ;;  %v3661_v13 = vunpack.c.h.bf16 %v3867_v6  ;;  %v3664_v19 = vunpack.c.l.bf16 %v3868_v11 }
   0xd   :  { %1833 = vst [vmem:[#allocation1 + $0x30] sm:$0xff] %v3784_v15  ;;  %v3660_v15 = vunpack.c.l.bf16 %v3867_v6  ;;  %v3668_v22 = vunpack.c.l.bf16 %v3869_v16  ;;  %vm2596_vm5 = vcmask 654848   ;;  %vm2771_vm6 = vcmask 523648  }
   0xe   :  { %1848 = vst [vmem:[#allocation1 + $0x28] sm:$0xff] %v3789_v17  ;;  %v2076_v33 = vld [vmem:[#allocation1 + $0x107] ss:$8 sm:$0xf0]   ;;  %vm2946_vm7 = vcmask 392448   ;;  %vm3121_vm8 = vcmask 261248  }
   0xf   :  { %1863 = vst [vmem:[#allocation1 + $0x20] sm:$0xff] %v3788_v18  ;;  %v3665_v18 = vunpack.c.h.bf16 %v3868_v11 }
  0x10   :  { %1878 = vst [vmem:[#allocation1 + $0x18] sm:$0xff] %v3793_v20  ;;  %v3846_v20 = vld [vmem:[%s4760_s0 + $0x1b8] sm:$0xff]  }
  0x11   :  { %1893 = vst [vmem:[#allocation1 + $0x10] sm:$0xff] %v3792_v21  ;;  %v3669_v21 = vunpack.c.h.bf16 %v3869_v16  ;;  %v3576_v25 = vunpack.c.l.bf16 %v3846_v20 }
  0x12   :  { %1908 = vst [vmem:[#allocation1 + $0x8] sm:$0xff] %v3797_v23  ;;  %v2074_v36 = vld [vmem:[#allocation1 + $0x107] ss:$8 sm:$0xf]  }
  0x13   :  { %1921 = vst [vmem:[#allocation1] sm:$0xff] %v3796_v24  ;;  %v2078_v42 = vsel %vm1924_vm0, %v2076_v33, %v2074_v36  ;;  %v3847_v23 = vld [vmem:[%s4760_s0 + $0x1b0] sm:$0xff]   ;;  %v3577_v24 = vunpack.c.h.bf16 %v3846_v20  ;;  %v3862_v33 = vld [vmem:[%s4760_s0 + $0x138] sm:$0xff]  }
  0x14   :  { %1218 = vst [vmem:[#allocation1 + $0x178] sm:$0xff] %v3705_v26  ;;  %v3848_v26 = vld [vmem:[%s4760_s0 + $0x1a8] sm:$0xff]   ;;  %v3580_v28 = vunpack.c.l.bf16 %v3847_v23  ;;  %v3641_v39 = vunpack.c.h.bf16 %v3862_v33 }
  0x15   :  { %1233 = vst [vmem:[#allocation1 + $0x170] sm:$0xff] %v3704_v27  ;;  %v3581_v27 = vunpack.c.h.bf16 %v3847_v23 }
  0x16   :  { %1248 = vst [vmem:[#allocation1 + $0x168] sm:$0xff] %v3709_v29  ;;  %v2066_v40 = vld [vmem:[#allocation1 + $0x7] ss:$8 sm:$0xf0]  }
  0x17   :  { %1263 = vst [vmem:[#allocation1 + $0x160] sm:$0xff] %v3708_v30  ;;  %v3849_v29 = vld [vmem:[%s4760_s0 + $0x1a0] sm:$0xff]   ;;  %v3585_v30 = vunpack.c.h.bf16 %v3848_v26 }
  0x18   :  { %1278 = vst [vmem:[#allocation1 + $0x158] sm:$0xff] %v3713_v32  ;;  %v3584_v32 = vunpack.c.l.bf16 %v3848_v26  ;;  %v3589_v35 = vunpack.c.h.bf16 %v3849_v29  ;;  %v3588_v36 = vunpack.c.l.bf16 %v3849_v29 }
  0x19   :  { %1293 = vst [vmem:[#allocation1 + $0x150] sm:$0xff] %v3712_v34 }
  0x1a   :  { %v2064_v45 = vld [vmem:[#allocation1 + $0x7] ss:$8 sm:$0xf]   ;;  %1308 = vst [vmem:[#allocation1 + $0x148] sm:$0xff] %v3717_v37 }
  0x1b   :  { %v2068_v47 = vsel %vm1924_vm0, %v2066_v40, %v2064_v45  ;;  %1323 = vst [vmem:[#allocation1 + $0x140] sm:$0xff] %v3716_v38  ;;  %v3863_v37 = vld [vmem:[%s4760_s0 + $0x130] sm:$0xff]  }
  0x1c   :  { %v3915_v50 = vpack.i.bf16 %v2078_v42, %v2068_v47  ;;  %1698 = vst [vmem:[#allocation1 + $0x78] sm:$0xff] %v3769_v41  ;;  %v3640_v41 = vunpack.c.l.bf16 %v3862_v33  ;;  %v3864_v42 = vld [vmem:[%s4760_s0 + $0x128] sm:$0xff]   ;;  %v3645_v44 = vunpack.c.h.bf16 %v3863_v37  ;;  %v3865_v47 = vld [vmem:[%s4760_s0 + $0x120] sm:$0xff]  }
  0x1d   :  { %1713 = vst [vmem:[#allocation1 + $0x70] sm:$0xff] %v3768_v43  ;;  %v3649_v49 = vunpack.c.h.bf16 %v3864_v42  ;;  %v3652_v53 = vunpack.c.l.bf16 %v3865_v47 }
  0x1e   :  { %3916 = vrot.lane.b32.xlu0 %v3915_v50, %s4195_s11  ;;  %1728 = vst [vmem:[#allocation1 + $0x68] sm:$0xff] %v3773_v46  ;;  %v2120_v0 = vld [vmem:[#allocation1 + $0x147] ss:$8 sm:$0xf0]   ;;  %v3644_v46 = vunpack.c.l.bf16 %v3863_v37  ;;  %v3648_v50 = vunpack.c.l.bf16 %v3864_v42 }
  0x1f   :  { %1743 = vst [vmem:[#allocation1 + $0x60] sm:$0xff] %v3772_v48 }
  0x20   :  { %1758 = vst [vmem:[#allocation1 + $0x58] sm:$0xff] %v3777_v51  ;;  %v3870_v51 = vld [vmem:[%s4760_s0 + $0xf8] sm:$0xff]  }
  0x21   :  { %1773 = vst [vmem:[#allocation1 + $0x50] sm:$0xff] %v3776_v52  ;;  %v3653_v52 = vunpack.c.h.bf16 %v3865_v47  ;;  %v3672_v56 = vunpack.c.l.bf16 %v3870_v51 }
  0x22   :  { %1788 = vst [vmem:[#allocation1 + $0x48] sm:$0xff] %v3781_v54  ;;  %v2118_v3 = vld [vmem:[#allocation1 + $0x147] ss:$8 sm:$0xf]  }
  0x23   :  { %1803 = vst [vmem:[#allocation1 + $0x40] sm:$0xff] %v3780_v55  ;;  %v2122_v9 = vsel %vm1924_vm0, %v2120_v0, %v2118_v3  ;;  %v3871_v54 = vld [vmem:[%s4760_s0 + $0xf0] sm:$0xff]   ;;  %v3673_v55 = vunpack.c.h.bf16 %v3870_v51  ;;  %v3886_v0 = vld [vmem:[%s4760_s0 + $0x78] sm:$0xff]  }
  0x24   :  { %378 = vst [vmem:[#allocation1 + $0x338] sm:$0xff] %v3593_v57  ;;  %v3872_v57 = vld [vmem:[%s4760_s0 + $0xe8] sm:$0xff]   ;;  %v3676_v59 = vunpack.c.l.bf16 %v3871_v54  ;;  %v3737_v6 = vunpack.c.h.bf16 %v3886_v0  ;;  %v3874_v51 = vld [vmem:[%s4760_s0 + $0xd8] sm:$0xff]  }
  0x25   :  { %393 = vst [vmem:[#allocation1 + $0x330] sm:$0xff] %v3592_v58  ;;  %v3677_v58 = vunpack.c.h.bf16 %v3871_v54 }
  0x26   :  { %408 = vst [vmem:[#allocation1 + $0x328] sm:$0xff] %v3597_v60  ;;  %v2109_v7 = vld [vmem:[#allocation1 + $0x47] ss:$8 sm:$0xf0]  }
  0x27   :  { %423 = vst [vmem:[#allocation1 + $0x320] sm:$0xff] %v3596_v61  ;;  %v3873_v60 = vld [vmem:[%s4760_s0 + $0xe0] sm:$0xff]   ;;  %v3681_v61 = vunpack.c.h.bf16 %v3872_v57 }
  0x28   :  { %438 = vst [vmem:[#allocation1 + $0x318] sm:$0xff] %v3601_v63  ;;  %v3680_v63 = vunpack.c.l.bf16 %v3872_v57  ;;  %v3685_v2 = vunpack.c.h.bf16 %v3873_v60  ;;  %v3684_v3 = vunpack.c.l.bf16 %v3873_v60  ;;  %v3688_v60 = vunpack.c.l.bf16 %v3874_v51 }
  0x29   :  { %453 = vst [vmem:[#allocation1 + $0x310] sm:$0xff] %v3600_v1 }
  0x2a   :  { %v2107_v12 = vld [vmem:[#allocation1 + $0x47] ss:$8 sm:$0xf]   ;;  %468 = vst [vmem:[#allocation1 + $0x308] sm:$0xff] %v3605_v4 }
  0x2b   :  { %v2111_v14 = vsel %vm1924_vm0, %v2109_v7, %v2107_v12  ;;  %483 = vst [vmem:[#allocation1 + $0x300] sm:$0xff] %v3604_v5  ;;  %v3887_v4 = vld [vmem:[%s4760_s0 + $0x70] sm:$0xff]  }
  0x2c   :  { %v3925_v17 = vpack.i.bf16 %v2122_v9, %v2111_v14  ;;  %858 = vst [vmem:[#allocation1 + $0x238] sm:$0xff] %v3657_v8  ;;  %v3736_v8 = vunpack.c.l.bf16 %v3886_v0  ;;  %v3888_v9 = vld [vmem:[%s4760_s0 + $0x68] sm:$0xff]   ;;  %v3741_v11 = vunpack.c.h.bf16 %v3887_v4  ;;  %v3889_v14 = vld [vmem:[%s4760_s0 + $0x60] sm:$0xff]  }
  0x2d   :  { %873 = vst [vmem:[#allocation1 + $0x230] sm:$0xff] %v3656_v10  ;;  %v3745_v16 = vunpack.c.h.bf16 %v3888_v9  ;;  %v3748_v20 = vunpack.c.l.bf16 %v3889_v14 }
  0x2e   :  { %3926 = vrot.lane.b32.xlu1 %v3925_v17, %s4195_s11  ;;  %888 = vst [vmem:[#allocation1 + $0x228] sm:$0xff] %v3661_v13  ;;  %v2098_v31 = vld [vmem:[#allocation1 + $0x307] ss:$8 sm:$0xf0]   ;;  %v3740_v13 = vunpack.c.l.bf16 %v3887_v4  ;;  %v3744_v17 = vunpack.c.l.bf16 %v3888_v9 }
  0x2f   :  { %903 = vst [vmem:[#allocation1 + $0x220] sm:$0xff] %v3660_v15  ;;  %v2273_v57 = vld [vmem:[#allocation1 + $0x306] ss:$8 sm:$0xf0]  }
  0x30   :  { %918 = vst [vmem:[#allocation1 + $0x218] sm:$0xff] %v3665_v18  ;;  %v3838_v18 = vld [vmem:[%s4760_s0 + $0x1f8] sm:$0xff]   ;;  %v3891_v9 = vld [vmem:[%s4760_s0 + $0x50] sm:$0xff]  }
  0x31   :  { %933 = vst [vmem:[#allocation1 + $0x210] sm:$0xff] %v3664_v19  ;;  %v3749_v19 = vunpack.c.h.bf16 %v3889_v14  ;;  %v3544_v23 = vunpack.c.l.bf16 %v3838_v18  ;;  %v3892_v14 = vld [vmem:[%s4760_s0 + $0x48] sm:$0xff]  }
  0x32   :  { %948 = vst [vmem:[#allocation1 + $0x208] sm:$0xff] %v3669_v21  ;;  %v2096_v34 = vld [vmem:[#allocation1 + $0x307] ss:$8 sm:$0xf]  }
  0x33   :  { %963 = vst [vmem:[#allocation1 + $0x200] sm:$0xff] %v3668_v22  ;;  %v2100_v40 = vsel %vm1924_vm0, %v2098_v31, %v2096_v34  ;;  %v3839_v21 = vld [vmem:[%s4760_s0 + $0x1f0] sm:$0xff]   ;;  %v3545_v22 = vunpack.c.h.bf16 %v3838_v18  ;;  %v3854_v31 = vld [vmem:[%s4760_s0 + $0x178] sm:$0xff]  }
  0x34   :  { %258 = vst [vmem:[#allocation1 + $0x378] sm:$0xff] %v3577_v24  ;;  %v3840_v24 = vld [vmem:[%s4760_s0 + $0x1e8] sm:$0xff]   ;;  %v3548_v26 = vunpack.c.l.bf16 %v3839_v21  ;;  %v3609_v37 = vunpack.c.h.bf16 %v3854_v31 }
  0x35   :  { %273 = vst [vmem:[#allocation1 + $0x370] sm:$0xff] %v3576_v25  ;;  %v3549_v25 = vunpack.c.h.bf16 %v3839_v21  ;;  %v2284_v18 = vld [vmem:[#allocation1 + $0x46] ss:$8 sm:$0xf0]  }
  0x36   :  { %288 = vst [vmem:[#allocation1 + $0x368] sm:$0xff] %v3581_v27  ;;  %v2087_v38 = vld [vmem:[#allocation1 + $0x207] ss:$8 sm:$0xf0]  }
  0x37   :  { %303 = vst [vmem:[#allocation1 + $0x360] sm:$0xff] %v3580_v28  ;;  %v3841_v27 = vld [vmem:[%s4760_s0 + $0x1e0] sm:$0xff]   ;;  %v3553_v28 = vunpack.c.h.bf16 %v3840_v24 }
  0x38   :  { %318 = vst [vmem:[#allocation1 + $0x358] sm:$0xff] %v3585_v30  ;;  %v3552_v30 = vunpack.c.l.bf16 %v3840_v24  ;;  %v3557_v33 = vunpack.c.h.bf16 %v3841_v27  ;;  %v3556_v34 = vunpack.c.l.bf16 %v3841_v27  ;;  %v3893_v21 = vld [vmem:[%s4760_s0 + $0x40] sm:$0xff]   ;;  %v3761_v24 = vunpack.c.h.bf16 %v3892_v14  ;;  %v3842_v27 = vld [vmem:[%s4760_s0 + $0x1d8] sm:$0xff]  }
  0x39   :  { %333 = vst [vmem:[#allocation1 + $0x350] sm:$0xff] %v3584_v32 }
  0x3a   :  { %v2085_v43 = vld [vmem:[#allocation1 + $0x207] ss:$8 sm:$0xf]   ;;  %348 = vst [vmem:[#allocation1 + $0x348] sm:$0xff] %v3589_v35 }
  0x3b   :  { %v2089_v45 = vsel %vm1924_vm0, %v2087_v38, %v2085_v43  ;;  %363 = vst [vmem:[#allocation1 + $0x340] sm:$0xff] %v3588_v36  ;;  %v3855_v35 = vld [vmem:[%s4760_s0 + $0x170] sm:$0xff]  }
  0x3c   :  { %v3920_v48 = vpack.i.bf16 %v2100_v40, %v2089_v45  ;;  %738 = vst [vmem:[#allocation1 + $0x278] sm:$0xff] %v3641_v39  ;;  %v3608_v39 = vunpack.c.l.bf16 %v3854_v31  ;;  %v3856_v40 = vld [vmem:[%s4760_s0 + $0x168] sm:$0xff]   ;;  %v3613_v42 = vunpack.c.h.bf16 %v3855_v35  ;;  %v3857_v45 = vld [vmem:[%s4760_s0 + $0x160] sm:$0xff]  }
  0x3d   :  { %753 = vst [vmem:[#allocation1 + $0x270] sm:$0xff] %v3640_v41  ;;  %v3620_v54 = vunpack.c.l.bf16 %v3857_v45 }
  0x3e   :  { %3921 = vrot.lane.b32.xlu0 %v3920_v48, %s4195_s11  ;;  %768 = vst [vmem:[#allocation1 + $0x268] sm:$0xff] %v3645_v44  ;;  %v2142_v62 = vld [vmem:[#allocation1 + $0x347] ss:$8 sm:$0xf0]   ;;  %v3612_v44 = vunpack.c.l.bf16 %v3855_v35  ;;  %v3617_v48 = vunpack.c.h.bf16 %v3856_v40 }
  0x3f   :  { %783 = vst [vmem:[#allocation1 + $0x260] sm:$0xff] %v3644_v46  ;;  %v2260_v46 = vld [vmem:[#allocation1 + $0x206] ss:$8 sm:$0xf]  }
  0x40   :  { %798 = vst [vmem:[#allocation1 + $0x258] sm:$0xff] %v3649_v49  ;;  %v2262_v49 = vld [vmem:[#allocation1 + $0x206] ss:$8 sm:$0xf0]  }
  0x41   :  { %813 = vst [vmem:[#allocation1 + $0x250] sm:$0xff] %v3648_v50  ;;  %v3616_v50 = vunpack.c.l.bf16 %v3856_v40 }
  0x42   :  { %828 = vst [vmem:[#allocation1 + $0x248] sm:$0xff] %v3653_v52  ;;  %v2140_v1 = vld [vmem:[#allocation1 + $0x347] ss:$8 sm:$0xf]  }
  0x43   :  { %843 = vst [vmem:[#allocation1 + $0x240] sm:$0xff] %v3652_v53  ;;  %v2144_v7 = vsel %vm1924_vm0, %v2142_v62, %v2140_v1  ;;  %v2271_v52 = vld [vmem:[#allocation1 + $0x306] ss:$8 sm:$0xf]   ;;  %v3621_v53 = vunpack.c.h.bf16 %v3857_v45 }
  0x44   :  { %978 = vst [vmem:[#allocation1 + $0x1f8] sm:$0xff] %v3673_v55  ;;  %v3875_v55 = vld [vmem:[%s4760_s0 + $0xd0] sm:$0xff]   ;;  %v3877_v1 = vld [vmem:[%s4760_s0 + $0xc0] sm:$0xff]  }
  0x45   :  { %993 = vst [vmem:[#allocation1 + $0x1f0] sm:$0xff] %v3672_v56  ;;  %v2264_v56 = vsel %vm1924_vm0, %v2262_v49, %v2260_v46  ;;  %v3693_v62 = vunpack.c.h.bf16 %v3875_v55  ;;  %v3692_v0 = vunpack.c.l.bf16 %v3875_v55 }
  0x46   :  { %1008 = vst [vmem:[#allocation1 + $0x1e8] sm:$0xff] %v3677_v58  ;;  %v2131_v5 = vld [vmem:[#allocation1 + $0x247] ss:$8 sm:$0xf0]   ;;  %v3689_v58 = vunpack.c.h.bf16 %v3874_v51 }
  0x47   :  { %1023 = vst [vmem:[#allocation1 + $0x1e0] sm:$0xff] %v3676_v59  ;;  %v2275_v59 = vsel %vm1924_vm0, %v2273_v57, %v2271_v52 }
  0x48   :  { %1038 = vst [vmem:[#allocation1 + $0x1d8] sm:$0xff] %v3681_v61  ;;  %v3876_v61 = vld [vmem:[%s4760_s0 + $0xc8] sm:$0xff]  }
  0x49   :  { %1053 = vst [vmem:[#allocation1 + $0x1d0] sm:$0xff] %v3680_v63  ;;  %v3960_v63 = vpack.i.bf16 %v2275_v59, %v2264_v56  ;;  %v3696_v4 = vunpack.c.l.bf16 %v3876_v61 }
  0x4a   :  { %v2129_v10 = vld [vmem:[#allocation1 + $0x247] ss:$8 sm:$0xf]   ;;  %1068 = vst [vmem:[#allocation1 + $0x1c8] sm:$0xff] %v3685_v2  ;;  %v3697_v2 = vunpack.c.h.bf16 %v3876_v61 }
  0x4b   :  { %v2133_v12 = vsel %vm1924_vm0, %v2131_v5, %v2129_v10  ;;  %1083 = vst [vmem:[#allocation1 + $0x1c0] sm:$0xff] %v3684_v3  ;;  %v3890_v5 = vld [vmem:[%s4760_s0 + $0x58] sm:$0xff]  }
  0x4c   :  { %v3930_v15 = vpack.i.bf16 %v2144_v7, %v2133_v12  ;;  %1458 = vst [vmem:[#allocation1 + $0xf8] sm:$0xff] %v3737_v6  ;;  %v3701_v7 = vunpack.c.h.bf16 %v3877_v1 }
  0x4d   :  { %1473 = vst [vmem:[#allocation1 + $0xf0] sm:$0xff] %v3736_v8  ;;  %v3700_v8 = vunpack.c.l.bf16 %v3877_v1 }
  0x4e   :  { %3931 = vrot.lane.b32.xlu1 %v3930_v15, %s4195_s11  ;;  %1488 = vst [vmem:[#allocation1 + $0xe8] sm:$0xff] %v3741_v11  ;;  %v2208_v29 = vld [vmem:[#allocation1 + $0x1c7] ss:$8 sm:$0xf0]   ;;  %v3753_v11 = vunpack.c.h.bf16 %v3890_v5 }
  0x4f   :  { %1503 = vst [vmem:[#allocation1 + $0xe0] sm:$0xff] %v3740_v13  ;;  %v3752_v13 = vunpack.c.l.bf16 %v3890_v5  ;;  %v3861_v5 = vld [vmem:[%s4760_s0 + $0x140] sm:$0xff]  }
  0x50   :  { %1518 = vst [vmem:[#allocation1 + $0xd8] sm:$0xff] %v3745_v16  ;;  %v3757_v16 = vunpack.c.h.bf16 %v3891_v9 }
  0x51   :  { %1533 = vst [vmem:[#allocation1 + $0xd0] sm:$0xff] %v3744_v17  ;;  %v2282_v17 = vld [vmem:[#allocation1 + $0x46] ss:$8 sm:$0xf]  }
  0x52   :  { %1548 = vst [vmem:[#allocation1 + $0xc8] sm:$0xff] %v3749_v19  ;;  %v2206_v32 = vld [vmem:[#allocation1 + $0x1c7] ss:$8 sm:$0xf]  }
  0x53   :  { %1563 = vst [vmem:[#allocation1 + $0xc0] sm:$0xff] %v3748_v20  ;;  %v2210_v38 = vsel %vm1924_vm0, %v2208_v29, %v2206_v32  ;;  %v3756_v20 = vunpack.c.l.bf16 %v3891_v9  ;;  %v3764_v29 = vunpack.c.l.bf16 %v3893_v21  ;;  %v3561_v32 = vunpack.c.h.bf16 %v3842_v27 }
  0x54   :  { %18 = vst [vmem:[#allocation1 + $0x3f8] sm:$0xff] %v3545_v22  ;;  %v2293_v22 = vld [vmem:[#allocation1 + $0x146] ss:$8 sm:$0xf]  }
  0x55   :  { %33 = vst [vmem:[#allocation1 + $0x3f0] sm:$0xff] %v3544_v23 }
  0x56   :  { %48 = vst [vmem:[#allocation1 + $0x3e8] sm:$0xff] %v3549_v25  ;;  %v2197_v36 = vld [vmem:[#allocation1 + $0xc7] ss:$8 sm:$0xf0]  }
  0x57   :  { %63 = vst [vmem:[#allocation1 + $0x3e0] sm:$0xff] %v3548_v26  ;;  %v2295_v25 = vld [vmem:[#allocation1 + $0x146] ss:$8 sm:$0xf0]   ;;  %v3760_v26 = vunpack.c.l.bf16 %v3892_v14 }
  0x58   :  { %78 = vst [vmem:[#allocation1 + $0x3d8] sm:$0xff] %v3553_v28  ;;  %v3765_v28 = vunpack.c.h.bf16 %v3893_v21  ;;  %v2297_v31 = vsel %vm1924_vm0, %v2295_v25, %v2293_v22  ;;  %v2470_v21 = vld [vmem:[#allocation1 + $0x145] ss:$8 sm:$0xf0]  }
  0x59   :  { %93 = vst [vmem:[#allocation1 + $0x3d0] sm:$0xff] %v3552_v30  ;;  %v2286_v30 = vsel %vm1924_vm0, %v2284_v18, %v2282_v17 }
  0x5a   :  { %v2195_v41 = vld [vmem:[#allocation1 + $0xc7] ss:$8 sm:$0xf]   ;;  %108 = vst [vmem:[#allocation1 + $0x3c8] sm:$0xff] %v3557_v33  ;;  %v3965_v35 = vpack.i.bf16 %v2297_v31, %v2286_v30 }
  0x5b   :  { %v2199_v43 = vsel %vm1924_vm0, %v2197_v36, %v2195_v41  ;;  %123 = vst [vmem:[#allocation1 + $0x3c0] sm:$0xff] %v3556_v34  ;;  %v3843_v33 = vld [vmem:[%s4760_s0 + $0x1d0] sm:$0xff]   ;;  %v3560_v34 = vunpack.c.l.bf16 %v3842_v27  ;;  %v3844_v36 = vld [vmem:[%s4760_s0 + $0x1c8] sm:$0xff]  }
  0x5c   :  { %v3945_v47 = vpack.i.bf16 %v2210_v38, %v2199_v43  ;;  %498 = vst [vmem:[#allocation1 + $0x2f8] sm:$0xff] %v3609_v37  ;;  %v3565_v37 = vunpack.c.h.bf16 %v3843_v33  ;;  %v3569_v41 = vunpack.c.h.bf16 %v3844_v36  ;;  %v3568_v46 = vunpack.c.l.bf16 %v3844_v36  ;;  %v2239_v27 = vld [vmem:[#allocation1 + $0x6] ss:$8 sm:$0xf]  }
  0x5d   :  { %513 = vst [vmem:[#allocation1 + $0x2f0] sm:$0xff] %v3608_v39  ;;  %v3564_v39 = vunpack.c.l.bf16 %v3843_v33  ;;  %v2251_v33 = vld [vmem:[#allocation1 + $0x106] ss:$8 sm:$0xf0]  }
  0x5e   :  { %3946 = vrot.lane.b32.xlu0 %v3945_v47, %s4195_s11  ;;  %528 = vst [vmem:[#allocation1 + $0x2e8] sm:$0xff] %v3613_v42  ;;  %v2230_v3 = vld [vmem:[#allocation1 + $0x3c7] ss:$8 sm:$0xf0]  }
  0x5f   :  { %543 = vst [vmem:[#allocation1 + $0x2e0] sm:$0xff] %v3612_v44  ;;  %v3845_v42 = vld [vmem:[%s4760_s0 + $0x1c0] sm:$0xff]   ;;  %v3858_v47 = vld [vmem:[%s4760_s0 + $0x158] sm:$0xff]  }
  0x60   :  { %558 = vst [vmem:[#allocation1 + $0x2d8] sm:$0xff] %v3617_v48  ;;  %v3573_v49 = vunpack.c.h.bf16 %v3845_v42  ;;  %v3572_v52 = vunpack.c.l.bf16 %v3845_v42  ;;  %v3625_v56 = vunpack.c.h.bf16 %v3858_v47  ;;  %v3624_v61 = vunpack.c.l.bf16 %v3858_v47  ;;  %v2414_v36 = vld [vmem:[#allocation1 + $0x5] ss:$8 sm:$0xf]  }
  0x61   :  { %573 = vst [vmem:[#allocation1 + $0x2d0] sm:$0xff] %v3616_v50 }
  0x62   :  { %588 = vst [vmem:[#allocation1 + $0x2c8] sm:$0xff] %v3621_v53  ;;  %v2228_v6 = vld [vmem:[#allocation1 + $0x3c7] ss:$8 sm:$0xf]  }
  0x63   :  { %603 = vst [vmem:[#allocation1 + $0x2c0] sm:$0xff] %v3620_v54  ;;  %v2232_v12 = vsel %vm1924_vm0, %v2230_v3, %v2228_v6  ;;  %v3859_v53 = vld [vmem:[%s4760_s0 + $0x150] sm:$0xff]  }
  0x64   :  { %1098 = vst [vmem:[#allocation1 + $0x1b8] sm:$0xff] %v3689_v58  ;;  %v2405_v3 = vld [vmem:[#allocation1 + $0x3c6] ss:$8 sm:$0xf0]  }
  0x65   :  { %1113 = vst [vmem:[#allocation1 + $0x1b0] sm:$0xff] %v3688_v60 }
  0x66   :  { %1128 = vst [vmem:[#allocation1 + $0x1a8] sm:$0xff] %v3693_v62  ;;  %3961 = vrot.lane.b32.xlu0 %v3960_v63, %s4196_s28  ;;  %v2219_v10 = vld [vmem:[#allocation1 + $0x2c7] ss:$8 sm:$0xf0]  }
  0x67   :  { %1143 = vst [vmem:[#allocation1 + $0x1a0] sm:$0xff] %v3692_v0  ;;  %v2394_v58 = vld [vmem:[#allocation1 + $0x2c6] ss:$8 sm:$0xf0]  }
  0x68   :  { %1158 = vst [vmem:[#allocation1 + $0x198] sm:$0xff] %v3697_v2  ;;  %v3860_v62 = vld [vmem:[%s4760_s0 + $0x148] sm:$0xff]   ;;  %v3629_v2 = vunpack.c.h.bf16 %v3859_v53  ;;  %s4197_s0 = smov 80  }
  0x69   :  { %1173 = vst [vmem:[#allocation1 + $0x190] sm:$0xff] %v3696_v4  ;;  %v2403_v63 = vld [vmem:[#allocation1 + $0x3c6] ss:$8 sm:$0xf]   ;;  %v3628_v4 = vunpack.c.l.bf16 %v3859_v53  ;;  %v3633_v6 = vunpack.c.h.bf16 %v3860_v62 }
  0x6a   :  { %v2217_v15 = vld [vmem:[#allocation1 + $0x2c7] ss:$8 sm:$0xf]   ;;  %1188 = vst [vmem:[#allocation1 + $0x188] sm:$0xff] %v3701_v7  ;;  %v3632_v7 = vunpack.c.l.bf16 %v3860_v62  ;;  %v2407_v9 = vsel %vm1924_vm0, %v2405_v3, %v2403_v63 }
  0x6b   :  { %v2221_v19 = vsel %vm1924_vm0, %v2219_v10, %v2217_v15  ;;  %1203 = vst [vmem:[#allocation1 + $0x180] sm:$0xff] %v3700_v8  ;;  %v2392_v57 = vld [vmem:[#allocation1 + $0x2c6] ss:$8 sm:$0xf]   ;;  %v3637_v10 = vunpack.c.h.bf16 %v3861_v5 }
  0x6c   :  { %v3950_v23 = vpack.i.bf16 %v2232_v12, %v2221_v19  ;;  %1578 = vst [vmem:[#allocation1 + $0xb8] sm:$0xff] %v3753_v11  ;;  %v2396_v8 = vsel %vm1924_vm0, %v2394_v58, %v2392_v57  ;;  %v3636_v11 = vunpack.c.l.bf16 %v3861_v5  ;;  %v2457_v15 = vld [vmem:[#allocation1 + $0x45] ss:$8 sm:$0xf]  }
  0x6d   :  { %1593 = vst [vmem:[#allocation1 + $0xb0] sm:$0xff] %v3752_v13  ;;  %v3990_v12 = vpack.i.bf16 %v2407_v9, %v2396_v8  ;;  %v2315_v57 = vld [vmem:[#allocation1 + $0x346] ss:$8 sm:$0xf]  }
  0x6e   :  { %3951 = vrot.lane.b32.xlu1 %v3950_v23, %s4195_s11  ;;  %1608 = vst [vmem:[#allocation1 + $0xa8] sm:$0xff] %v3757_v16  ;;  %v2164_v38 = vld [vmem:[#allocation1 + $0x187] ss:$8 sm:$0xf0]  }
  0x6f   :  { %1623 = vst [vmem:[#allocation1 + $0xa0] sm:$0xff] %v3756_v20  ;;  %v2339_v40 = vld [vmem:[#allocation1 + $0x186] ss:$8 sm:$0xf0]  }
  0x70   :  { %1638 = vst [vmem:[#allocation1 + $0x98] sm:$0xff] %v3761_v24  ;;  %v2459_v16 = vld [vmem:[#allocation1 + $0x45] ss:$8 sm:$0xf0]  }
  0x71   :  { %1653 = vst [vmem:[#allocation1 + $0x90] sm:$0xff] %v3760_v26  ;;  %v2461_v19 = vsel %vm1924_vm0, %v2459_v16, %v2457_v15  ;;  %v2468_v20 = vld [vmem:[#allocation1 + $0x145] ss:$8 sm:$0xf]  }
  0x72   :  { %1668 = vst [vmem:[#allocation1 + $0x88] sm:$0xff] %v3765_v28  ;;  %v2162_v43 = vld [vmem:[#allocation1 + $0x187] ss:$8 sm:$0xf]   ;;  %v2472_v24 = vsel %vm1924_vm0, %v2470_v21, %v2468_v20 }
  0x73   :  { %1683 = vst [vmem:[#allocation1 + $0x80] sm:$0xff] %v3764_v29  ;;  %v2337_v44 = vld [vmem:[#allocation1 + $0x186] ss:$8 sm:$0xf]   ;;  %v2166_v50 = vsel %vm1924_vm0, %v2164_v38, %v2162_v43  ;;  %v4005_v29 = vpack.i.bf16 %v2472_v24, %v2461_v19 }
  0x74   :  { %138 = vst [vmem:[#allocation1 + $0x3b8] sm:$0xff] %v3561_v32  ;;  %v2341_v51 = vsel %vm1924_vm0, %v2339_v40, %v2337_v44  ;;  %v2241_v28 = vld [vmem:[#allocation1 + $0x6] ss:$8 sm:$0xf0]  }
  0x75   :  { %153 = vst [vmem:[#allocation1 + $0x3b0] sm:$0xff] %v3560_v34  ;;  %v2249_v32 = vld [vmem:[#allocation1 + $0x106] ss:$8 sm:$0xf]   ;;  %v2243_v44 = vsel %vm1924_vm0, %v2241_v28, %v2239_v27 }
  0x76   :  { %3966 = vrot.lane.b32.xlu1 %v3965_v35, %s4196_s28  ;;  %v2153_v45 = vld [vmem:[#allocation1 + $0x87] ss:$8 sm:$0xf0]   ;;  %168 = vst [vmem:[#allocation1 + $0x3a8] sm:$0xff] %v3565_v37 }
  0x77   :  { %v2328_v48 = vld [vmem:[#allocation1 + $0x86] ss:$8 sm:$0xf0]   ;;  %183 = vst [vmem:[#allocation1 + $0x3a0] sm:$0xff] %v3564_v39 }
  0x78   :  { %198 = vst [vmem:[#allocation1 + $0x398] sm:$0xff] %v3569_v41  ;;  %v2416_v37 = vld [vmem:[#allocation1 + $0x5] ss:$8 sm:$0xf0]  }
  0x79   :  { %213 = vst [vmem:[#allocation1 + $0x390] sm:$0xff] %v3568_v46  ;;  %v2424_v40 = vld [vmem:[#allocation1 + $0x105] ss:$8 sm:$0xf]  }
  0x7a   :  { %v2151_v54 = vld [vmem:[#allocation1 + $0x87] ss:$8 sm:$0xf]   ;;  %v2326_v55 = vld [vmem:[#allocation1 + $0x86] ss:$8 sm:$0xf]  }
  0x7b   :  { %v2155_v59 = vsel %vm1924_vm0, %v2153_v45, %v2151_v54  ;;  %v2330_v60 = vsel %vm1924_vm0, %v2328_v48, %v2326_v55  ;;  %228 = vst [vmem:[#allocation1 + $0x388] sm:$0xff] %v3573_v49  ;;  %v2426_v41 = vld [vmem:[#allocation1 + $0x105] ss:$8 sm:$0xf0]   ;;  %v2253_v48 = vsel %vm1924_vm0, %v2251_v33, %v2249_v32  ;;  %v2418_v49 = vsel %vm1924_vm0, %v2416_v37, %v2414_v36 }
  0x7c   :  { %v3935_v0 = vpack.i.bf16 %v2166_v50, %v2155_v59  ;;  %v3975_v1 = vpack.i.bf16 %v2341_v51, %v2330_v60  ;;  %243 = vst [vmem:[#allocation1 + $0x380] sm:$0xff] %v3572_v52  ;;  %v2428_v50 = vsel %vm1924_vm0, %v2426_v41, %v2424_v40  ;;  %v3955_v53 = vpack.i.bf16 %v2253_v48, %v2243_v44  ;;  %v2304_v55 = vld [vmem:[#allocation1 + $0x246] ss:$8 sm:$0xf]  }
  0x7d   :  { %618 = vst [vmem:[#allocation1 + $0x2b8] sm:$0xff] %v3625_v56  ;;  %v3995_v54 = vpack.i.bf16 %v2428_v50, %v2418_v49  ;;  %v2306_v56 = vld [vmem:[#allocation1 + $0x246] ss:$8 sm:$0xf0]  }
  0x7e   :  { %3936 = vrot.lane.b32.xlu2 %v3935_v0, %s4195_s11  ;;  %3976 = vrot.lane.b32.xlu0 %v3975_v1, %s4196_s28  ;;  %633 = vst [vmem:[#allocation1 + $0x2b0] sm:$0xff] %v3624_v61  ;;  %v2186_v13 = vld [vmem:[#allocation1 + $0x387] ss:$8 sm:$0xf0]   ;;  %v2308_v5 = vsel %vm1924_vm0, %v2306_v56, %v2304_v55 }
  0x7f   :  { %648 = vst [vmem:[#allocation1 + $0x2a8] sm:$0xff] %v3629_v2  ;;  %v2361_v14 = vld [vmem:[#allocation1 + $0x386] ss:$8 sm:$0xf0]  }
  0x80   :  { %663 = vst [vmem:[#allocation1 + $0x2a0] sm:$0xff] %v3628_v4  ;;  %v2536_v47 = vld [vmem:[#allocation1 + $0x385] ss:$8 sm:$0xf0]  }
  0x81   :  { %678 = vst [vmem:[#allocation1 + $0x298] sm:$0xff] %v3633_v6  ;;  %v2317_v58 = vld [vmem:[#allocation1 + $0x346] ss:$8 sm:$0xf0]  }
  0x82   :  { %693 = vst [vmem:[#allocation1 + $0x290] sm:$0xff] %v3632_v7  ;;  %v2479_v59 = vld [vmem:[#allocation1 + $0x245] ss:$8 sm:$0xf]   ;;  %v2319_v6 = vsel %vm1924_vm0, %v2317_v58, %v2315_v57 }
  0x83   :  { %708 = vst [vmem:[#allocation1 + $0x288] sm:$0xff] %v3637_v10  ;;  %v2184_v17 = vld [vmem:[#allocation1 + $0x387] ss:$8 sm:$0xf]  }
  0x84   :  { %723 = vst [vmem:[#allocation1 + $0x280] sm:$0xff] %v3636_v11  ;;  %v2359_v18 = vld [vmem:[#allocation1 + $0x386] ss:$8 sm:$0xf]   ;;  %v2188_v25 = vsel %vm1924_vm0, %v2186_v13, %v2184_v17 }
  0x85   :  { %v2363_v26 = vsel %vm1924_vm0, %v2361_v14, %v2359_v18  ;;  %v2534_v46 = vld [vmem:[#allocation1 + $0x385] ss:$8 sm:$0xf]   ;;  %v2589_v63 = vld [vmem:[#allocation1 + $0x4] ss:$8 sm:$0xf]  }
  0x86   :  { %3991 = vrot.lane.b32.xlu0 %v3990_v12, %s4196_s28  ;;  %v2538_v51 = vsel %vm1924_vm0, %v2536_v47, %v2534_v46  ;;  %v2481_v60 = vld [vmem:[#allocation1 + $0x245] ss:$8 sm:$0xf0]   ;;  %v2591_v0 = vld [vmem:[#allocation1 + $0x4] ss:$8 sm:$0xf0]   ;;  %v3970_v12 = vpack.i.bf16 %v2319_v6, %v2308_v5 }
  0x87   :  { %v2175_v22 = vld [vmem:[#allocation1 + $0x287] ss:$8 sm:$0xf0]   ;;  %v2350_v23 = vld [vmem:[#allocation1 + $0x286] ss:$8 sm:$0xf0]   ;;  %v2593_v3 = vsel %vm1924_vm0, %v2591_v0, %v2589_v63  ;;  %v2483_v7 = vsel %vm1924_vm0, %v2481_v60, %v2479_v59 }
  0x88   :  { %v2525_v43 = vld [vmem:[#allocation1 + $0x285] ss:$8 sm:$0xf0]   ;;  %v2599_v1 = vld [vmem:[#allocation1 + $0x104] ss:$8 sm:$0xf]  }
  0x89   :  { %v2490_v61 = vld [vmem:[#allocation1 + $0x345] ss:$8 sm:$0xf]   ;;  %v2601_v2 = vld [vmem:[#allocation1 + $0x104] ss:$8 sm:$0xf0]  }
  0x8a   :  { %v2492_v62 = vld [vmem:[#allocation1 + $0x345] ss:$8 sm:$0xf0]   ;;  %v2603_v4 = vsel %vm1924_vm0, %v2601_v2, %v2599_v1  ;;  %v2654_v10 = vld [vmem:[#allocation1 + $0x244] ss:$8 sm:$0xf]  }
  0x8b   :  { %v2173_v30 = vld [vmem:[#allocation1 + $0x287] ss:$8 sm:$0xf]   ;;  %v2348_v31 = vld [vmem:[#allocation1 + $0x286] ss:$8 sm:$0xf]   ;;  %v2494_v8 = vsel %vm1924_vm0, %v2492_v62, %v2490_v61  ;;  %v4035_v9 = vpack.i.bf16 %v2603_v4, %v2593_v3 }
  0x8c   :  { %v2177_v34 = vsel %vm1924_vm0, %v2175_v22, %v2173_v30  ;;  %v2352_v35 = vsel %vm1924_vm0, %v2350_v23, %v2348_v31  ;;  %v2523_v42 = vld [vmem:[#allocation1 + $0x285] ss:$8 sm:$0xf]   ;;  %v2656_v11 = vld [vmem:[#allocation1 + $0x244] ss:$8 sm:$0xf0]   ;;  %v4010_v13 = vpack.i.bf16 %v2494_v8, %v2483_v7 }
  0x8d   :  { %v3940_v38 = vpack.i.bf16 %v2188_v25, %v2177_v34  ;;  %v3980_v39 = vpack.i.bf16 %v2363_v26, %v2352_v35  ;;  %v2527_v45 = vsel %vm1924_vm0, %v2525_v43, %v2523_v42  ;;  %v2370_v14 = vld [vmem:[#allocation1 + $0xc6] ss:$8 sm:$0xf]   ;;  %v2665_v18 = vld [vmem:[#allocation1 + $0x344] ss:$8 sm:$0xf]   ;;  %v2658_v24 = vsel %vm1924_vm0, %v2656_v11, %v2654_v10 }
  0x8e   :  { %4006 = vrot.lane.b32.xlu0 %v4005_v29, %s4197_s0  ;;  %v4020_v52 = vpack.i.bf16 %v2538_v51, %v2527_v45  ;;  %v2372_v15 = vld [vmem:[#allocation1 + $0xc6] ss:$8 sm:$0xf0]   ;;  %v2667_v19 = vld [vmem:[#allocation1 + $0x344] ss:$8 sm:$0xf0]  }
  0x8f   :  { %3941 = vrot.lane.b32.xlu2 %v3940_v38, %s4195_s11  ;;  %3981 = vrot.lane.b32.xlu1 %v3980_v39, %s4196_s28  ;;  %v2381_v16 = vld [vmem:[#allocation1 + $0x1c6] ss:$8 sm:$0xf]   ;;  %v2545_v20 = vld [vmem:[#allocation1 + $0xc5] ss:$8 sm:$0xf]   ;;  %v2669_v25 = vsel %vm1924_vm0, %v2667_v19, %v2665_v18  ;;  %v2374_v26 = vsel %vm1924_vm0, %v2372_v15, %v2370_v14 }
  0x90   :  { %v2383_v17 = vld [vmem:[#allocation1 + $0x1c6] ss:$8 sm:$0xf0]   ;;  %v2547_v21 = vld [vmem:[#allocation1 + $0xc5] ss:$8 sm:$0xf0]   ;;  %v4050_v30 = vpack.i.bf16 %v2669_v25, %v2658_v24 }
  0x91   :  { %v2556_v22 = vld [vmem:[#allocation1 + $0x1c5] ss:$8 sm:$0xf]   ;;  %s4198_s11 = smov 64   ;;  %v2385_v27 = vsel %vm1924_vm0, %v2383_v17, %v2381_v16  ;;  %v2549_v28 = vsel %vm1924_vm0, %v2547_v21, %v2545_v20 }
  0x92   :  { %v2558_v23 = vld [vmem:[#allocation1 + $0x1c5] ss:$8 sm:$0xf0]   ;;  %v2720_v31 = vld [vmem:[#allocation1 + $0xc4] ss:$8 sm:$0xf]   ;;  %v3985_v33 = vpack.i.bf16 %v2385_v27, %v2374_v26 }
  0x93   :  { %v2560_v29 = vsel %vm1924_vm0, %v2558_v23, %v2556_v22  ;;  %v2722_v32 = vld [vmem:[#allocation1 + $0xc4] ss:$8 sm:$0xf0]   ;;  %v2435_v35 = vld [vmem:[#allocation1 + $0x205] ss:$8 sm:$0xf]  }
  0x94   :  { %v4025_v34 = vpack.i.bf16 %v2560_v29, %v2549_v28  ;;  %v2437_v36 = vld [vmem:[#allocation1 + $0x205] ss:$8 sm:$0xf0]   ;;  %v2731_v39 = vld [vmem:[#allocation1 + $0x1c4] ss:$8 sm:$0xf]   ;;  %v2724_v45 = vsel %vm1924_vm0, %v2722_v32, %v2720_v31 }
  0x95   :  { %v2446_v37 = vld [vmem:[#allocation1 + $0x305] ss:$8 sm:$0xf]   ;;  %v2733_v40 = vld [vmem:[#allocation1 + $0x1c4] ss:$8 sm:$0xf0]   ;;  %v2439_v47 = vsel %vm1924_vm0, %v2437_v36, %v2435_v35 }
  0x96   :  { %4021 = vrot.lane.b32.xlu0 %v4020_v52, %s4197_s0  ;;  %v2448_v38 = vld [vmem:[#allocation1 + $0x305] ss:$8 sm:$0xf0]   ;;  %v2610_v41 = vld [vmem:[#allocation1 + $0x204] ss:$8 sm:$0xf]   ;;  %v2735_v46 = vsel %vm1924_vm0, %v2733_v40, %v2731_v39 }
  0x97   :  { %3956 = vrot.lane.b32.xlu2 %v3955_v53, %s4196_s28  ;;  %3996 = vrot.lane.b32.xlu1 %v3995_v54, %s4197_s0  ;;  %v2612_v42 = vld [vmem:[#allocation1 + $0x204] ss:$8 sm:$0xf0]   ;;  %v2450_v48 = vsel %vm1924_vm0, %v2448_v38, %v2446_v37  ;;  %v4065_v51 = vpack.i.bf16 %v2735_v46, %v2724_v45  ;;  %v2785_v52 = vld [vmem:[#allocation1 + $0x203] ss:$8 sm:$0xf]  }
  0x98   :  { %v2621_v43 = vld [vmem:[#allocation1 + $0x304] ss:$8 sm:$0xf]   ;;  %v2614_v49 = vsel %vm1924_vm0, %v2612_v42, %v2610_v41  ;;  %v2787_v53 = vld [vmem:[#allocation1 + $0x203] ss:$8 sm:$0xf0]   ;;  %v4000_v54 = vpack.i.bf16 %v2450_v48, %v2439_v47 }
  0x99   :  { %v2623_v44 = vld [vmem:[#allocation1 + $0x304] ss:$8 sm:$0xf0]   ;;  %v2501_v56 = vld [vmem:[#allocation1 + $0x85] ss:$8 sm:$0xf]   ;;  %v2789_v2 = vsel %vm1924_vm0, %v2787_v53, %v2785_v52 }
  0x9a   :  { %v2625_v50 = vsel %vm1924_vm0, %v2623_v44, %v2621_v43  ;;  %v2503_v57 = vld [vmem:[#allocation1 + $0x85] ss:$8 sm:$0xf0]   ;;  %v2796_v60 = vld [vmem:[#allocation1 + $0x303] ss:$8 sm:$0xf]  }
  0x9b   :  { %v4040_v55 = vpack.i.bf16 %v2625_v50, %v2614_v49  ;;  %v2512_v58 = vld [vmem:[#allocation1 + $0x185] ss:$8 sm:$0xf]   ;;  %v2798_v61 = vld [vmem:[#allocation1 + $0x303] ss:$8 sm:$0xf0]   ;;  %v2505_v4 = vsel %vm1924_vm0, %v2503_v57, %v2501_v56  ;;  %v3917_v50 = vpop.permute.xlu0 %3916 }
  0x9c   :  { %v2514_v59 = vld [vmem:[#allocation1 + $0x185] ss:$8 sm:$0xf0]   ;;  %v2676_v62 = vld [vmem:[#allocation1 + $0x84] ss:$8 sm:$0xf]   ;;  %v2800_v3 = vsel %vm1924_vm0, %v2798_v61, %v2796_v60  ;;  %v3919_v61 = vunpack.i.h.bf16 %v3917_v50 }
  0x9d   :  { %v2678_v63 = vld [vmem:[#allocation1 + $0x84] ss:$8 sm:$0xf0]   ;;  %v2516_v5 = vsel %vm1924_vm0, %v2514_v59, %v2512_v58  ;;  %v4080_v8 = vpack.i.bf16 %v2800_v3, %v2789_v2  ;;  %v2853_v10 = vld [vmem:[#allocation1 + $0x83] ss:$8 sm:$0xf0]  }
  0x9e   :  { %4036 = vrot.lane.b32.xlu0 %v4035_v9, %s4198_s11  ;;  %v2687_v0 = vld [vmem:[#allocation1 + $0x184] ss:$8 sm:$0xf]   ;;  %v2680_v6 = vsel %vm1924_vm0, %v2678_v63, %v2676_v62  ;;  %v2851_v9 = vld [vmem:[#allocation1 + $0x83] ss:$8 sm:$0xf]   ;;  %v4015_v11 = vpack.i.bf16 %v2516_v5, %v2505_v4  ;;  %v3918_v62 = vunpack.i.l.bf16 %v3917_v50 }
  0x9f   :  { %3971 = vrot.lane.b32.xlu2 %v3970_v12, %s4196_s28  ;;  %4011 = vrot.lane.b32.xlu1 %v4010_v13, %s4197_s0  ;;  %v2689_v1 = vld [vmem:[#allocation1 + $0x184] ss:$8 sm:$0xf0]   ;;  %v2567_v13 = vld [vmem:[#allocation1 + $0x2c5] ss:$8 sm:$0xf]   ;;  %v2855_v23 = vsel %vm1924_vm0, %v2853_v10, %v2851_v9 }
  0xa0   :  { %v2691_v7 = vsel %vm1924_vm0, %v2689_v1, %v2687_v0  ;;  %v2569_v14 = vld [vmem:[#allocation1 + $0x2c5] ss:$8 sm:$0xf0]   ;;  %v2862_v17 = vld [vmem:[#allocation1 + $0x183] ss:$8 sm:$0xf]  }
  0xa1   :  { %v4055_v12 = vpack.i.bf16 %v2691_v7, %v2680_v6  ;;  %v2578_v15 = vld [vmem:[#allocation1 + $0x3c5] ss:$8 sm:$0xf]   ;;  %v2864_v18 = vld [vmem:[#allocation1 + $0x183] ss:$8 sm:$0xf0]   ;;  %v2571_v25 = vsel %vm1924_vm0, %v2569_v14, %v2567_v13 }
  0xa2   :  { %v2580_v16 = vld [vmem:[#allocation1 + $0x3c5] ss:$8 sm:$0xf0]   ;;  %v2742_v19 = vld [vmem:[#allocation1 + $0x2c4] ss:$8 sm:$0xf]   ;;  %v2866_v24 = vsel %vm1924_vm0, %v2864_v18, %v2862_v17 }
  0xa3   :  { %v2744_v20 = vld [vmem:[#allocation1 + $0x2c4] ss:$8 sm:$0xf0]   ;;  %v2582_v26 = vsel %vm1924_vm0, %v2580_v16, %v2578_v15  ;;  %v4095_v29 = vpack.i.bf16 %v2866_v24, %v2855_v23  ;;  %v2919_v35 = vld [vmem:[#allocation1 + $0x2c3] ss:$8 sm:$0xf0]  }
  0xa4   :  { %v2753_v21 = vld [vmem:[#allocation1 + $0x3c4] ss:$8 sm:$0xf]   ;;  %v2746_v27 = vsel %vm1924_vm0, %v2744_v20, %v2742_v19  ;;  %v4030_v36 = vpack.i.bf16 %v2582_v26, %v2571_v25  ;;  %v2928_v38 = vld [vmem:[#allocation1 + $0x3c3] ss:$8 sm:$0xf]  }
  0xa5   :  { %v2755_v22 = vld [vmem:[#allocation1 + $0x3c4] ss:$8 sm:$0xf0]   ;;  %v2930_v39 = vld [vmem:[#allocation1 + $0x3c3] ss:$8 sm:$0xf0]  }
  0xa6   :  { %4051 = vrot.lane.b32.xlu0 %v4050_v30, %s4198_s11  ;;  %v2757_v28 = vsel %vm1924_vm0, %v2755_v22, %v2753_v21  ;;  %v2632_v30 = vld [vmem:[#allocation1 + $0x44] ss:$8 sm:$0xf]   ;;  %v2807_v40 = vld [vmem:[#allocation1 + $0x43] ss:$8 sm:$0xf]   ;;  %v2932_v45 = vsel %vm1924_vm0, %v2930_v39, %v2928_v38 }
  0xa7   :  { %3986 = vrot.lane.b32.xlu2 %v3985_v33, %s4196_s28  ;;  %4026 = vrot.lane.b32.xlu1 %v4025_v34, %s4197_s0  ;;  %v2634_v31 = vld [vmem:[#allocation1 + $0x44] ss:$8 sm:$0xf0]   ;;  %v2917_v34 = vld [vmem:[#allocation1 + $0x2c3] ss:$8 sm:$0xf]   ;;  %v4070_v37 = vpack.i.bf16 %v2757_v28, %v2746_v27 }
  0xa8   :  { %v2643_v32 = vld [vmem:[#allocation1 + $0x144] ss:$8 sm:$0xf]   ;;  %v2809_v41 = vld [vmem:[#allocation1 + $0x43] ss:$8 sm:$0xf0]   ;;  %v2921_v44 = vsel %vm1924_vm0, %v2919_v35, %v2917_v34  ;;  %v2636_v46 = vsel %vm1924_vm0, %v2634_v31, %v2632_v30 }
  0xa9   :  { %v2645_v33 = vld [vmem:[#allocation1 + $0x144] ss:$8 sm:$0xf0]   ;;  %v2818_v42 = vld [vmem:[#allocation1 + $0x143] ss:$8 sm:$0xf]   ;;  %v2811_v52 = vsel %vm1924_vm0, %v2809_v41, %v2807_v40  ;;  %v4110_v56 = vpack.i.bf16 %v2932_v45, %v2921_v44 }
  0xaa   :  { %v2820_v43 = vld [vmem:[#allocation1 + $0x143] ss:$8 sm:$0xf0]   ;;  %v2647_v47 = vsel %vm1924_vm0, %v2645_v33, %v2643_v32  ;;  %v1922_v48 = vld [vmem:[#allocation1] ss:$8 sm:$0xf]  }
  0xab   :  { %v1923_v49 = vld [vmem:[#allocation1] ss:$8 sm:$0xf0]   ;;  %v2822_v53 = vsel %vm1924_vm0, %v2820_v43, %v2818_v42  ;;  %v2982_v57 = vld [vmem:[#allocation1 + $0x42] ss:$8 sm:$0xf]   ;;  %v4045_v3 = vpack.i.bf16 %v2647_v47, %v2636_v46 }
  0xac   :  { %v2984_v58 = vld [vmem:[#allocation1 + $0x42] ss:$8 sm:$0xf0]   ;;  %v1958_v63 = vld [vmem:[#allocation1 + $0x100] ss:$8 sm:$0xf0]   ;;  %v4085_v4 = vpack.i.bf16 %v2822_v53, %v2811_v52 }
  0xad   :  { %v2993_v59 = vld [vmem:[#allocation1 + $0x142] ss:$8 sm:$0xf]   ;;  %v1929_v1 = vld [vmem:[#allocation1 + $0x40] ss:$8 sm:$0xf]   ;;  %v2986_v20 = vsel %vm1924_vm0, %v2984_v58, %v2982_v57 }
  0xae   :  { %4066 = vrot.lane.b32.xlu0 %v4065_v51, %s4198_s11  ;;  %v3927_v51 = vpop.permute.xlu1 %3926  ;;  %v2995_v60 = vld [vmem:[#allocation1 + $0x142] ss:$8 sm:$0xf0]   ;;  %v1931_v2 = vld [vmem:[#allocation1 + $0x40] ss:$8 sm:$0xf0]  }
  0xaf   :  { %4001 = vrot.lane.b32.xlu2 %v4000_v54, %s4197_s0  ;;  %4041 = vrot.lane.b32.xlu1 %v4040_v55, %s4198_s11  ;;  %v1925_v54 = vsel %vm1924_vm0, %v1923_v49, %v1922_v48  ;;  %v1956_v55 = vld [vmem:[#allocation1 + $0x100] ss:$8 sm:$0xf]   ;;  %v2698_v5 = vld [vmem:[#allocation1 + $0x284] ss:$8 sm:$0xf]   ;;  %v1933_v13 = vsel %vm1924_vm0, %v1931_v2, %v1929_v1  ;;  %v3928_v15 = vunpack.i.l.bf16 %v3927_v51  ;;  %v3929_v17 = vunpack.i.h.bf16 %v3927_v51 }
  0xb0   :  { %1927 = vst.msk [vmem:[#allocation0] sm:$0xff] %vm1926_vm1, %v1925_v54   ;;  %v1960_v0 = vsel %vm1924_vm0, %v1958_v63, %v1956_v55  ;;  %v2700_v6 = vld [vmem:[#allocation1 + $0x284] ss:$8 sm:$0xf0]   ;;  %v2997_v21 = vsel %vm1924_vm0, %v2995_v60, %v2993_v59  ;;  %v4522_v25 = vpop.permute.xlu0 %3921 }
  0xb1   :  { %v2709_v7 = vld [vmem:[#allocation1 + $0x384] ss:$8 sm:$0xf]   ;;  %v2873_v9 = vld [vmem:[#allocation1 + $0x283] ss:$8 sm:$0xf]   ;;  %v2702_v27 = vsel %vm1924_vm0, %v2700_v6, %v2698_v5  ;;  %v4125_v32 = vpack.i.bf16 %v2997_v21, %v2986_v20  ;;  %v3923_v59 = vunpack.i.l.bf16 %v4522_v25 }
  0xb2   :  { %v2875_v10 = vld [vmem:[#allocation1 + $0x283] ss:$8 sm:$0xf0]   ;;  %1963 = vst.msk [vmem:[#allocation0 + $0x20] sm:$0xff] %vm1926_vm1, %v1960_v0  }
  0xb3   :  { %v1965_v14 = vld [vmem:[#allocation1 + $0x140] ss:$8 sm:$0xf]   ;;  %2072 = vst.msk [vmem:[#allocation0] sm:$0xff] %vm2071_vm2, %v3918_v62  }
  0xb4   :  { %v1967_v16 = vld [vmem:[#allocation1 + $0x140] ss:$8 sm:$0xf0]   ;;  %2083 = vst.msk [vmem:[#allocation0 + $0x20] sm:$0xff] %vm2071_vm2, %v3919_v61  }
  0xb5   :  { %v1969_v18 = vsel %vm1924_vm0, %v1967_v16, %v1965_v14  ;;  %v1938_v19 = vld [vmem:[#allocation1 + $0x80] ss:$8 sm:$0xf]   ;;  %1936 = vst.msk [vmem:[#allocation0 + $0x8] sm:$0xff] %vm1926_vm1, %v1933_v13  }
  0xb6   :  { %4081 = vrot.lane.b32.xlu0 %v4080_v8, %s4199_s23  ;;  %v2711_v8 = vld [vmem:[#allocation1 + $0x384] ss:$8 sm:$0xf0]   ;;  %v1940_v22 = vld [vmem:[#allocation1 + $0x80] ss:$8 sm:$0xf0]  }
  0xb7   :  { %4016 = vrot.lane.b32.xlu2 %v4015_v11, %s4197_s0  ;;  %4056 = vrot.lane.b32.xlu1 %v4055_v12, %s4198_s11  ;;  %v2884_v11 = vld [vmem:[#allocation1 + $0x383] ss:$8 sm:$0xf]   ;;  %1972 = vst.msk [vmem:[#allocation0 + $0x28] sm:$0xff] %vm1926_vm1, %v1969_v18   ;;  %v1942_v23 = vsel %vm1924_vm0, %v1940_v22, %v1938_v19  ;;  %v2713_v28 = vsel %vm1924_vm0, %v2711_v8, %v2709_v7 }
  0xb8   :  { %v2886_v12 = vld [vmem:[#allocation1 + $0x383] ss:$8 sm:$0xf0]   ;;  %v1974_v24 = vld [vmem:[#allocation1 + $0x180] ss:$8 sm:$0xf]   ;;  %v4060_v34 = vpack.i.bf16 %v2713_v28, %v2702_v27 }
  0xb9   :  { %v2888_v30 = vsel %vm1924_vm0, %v2886_v12, %v2884_v11  ;;  %2116 = vst.msk [vmem:[#allocation0 + $0x8] sm:$0xff] %vm2071_vm2, %v3928_v15   ;;  %v1976_v31 = vld [vmem:[#allocation1 + $0x180] ss:$8 sm:$0xf0]  }
  0xba   :  { %2127 = vst.msk [vmem:[#allocation0 + $0x28] sm:$0xff] %vm2071_vm2, %v3929_v17   ;;  %v1978_v33 = vsel %vm1924_vm0, %v1976_v31, %v1974_v24  ;;  %v2774_v38 = vld [vmem:[#allocation1 + $0x103] ss:$8 sm:$0xf]  }
  0xbb   :  { %1945 = vst.msk [vmem:[#allocation0 + $0x10] sm:$0xff] %vm1926_vm1, %v1942_v23   ;;  %v2776_v39 = vld [vmem:[#allocation1 + $0x103] ss:$8 sm:$0xf0]  }
  0xbc   :  { %v2939_v40 = vld [vmem:[#allocation1 + $0x2] ss:$8 sm:$0xf]   ;;  %1981 = vst.msk [vmem:[#allocation0 + $0x30] sm:$0xff] %vm1926_vm1, %v1978_v33   ;;  %v2778_v52 = vsel %vm1924_vm0, %v2776_v39, %v2774_v38 }
  0xbd   :  { %v2941_v41 = vld [vmem:[#allocation1 + $0x2] ss:$8 sm:$0xf0]   ;;  %v1992_v55 = vld [vmem:[#allocation1 + $0x200] ss:$8 sm:$0xf]  }
  0xbe   :  { %4096 = vrot.lane.b32.xlu0 %v4095_v29, %s4199_s23  ;;  %v2877_v29 = vsel %vm1924_vm0, %v2875_v10, %v2873_v9  ;;  %v2949_v42 = vld [vmem:[#allocation1 + $0x102] ss:$8 sm:$0xf]   ;;  %v2943_v53 = vsel %vm1924_vm0, %v2941_v41, %v2939_v40  ;;  %v1994_v57 = vld [vmem:[#allocation1 + $0x200] ss:$8 sm:$0xf0]  }
  0xbf   :  { %4031 = vrot.lane.b32.xlu2 %v4030_v36, %s4197_s0  ;;  %4071 = vrot.lane.b32.xlu1 %v4070_v37, %s4198_s11  ;;  %v4100_v35 = vpack.i.bf16 %v2888_v30, %v2877_v29  ;;  %v2764_v36 = vld [vmem:[#allocation1 + $0x3] ss:$8 sm:$0xf]   ;;  %v2951_v43 = vld [vmem:[#allocation1 + $0x102] ss:$8 sm:$0xf0]   ;;  %v1996_v2 = vsel %vm1924_vm0, %v1994_v57, %v1992_v55 }
  0xc0   :  { %v4524_v26 = vpop.permute.xlu1 %3931  ;;  %v2766_v37 = vld [vmem:[#allocation1 + $0x3] ss:$8 sm:$0xf0]   ;;  %v3048_v44 = vld [vmem:[#allocation1 + $0x282] ss:$8 sm:$0xf]   ;;  %v2953_v54 = vsel %vm1924_vm0, %v2951_v43, %v2949_v42 }
  0xc1   :  { %v3050_v45 = vld [vmem:[#allocation1 + $0x282] ss:$8 sm:$0xf0]   ;;  %v2768_v51 = vsel %vm1924_vm0, %v2766_v37, %v2764_v36  ;;  %v2028_v58 = vld [vmem:[#allocation1 + $0x300] ss:$8 sm:$0xf]   ;;  %v4115_v7 = vpack.i.bf16 %v2953_v54, %v2943_v53  ;;  %v3933_v14 = vunpack.i.l.bf16 %v4524_v26  ;;  %v3934_v26 = vunpack.i.h.bf16 %v4524_v26 }
  0xc2   :  { %v3059_v46 = vld [vmem:[#allocation1 + $0x382] ss:$8 sm:$0xf]   ;;  %v3052_v47 = vsel %vm1924_vm0, %v3050_v45, %v3048_v44  ;;  %v2829_v60 = vld [vmem:[#allocation1 + $0x243] ss:$8 sm:$0xf]   ;;  %v4075_v6 = vpack.i.bf16 %v2778_v52, %v2768_v51 }
  0xc3   :  { %v3061_v48 = vld [vmem:[#allocation1 + $0x382] ss:$8 sm:$0xf0]   ;;  %v2831_v61 = vld [vmem:[#allocation1 + $0x243] ss:$8 sm:$0xf0]  }
  0xc4   :  { %v3063_v49 = vsel %vm1924_vm0, %v3061_v48, %v3059_v46  ;;  %v2840_v62 = vld [vmem:[#allocation1 + $0x343] ss:$8 sm:$0xf]   ;;  %v3004_v0 = vld [vmem:[#allocation1 + $0x242] ss:$8 sm:$0xf]   ;;  %v2833_v18 = vsel %vm1924_vm0, %v2831_v61, %v2829_v60 }
  0xc5   :  { %v2842_v63 = vld [vmem:[#allocation1 + $0x343] ss:$8 sm:$0xf0]   ;;  %v3006_v1 = vld [vmem:[#allocation1 + $0x242] ss:$8 sm:$0xf0]  }
  0xc6   :  { %4111 = vrot.lane.b32.xlu0 %v4110_v56, %s4199_s23  ;;  %v4140_v56 = vpack.i.bf16 %v3063_v49, %v3052_v47  ;;  %v2001_v5 = vld [vmem:[#allocation1 + $0x240] ss:$8 sm:$0xf]   ;;  %v3015_v8 = vld [vmem:[#allocation1 + $0x342] ss:$8 sm:$0xf]   ;;  %v2844_v19 = vsel %vm1924_vm0, %v2842_v63, %v2840_v62  ;;  %v3008_v20 = vsel %vm1924_vm0, %v3006_v1, %v3004_v0 }
  0xc7   :  { %4046 = vrot.lane.b32.xlu2 %v4045_v3, %s4198_s11  ;;  %4086 = vrot.lane.b32.xlu1 %v4085_v4, %s4199_s23  ;;  %v3924_v3 = vunpack.i.h.bf16 %v4522_v25  ;;  %v2030_v4 = vld [vmem:[#allocation1 + $0x300] ss:$8 sm:$0xf0]   ;;  %v3017_v9 = vld [vmem:[#allocation1 + $0x342] ss:$8 sm:$0xf0]   ;;  %v4090_v33 = vpack.i.bf16 %v2844_v19, %v2833_v18 }
  0xc8   :  { %1999 = vst.msk [vmem:[#allocation0 + $0x40] sm:$0xff] %vm1926_vm1, %v1996_v2   ;;  %v2032_v10 = vsel %vm1924_vm0, %v2030_v4, %v2028_v58  ;;  %v2003_v11 = vld [vmem:[#allocation1 + $0x240] ss:$8 sm:$0xf0]   ;;  %v3019_v24 = vsel %vm1924_vm0, %v3017_v9, %v3015_v8 }
  0xc9   :  { %2035 = vst.msk [vmem:[#allocation0 + $0x60] sm:$0xff] %vm1926_vm1, %v2032_v10   ;;  %v2005_v12 = vsel %vm1924_vm0, %v2003_v11, %v2001_v5  ;;  %v2037_v13 = vld [vmem:[#allocation1 + $0x340] ss:$8 sm:$0xf]  }
  0xca   :  { %2094 = vst.msk [vmem:[#allocation0 + $0x40] sm:$0xff] %vm2071_vm2, %v3923_v59   ;;  %v2039_v15 = vld [vmem:[#allocation1 + $0x340] ss:$8 sm:$0xf0]  }
  0xcb   :  { %2105 = vst.msk [vmem:[#allocation0 + $0x60] sm:$0xff] %vm2071_vm2, %v3924_v3   ;;  %v2041_v16 = vsel %vm1924_vm0, %v2039_v15, %v2037_v13  ;;  %v2010_v17 = vld [vmem:[#allocation1 + $0x280] ss:$8 sm:$0xf]  }
  0xcc   :  { %2008 = vst.msk [vmem:[#allocation0 + $0x48] sm:$0xff] %vm1926_vm1, %v2005_v12   ;;  %v2012_v22 = vld [vmem:[#allocation1 + $0x280] ss:$8 sm:$0xf0]  }
  0xcd   :  { %2044 = vst.msk [vmem:[#allocation0 + $0x68] sm:$0xff] %vm1926_vm1, %v2041_v16   ;;  %v2046_v28 = vld [vmem:[#allocation1 + $0x380] ss:$8 sm:$0xf]  }
  0xce   :  { %4126 = vrot.lane.b32.xlu0 %v4125_v32, %s4200_s24  ;;  %2138 = vst.msk [vmem:[#allocation0 + $0x48] sm:$0xff] %vm2071_vm2, %v3933_v14   ;;  %v2048_v29 = vld [vmem:[#allocation1 + $0x380] ss:$8 sm:$0xf0]   ;;  %v2014_v32 = vsel %vm1924_vm0, %v2012_v22, %v2010_v17 }
  0xcf   :  { %4061 = vrot.lane.b32.xlu2 %v4060_v34, %s4198_s11  ;;  %4101 = vrot.lane.b32.xlu1 %v4100_v35, %s4199_s23  ;;  %v2895_v30 = vld [vmem:[#allocation1 + $0xc3] ss:$8 sm:$0xf]   ;;  %v4130_v34 = vpack.i.bf16 %v3019_v24, %v3008_v20  ;;  %v3070_v37 = vld [vmem:[#allocation1 + $0xc2] ss:$8 sm:$0xf]   ;;  %v2050_v39 = vsel %vm1924_vm0, %v2048_v29, %v2046_v28 }
  0xd0   :  { %v4540_v50 = vpop.permute.xlu0 %3946  ;;  %v2897_v31 = vld [vmem:[#allocation1 + $0xc3] ss:$8 sm:$0xf0]   ;;  %v3072_v38 = vld [vmem:[#allocation1 + $0xc2] ss:$8 sm:$0xf0]  }
  0xd1   :  { %v2906_v35 = vld [vmem:[#allocation1 + $0x1c3] ss:$8 sm:$0xf]   ;;  %v3081_v40 = vld [vmem:[#allocation1 + $0x1c2] ss:$8 sm:$0xf]   ;;  %v2899_v43 = vsel %vm1924_vm0, %v2897_v31, %v2895_v30  ;;  %v3074_v48 = vsel %vm1924_vm0, %v3072_v38, %v3070_v37  ;;  %v3949_v4 = vunpack.i.h.bf16 %v4540_v50  ;;  %v3948_v50 = vunpack.i.l.bf16 %v4540_v50 }
  0xd2   :  { %v2908_v36 = vld [vmem:[#allocation1 + $0x1c3] ss:$8 sm:$0xf0]   ;;  %2149 = vst.msk [vmem:[#allocation0 + $0x68] sm:$0xff] %vm2071_vm2, %v3934_v26  }
  0xd3   :  { %v3083_v41 = vld [vmem:[#allocation1 + $0x1c2] ss:$8 sm:$0xf0]   ;;  %2017 = vst.msk [vmem:[#allocation0 + $0x50] sm:$0xff] %vm1926_vm1, %v2014_v32   ;;  %v2910_v47 = vsel %vm1924_vm0, %v2908_v36, %v2906_v35 }
  0xd4   :  { %2053 = vst.msk [vmem:[#allocation0 + $0x70] sm:$0xff] %vm1926_vm1, %v2050_v39   ;;  %v3114_v42 = vld [vmem:[#allocation1 + $0x1] ss:$8 sm:$0xf]   ;;  %v3085_v49 = vsel %vm1924_vm0, %v3083_v41, %v3081_v40  ;;  %v4105_v58 = vpack.i.bf16 %v2910_v47, %v2899_v43 }
  0xd5   :  { %v3116_v44 = vld [vmem:[#allocation1 + $0x1] ss:$8 sm:$0xf0]   ;;  %v2960_v54 = vld [vmem:[#allocation1 + $0x202] ss:$8 sm:$0xf]   ;;  %v4145_v59 = vpack.i.bf16 %v3085_v49, %v3074_v48 }
  0xd6   :  { %4141 = vrot.lane.b32.xlu0 %v4140_v56, %s4200_s24  ;;  %v3124_v45 = vld [vmem:[#allocation1 + $0x101] ss:$8 sm:$0xf]   ;;  %v3118_v51 = vsel %vm1924_vm0, %v3116_v44, %v3114_v42  ;;  %v2962_v55 = vld [vmem:[#allocation1 + $0x202] ss:$8 sm:$0xf0]  }
  0xd7   :  { %4076 = vrot.lane.b32.xlu2 %v4075_v6, %s4199_s23  ;;  %4116 = vrot.lane.b32.xlu1 %v4115_v7, %s4200_s24  ;;  %v3126_v52 = vld [vmem:[#allocation1 + $0x101] ss:$8 sm:$0xf0]   ;;  %v1947_v57 = vld [vmem:[#allocation1 + $0xc0] ss:$8 sm:$0xf]   ;;  %v2964_v12 = vsel %vm1924_vm0, %v2962_v55, %v2960_v54 }
  0xd8   :  { %v3937_v21 = vpop.permute.xlu2 %3936  ;;  %v4564_v23 = vpop.permute.xlu0 %3961  ;;  %v3128_v53 = vsel %vm1924_vm0, %v3126_v52, %v3124_v45  ;;  %v2971_v60 = vld [vmem:[#allocation1 + $0x302] ss:$8 sm:$0xf]   ;;  %v3135_v62 = vld [vmem:[#allocation1 + $0x201] ss:$8 sm:$0xf]  }
  0xd9   :  { %v3939_v25 = vunpack.i.h.bf16 %v3937_v21  ;;  %v3938_v27 = vunpack.i.l.bf16 %v3937_v21  ;;  %v4155_v56 = vpack.i.bf16 %v3128_v53, %v3118_v51  ;;  %v2973_v61 = vld [vmem:[#allocation1 + $0x302] ss:$8 sm:$0xf0]   ;;  %v3137_v63 = vld [vmem:[#allocation1 + $0x201] ss:$8 sm:$0xf0]  }
  0xda   :  { %v3146_v0 = vld [vmem:[#allocation1 + $0x301] ss:$8 sm:$0xf]   ;;  %v1949_v2 = vld [vmem:[#allocation1 + $0xc0] ss:$8 sm:$0xf0]   ;;  %v2975_v16 = vsel %vm1924_vm0, %v2973_v61, %v2971_v60  ;;  %v3139_v17 = vsel %vm1924_vm0, %v3137_v63, %v3135_v62 }
  0xdb   :  { %2160 = vst.msk [vmem:[#allocation0 + $0x10] sm:$0xff] %vm2071_vm2, %v3938_v27   ;;  %v3148_v1 = vld [vmem:[#allocation1 + $0x301] ss:$8 sm:$0xf0]   ;;  %v1951_v5 = vsel %vm1924_vm0, %v1949_v2, %v1947_v57 }
  0xdc   :  { %2171 = vst.msk [vmem:[#allocation0 + $0x30] sm:$0xff] %vm2071_vm2, %v3939_v25   ;;  %v1983_v3 = vld [vmem:[#allocation1 + $0x1c0] ss:$8 sm:$0xf]   ;;  %v3150_v18 = vsel %vm1924_vm0, %v3148_v1, %v3146_v0  ;;  %v4120_v25 = vpack.i.bf16 %v2975_v16, %v2964_v12 }
  0xdd   :  { %v1985_v6 = vld [vmem:[#allocation1 + $0x1c0] ss:$8 sm:$0xf0]   ;;  %1954 = vst.msk [vmem:[#allocation0 + $0x18] sm:$0xff] %vm1926_vm1, %v1951_v5   ;;  %v4160_v27 = vpack.i.bf16 %v3150_v18, %v3139_v17 }
  0xde   :  { %4156 = vrot.lane.b32.xlu0 %v4155_v56, %s4201_s25  ;;  %v2019_v7 = vld [vmem:[#allocation1 + $0x2c0] ss:$8 sm:$0xf]   ;;  %v1987_v8 = vsel %vm1924_vm0, %v1985_v6, %v1983_v3  ;;  %2204 = vst.msk [vmem:[#allocation0 + $0x18] sm:$0xff] %vm2071_vm2, %v3948_v50  }
  0xdf   :  { %4091 = vrot.lane.b32.xlu2 %v4090_v33, %s4199_s23  ;;  %4131 = vrot.lane.b32.xlu1 %v4130_v34, %s4200_s24  ;;  %v2021_v9 = vld [vmem:[#allocation1 + $0x2c0] ss:$8 sm:$0xf0]   ;;  %1990 = vst.msk [vmem:[#allocation0 + $0x38] sm:$0xff] %vm1926_vm1, %v1987_v8   ;;  %v3963_v33 = vunpack.i.l.bf16 %v4564_v23  ;;  %v3964_v23 = vunpack.i.h.bf16 %v4564_v23 }
  0xe0   :  { %v4580_v46 = vpop.permute.xlu1 %3951  ;;  %v2023_v10 = vsel %vm1924_vm0, %v2021_v9, %v2019_v7  ;;  %v2055_v11 = vld [vmem:[#allocation1 + $0x3c0] ss:$8 sm:$0xf]   ;;  %2215 = vst.msk [vmem:[#allocation0 + $0x38] sm:$0xff] %vm2071_vm2, %v3949_v4  }
  0xe1   :  { %v3953_v13 = vunpack.i.l.bf16 %v4580_v46  ;;  %v2057_v14 = vld [vmem:[#allocation1 + $0x3c0] ss:$8 sm:$0xf0]   ;;  %2026 = vst.msk [vmem:[#allocation0 + $0x58] sm:$0xff] %vm1926_vm1, %v2023_v10   ;;  %v3954_v24 = vunpack.i.h.bf16 %v4580_v46 }
  0xe2   :  { %v2059_v19 = vsel %vm1924_vm0, %v2057_v14, %v2055_v11  ;;  %v3026_v26 = vld [vmem:[#allocation1 + $0x82] ss:$8 sm:$0xf]   ;;  %v3179_v31 = vld [vmem:[#allocation1 + $0x241] ss:$8 sm:$0xf]  }
  0xe3   :  { %2062 = vst.msk [vmem:[#allocation0 + $0x78] sm:$0xff] %vm1926_vm1, %v2059_v19   ;;  %v3028_v28 = vld [vmem:[#allocation1 + $0x82] ss:$8 sm:$0xf0]  }
  0xe4   :  { %2226 = vst.msk [vmem:[#allocation0 + $0x58] sm:$0xff] %vm2071_vm2, %v3953_v13   ;;  %v3037_v29 = vld [vmem:[#allocation1 + $0x182] ss:$8 sm:$0xf]   ;;  %v3030_v40 = vsel %vm1924_vm0, %v3028_v28, %v3026_v26 }
  0xe5   :  { %v3039_v30 = vld [vmem:[#allocation1 + $0x182] ss:$8 sm:$0xf0]   ;;  %v3181_v32 = vld [vmem:[#allocation1 + $0x241] ss:$8 sm:$0xf0]  }
  0xe6   :  { %2237 = vst.msk [vmem:[#allocation0 + $0x78] sm:$0xff] %vm2071_vm2, %v3954_v24   ;;  %v3183_v34 = vsel %vm1924_vm0, %v3181_v32, %v3179_v31  ;;  %v3190_v35 = vld [vmem:[#allocation1 + $0x341] ss:$8 sm:$0xf]   ;;  %v3041_v41 = vsel %vm1924_vm0, %v3039_v30, %v3037_v29 }
  0xe7   :  { %4106 = vrot.lane.b32.xlu2 %v4105_v58, %s4199_s23  ;;  %4146 = vrot.lane.b32.xlu1 %v4145_v59, %s4200_s24  ;;  %v3192_v36 = vld [vmem:[#allocation1 + $0x341] ss:$8 sm:$0xf0]   ;;  %2269 = vst.msk [vmem:[#allocation0 + $0x40] sm:$0xff] %vm2246_vm3, %v3963_v33   ;;  %v4135_v54 = vpack.i.bf16 %v3041_v41, %v3030_v40 }
  0xe8   :  { %v3967_v15 = vpop.permute.xlu1 %3966  ;;  %v3201_v37 = vld [vmem:[#allocation1 + $0x81] ss:$8 sm:$0xf]   ;;  %v3194_v42 = vsel %vm1924_vm0, %v3192_v36, %v3190_v35  ;;  %2280 = vst.msk [vmem:[#allocation0 + $0x60] sm:$0xff] %vm2246_vm3, %v3964_v23  }
  0xe9   :  { %v3942_v20 = vpop.permute.xlu2 %3941  ;;  %v3969_v38 = vunpack.i.h.bf16 %v3967_v15  ;;  %v3203_v43 = vld [vmem:[#allocation1 + $0x81] ss:$8 sm:$0xf0]   ;;  %v4170_v46 = vpack.i.bf16 %v3194_v42, %v3183_v34  ;;  %v3968_v53 = vunpack.i.l.bf16 %v3967_v15  ;;  %v3092_v56 = vld [vmem:[#allocation1 + $0x2c2] ss:$8 sm:$0xf]  }
  0xea   :  { %v3944_v21 = vunpack.i.h.bf16 %v3942_v20  ;;  %v3943_v22 = vunpack.i.l.bf16 %v3942_v20  ;;  %v3212_v44 = vld [vmem:[#allocation1 + $0x181] ss:$8 sm:$0xf]   ;;  %v3205_v47 = vsel %vm1924_vm0, %v3203_v43, %v3201_v37  ;;  %v3094_v57 = vld [vmem:[#allocation1 + $0x2c2] ss:$8 sm:$0xf0]  }
  0xeb   :  { %v3214_v48 = vld [vmem:[#allocation1 + $0x181] ss:$8 sm:$0xf0]   ;;  %4171 = vrot.lane.b32.xlu0 %v4170_v46, %s4201_s25  ;;  %2302 = vst.msk [vmem:[#allocation0 + $0x28] sm:$0xff] %vm2246_vm3, %v3969_v38   ;;  %v3096_v2 = vsel %vm1924_vm0, %v3094_v57, %v3092_v56 }
  0xec   :  { %2182 = vst.msk [vmem:[#allocation0 + $0x50] sm:$0xff] %vm2071_vm2, %v3943_v22   ;;  %v3216_v52 = vsel %vm1924_vm0, %v3214_v48, %v3212_v44  ;;  %v3103_v58 = vld [vmem:[#allocation1 + $0x3c2] ss:$8 sm:$0xf]  }
  0xed   :  { %2193 = vst.msk [vmem:[#allocation0 + $0x70] sm:$0xff] %vm2071_vm2, %v3944_v21   ;;  %v4175_v55 = vpack.i.bf16 %v3216_v52, %v3205_v47  ;;  %v3105_v59 = vld [vmem:[#allocation1 + $0x3c2] ss:$8 sm:$0xf0]  }
  0xee   :  { %2291 = vst.msk [vmem:[#allocation0 + $0x8] sm:$0xff] %vm2246_vm3, %v3968_v53   ;;  %v3245_v60 = vld [vmem:[#allocation1 + $0xc1] ss:$8 sm:$0xf]   ;;  %v3107_v3 = vsel %vm1924_vm0, %v3105_v59, %v3103_v58 }
  0xef   :  { %4121 = vrot.lane.b32.xlu2 %v4120_v25, %s4200_s24  ;;  %4161 = vrot.lane.b32.xlu1 %v4160_v27, %s4201_s25  ;;  %v3247_v62 = vld [vmem:[#allocation1 + $0xc1] ss:$8 sm:$0xf0]   ;;  %v4150_v16 = vpack.i.bf16 %v3107_v3, %v3096_v2 }
  0xf0   :  { %v3977_v39 = vpop.permute.xlu0 %3976  ;;  %v3256_v63 = vld [vmem:[#allocation1 + $0x1c1] ss:$8 sm:$0xf]   ;;  %v3249_v4 = vsel %vm1924_vm0, %v3247_v62, %v3245_v60 }
  0xf1   :  { %v3957_v45 = vpop.permute.xlu2 %3956  ;;  %v3979_v61 = vunpack.i.h.bf16 %v3977_v39  ;;  %v3978_v0 = vunpack.i.l.bf16 %v3977_v39  ;;  %v3258_v5 = vld [vmem:[#allocation1 + $0x1c1] ss:$8 sm:$0xf0]  }
  0xf2   :  { %v3959_v49 = vunpack.i.h.bf16 %v3957_v45  ;;  %v3958_v51 = vunpack.i.l.bf16 %v3957_v45  ;;  %v3267_v6 = vld [vmem:[#allocation1 + $0x2c1] ss:$8 sm:$0xf]   ;;  %v3260_v7 = vsel %vm1924_vm0, %v3258_v5, %v3256_v63 }
  0xf3   :  { %v3269_v8 = vld [vmem:[#allocation1 + $0x2c1] ss:$8 sm:$0xf0]   ;;  %v4185_v13 = vpack.i.bf16 %v3260_v7, %v3249_v4  ;;  %2346 = vst.msk [vmem:[#allocation0 + $0x30] sm:$0xff] %vm2246_vm3, %v3979_v61  }
  0xf4   :  { %2258 = vst.msk [vmem:[#allocation0 + $0x20] sm:$0xff] %vm2246_vm3, %v3959_v49   ;;  %v3278_v9 = vld [vmem:[#allocation1 + $0x3c1] ss:$8 sm:$0xf]   ;;  %v3271_v14 = vsel %vm1924_vm0, %v3269_v8, %v3267_v6 }
  0xf5   :  { %2247 = vst.msk [vmem:[#allocation0] sm:$0xff] %vm2246_vm3, %v3958_v51   ;;  %v3280_v15 = vld [vmem:[#allocation1 + $0x3c1] ss:$8 sm:$0xf0]   ;;  %4186 = vrot.lane.b32.xlu0 %v4185_v13, %s4201_s25 }
  0xf6   :  { %v3282_v17 = vsel %vm1924_vm0, %v3280_v15, %v3278_v9  ;;  %2335 = vst.msk [vmem:[#allocation0 + $0x10] sm:$0xff] %vm2246_vm3, %v3978_v0   ;;  %v3157_v18 = vld [vmem:[#allocation1 + $0x41] ss:$8 sm:$0xf]  }
  0xf7   :  { %4136 = vrot.lane.b32.xlu2 %v4135_v54, %s4200_s24  ;;  %4176 = vrot.lane.b32.xlu1 %v4175_v55, %s4201_s25  ;;  %v4190_v20 = vpack.i.bf16 %v3282_v17, %v3271_v14  ;;  %v3159_v21 = vld [vmem:[#allocation1 + $0x41] ss:$8 sm:$0xf0]  }
  0xf8   :  { %v3992_v1 = vpop.permute.xlu0 %3991  ;;  %v3168_v22 = vld [vmem:[#allocation1 + $0x141] ss:$8 sm:$0xf]   ;;  %v3161_v27 = vsel %vm1924_vm0, %v3159_v21, %v3157_v18 }
  0xf9   :  { %v3972_v50 = vpop.permute.xlu2 %3971  ;;  %v3993_v10 = vunpack.i.l.bf16 %v3992_v1  ;;  %v3994_v19 = vunpack.i.h.bf16 %v3992_v1  ;;  %v3170_v24 = vld [vmem:[#allocation1 + $0x141] ss:$8 sm:$0xf0]  }
  0xfa   :  { %v3974_v11 = vunpack.i.h.bf16 %v3972_v50  ;;  %v3973_v12 = vunpack.i.l.bf16 %v3972_v50  ;;  %v3172_v26 = vsel %vm1924_vm0, %v3170_v24, %v3168_v22  ;;  %v3223_v36 = vld [vmem:[#allocation1 + $0x281] ss:$8 sm:$0xf]  }
  0xfb   :  { %2401 = vst.msk [vmem:[#allocation0 + $0x58] sm:$0xff] %vm2246_vm3, %v3993_v10   ;;  %v4165_v23 = vpack.i.bf16 %v3172_v26, %v3161_v27  ;;  %v3225_v37 = vld [vmem:[#allocation1 + $0x281] ss:$8 sm:$0xf0]  }
  0xfc   :  { %2324 = vst.msk [vmem:[#allocation0 + $0x68] sm:$0xff] %vm2246_vm3, %v3974_v11   ;;  %v3234_v38 = vld [vmem:[#allocation1 + $0x381] ss:$8 sm:$0xf]   ;;  %v3227_v41 = vsel %vm1924_vm0, %v3225_v37, %v3223_v36 }
  0xfd   :  { %2313 = vst.msk [vmem:[#allocation0 + $0x48] sm:$0xff] %vm2246_vm3, %v3973_v12   ;;  %v3236_v39 = vld [vmem:[#allocation1 + $0x381] ss:$8 sm:$0xf0]  }
  0xfe   :  { %2412 = vst.msk [vmem:[#allocation0 + $0x78] sm:$0xff] %vm2246_vm3, %v3994_v19   ;;  %v3238_v42 = vsel %vm1924_vm0, %v3236_v39, %v3234_v38 }
  0xff   :  { %4151 = vrot.lane.b32.xlu2 %v4150_v16, %s4200_s24  ;;  %4191 = vrot.lane.b32.xlu1 %v4190_v20, %s4201_s25  ;;  %v4180_v52 = vpack.i.bf16 %v3238_v42, %v3227_v41 }
 0x100   :  { %v4007_v25 = vpop.permute.xlu0 %4006 }
 0x101   :  { %v4009_v28 = vunpack.i.h.bf16 %v4007_v25  ;;  %v4008_v29 = vunpack.i.l.bf16 %v4007_v25  ;;  %v3987_v30 = vpop.permute.xlu2 %3986  ;;  %v3982_v31 = vpop.permute.xlu1 %3981 }
 0x102   :  { %v3989_v32 = vunpack.i.h.bf16 %v3987_v30  ;;  %v3988_v33 = vunpack.i.l.bf16 %v3987_v30  ;;  %v3984_v34 = vunpack.i.h.bf16 %v3982_v31  ;;  %v3983_v35 = vunpack.i.l.bf16 %v3982_v31 }
 0x103   :  { %2466 = vst.msk [vmem:[#allocation0 + $0x8] sm:$0xff] %vm2421_vm4, %v4008_v29  }
 0x104   :  { %2477 = vst.msk [vmem:[#allocation0 + $0x28] sm:$0xff] %vm2421_vm4, %v4009_v28  }
 0x105   :  { %2390 = vst.msk [vmem:[#allocation0 + $0x38] sm:$0xff] %vm2246_vm3, %v3989_v32  }
 0x106   :  { %2379 = vst.msk [vmem:[#allocation0 + $0x18] sm:$0xff] %vm2246_vm3, %v3988_v33  }
 0x107   :  { %2368 = vst.msk [vmem:[#allocation0 + $0x70] sm:$0xff] %vm2246_vm3, %v3984_v34   ;;  %4166 = vrot.lane.b32.xlu2 %v4165_v23, %s4201_s25 }
 0x108   :  { %2357 = vst.msk [vmem:[#allocation0 + $0x50] sm:$0xff] %vm2246_vm3, %v3983_v35   ;;  %v4022_v40 = vpop.permute.xlu0 %4021 }
 0x109   :  { %v4024_v43 = vunpack.i.h.bf16 %v4022_v40  ;;  %v4023_v44 = vunpack.i.l.bf16 %v4022_v40  ;;  %v4002_v45 = vpop.permute.xlu2 %4001  ;;  %v3997_v46 = vpop.permute.xlu1 %3996 }
 0x10a   :  { %v4004_v47 = vunpack.i.h.bf16 %v4002_v45  ;;  %v4003_v48 = vunpack.i.l.bf16 %v4002_v45  ;;  %v3999_v49 = vunpack.i.h.bf16 %v3997_v46  ;;  %v3998_v51 = vunpack.i.l.bf16 %v3997_v46 }
 0x10b   :  { %2532 = vst.msk [vmem:[#allocation0 + $0x50] sm:$0xff] %vm2421_vm4, %v4023_v44  }
 0x10c   :  { %2543 = vst.msk [vmem:[#allocation0 + $0x70] sm:$0xff] %vm2421_vm4, %v4024_v43  }
 0x10d   :  { %2455 = vst.msk [vmem:[#allocation0 + $0x60] sm:$0xff] %vm2421_vm4, %v4004_v47  }
 0x10e   :  { %2444 = vst.msk [vmem:[#allocation0 + $0x40] sm:$0xff] %vm2421_vm4, %v4003_v48  }
 0x10f   :  { %2433 = vst.msk [vmem:[#allocation0 + $0x20] sm:$0xff] %vm2421_vm4, %v3999_v49   ;;  %4181 = vrot.lane.b32.xlu2 %v4180_v52, %s4201_s25 }
 0x110   :  { %2422 = vst.msk [vmem:[#allocation0] sm:$0xff] %vm2421_vm4, %v3998_v51   ;;  %v4037_v53 = vpop.permute.xlu0 %4036 }
 0x111   :  { %v4039_v54 = vunpack.i.h.bf16 %v4037_v53  ;;  %v4038_v55 = vunpack.i.l.bf16 %v4037_v53  ;;  %v4017_v56 = vpop.permute.xlu2 %4016  ;;  %v4012_v57 = vpop.permute.xlu1 %4011 }
 0x112   :  { %v4019_v58 = vunpack.i.h.bf16 %v4017_v56  ;;  %v4018_v59 = vunpack.i.l.bf16 %v4017_v56  ;;  %v4014_v60 = vunpack.i.h.bf16 %v4012_v57  ;;  %v4013_v61 = vunpack.i.l.bf16 %v4012_v57 }
 0x113   :  { %2597 = vst.msk [vmem:[#allocation0] sm:$0xff] %vm2596_vm5, %v4038_v55  }
 0x114   :  { %2608 = vst.msk [vmem:[#allocation0 + $0x20] sm:$0xff] %vm2596_vm5, %v4039_v54  }
 0x115   :  { %2521 = vst.msk [vmem:[#allocation0 + $0x30] sm:$0xff] %vm2421_vm4, %v4019_v58  }
 0x116   :  { %2510 = vst.msk [vmem:[#allocation0 + $0x10] sm:$0xff] %vm2421_vm4, %v4018_v59  }
 0x117   :  { %2499 = vst.msk [vmem:[#allocation0 + $0x68] sm:$0xff] %vm2421_vm4, %v4014_v60  }
 0x118   :  { %2488 = vst.msk [vmem:[#allocation0 + $0x48] sm:$0xff] %vm2421_vm4, %v4013_v61   ;;  %v4052_v62 = vpop.permute.xlu0 %4051 }
 0x119   :  { %v4054_v63 = vunpack.i.h.bf16 %v4052_v62  ;;  %v4053_v0 = vunpack.i.l.bf16 %v4052_v62  ;;  %v4032_v1 = vpop.permute.xlu2 %4031  ;;  %v4027_v2 = vpop.permute.xlu1 %4026 }
 0x11a   :  { %v4034_v3 = vunpack.i.h.bf16 %v4032_v1  ;;  %v4033_v4 = vunpack.i.l.bf16 %v4032_v1  ;;  %v4029_v5 = vunpack.i.h.bf16 %v4027_v2  ;;  %v4028_v6 = vunpack.i.l.bf16 %v4027_v2 }
 0x11b   :  { %2663 = vst.msk [vmem:[#allocation0 + $0x48] sm:$0xff] %vm2596_vm5, %v4053_v0  }
 0x11c   :  { %2674 = vst.msk [vmem:[#allocation0 + $0x68] sm:$0xff] %vm2596_vm5, %v4054_v63  }
 0x11d   :  { %2576 = vst.msk [vmem:[#allocation0 + $0x58] sm:$0xff] %vm2421_vm4, %v4033_v4  }
 0x11e   :  { %2587 = vst.msk [vmem:[#allocation0 + $0x78] sm:$0xff] %vm2421_vm4, %v4034_v3  }
 0x11f   :  { %2565 = vst.msk [vmem:[#allocation0 + $0x38] sm:$0xff] %vm2421_vm4, %v4029_v5  }
 0x120   :  { %2554 = vst.msk [vmem:[#allocation0 + $0x18] sm:$0xff] %vm2421_vm4, %v4028_v6   ;;  %v4067_v50 = vpop.permute.xlu0 %4066 }
 0x121   :  { %v4069_v7 = vunpack.i.h.bf16 %v4067_v50  ;;  %v4068_v8 = vunpack.i.l.bf16 %v4067_v50  ;;  %v4047_v9 = vpop.permute.xlu2 %4046  ;;  %v4042_v10 = vpop.permute.xlu1 %4041 }
 0x122   :  { %v4049_v11 = vunpack.i.h.bf16 %v4047_v9  ;;  %v4048_v12 = vunpack.i.l.bf16 %v4047_v9  ;;  %v4044_v13 = vunpack.i.h.bf16 %v4042_v10  ;;  %v4043_v14 = vunpack.i.l.bf16 %v4042_v10 }
 0x123   :  { %2729 = vst.msk [vmem:[#allocation0 + $0x18] sm:$0xff] %vm2596_vm5, %v4068_v8  }
 0x124   :  { %2740 = vst.msk [vmem:[#allocation0 + $0x38] sm:$0xff] %vm2596_vm5, %v4069_v7  }
 0x125   :  { %2641 = vst.msk [vmem:[#allocation0 + $0x8] sm:$0xff] %vm2596_vm5, %v4048_v12  }
 0x126   :  { %2652 = vst.msk [vmem:[#allocation0 + $0x28] sm:$0xff] %vm2596_vm5, %v4049_v11  }
 0x127   :  { %2630 = vst.msk [vmem:[#allocation0 + $0x60] sm:$0xff] %vm2596_vm5, %v4044_v13  }
 0x128   :  { %2619 = vst.msk [vmem:[#allocation0 + $0x40] sm:$0xff] %vm2596_vm5, %v4043_v14   ;;  %v4082_v15 = vpop.permute.xlu0 %4081 }
 0x129   :  { %v4084_v16 = vunpack.i.h.bf16 %v4082_v15  ;;  %v4083_v17 = vunpack.i.l.bf16 %v4082_v15  ;;  %v4062_v18 = vpop.permute.xlu2 %4061  ;;  %v4057_v19 = vpop.permute.xlu1 %4056 }
 0x12a   :  { %v4064_v20 = vunpack.i.h.bf16 %v4062_v18  ;;  %v4063_v21 = vunpack.i.l.bf16 %v4062_v18  ;;  %v4059_v22 = vunpack.i.h.bf16 %v4057_v19  ;;  %v4058_v24 = vunpack.i.l.bf16 %v4057_v19 }
 0x12b   :  { %2794 = vst.msk [vmem:[#allocation0 + $0x40] sm:$0xff] %vm2771_vm6, %v4083_v17  }
 0x12c   :  { %2805 = vst.msk [vmem:[#allocation0 + $0x60] sm:$0xff] %vm2771_vm6, %v4084_v16  }
 0x12d   :  { %2707 = vst.msk [vmem:[#allocation0 + $0x50] sm:$0xff] %vm2596_vm5, %v4063_v21  }
 0x12e   :  { %2718 = vst.msk [vmem:[#allocation0 + $0x70] sm:$0xff] %vm2596_vm5, %v4064_v20  }
 0x12f   :  { %2696 = vst.msk [vmem:[#allocation0 + $0x30] sm:$0xff] %vm2596_vm5, %v4059_v22  }
 0x130   :  { %2685 = vst.msk [vmem:[#allocation0 + $0x10] sm:$0xff] %vm2596_vm5, %v4058_v24   ;;  %v4097_v25 = vpop.permute.xlu0 %4096 }
 0x131   :  { %v4099_v27 = vunpack.i.h.bf16 %v4097_v25  ;;  %v4098_v26 = vunpack.i.l.bf16 %v4097_v25  ;;  %v4077_v28 = vpop.permute.xlu2 %4076  ;;  %v4072_v29 = vpop.permute.xlu1 %4071 }
 0x132   :  { %v4079_v30 = vunpack.i.h.bf16 %v4077_v28  ;;  %v4078_v31 = vunpack.i.l.bf16 %v4077_v28  ;;  %v4073_v32 = vunpack.i.l.bf16 %v4072_v29  ;;  %v4074_v33 = vunpack.i.h.bf16 %v4072_v29 }
 0x133   :  { %2860 = vst.msk [vmem:[#allocation0 + $0x10] sm:$0xff] %vm2771_vm6, %v4098_v26  }
 0x134   :  { %2871 = vst.msk [vmem:[#allocation0 + $0x30] sm:$0xff] %vm2771_vm6, %v4099_v27  }
 0x135   :  { %2772 = vst.msk [vmem:[#allocation0] sm:$0xff] %vm2771_vm6, %v4078_v31  }
 0x136   :  { %2783 = vst.msk [vmem:[#allocation0 + $0x20] sm:$0xff] %vm2771_vm6, %v4079_v30  }
 0x137   :  { %2751 = vst.msk [vmem:[#allocation0 + $0x58] sm:$0xff] %vm2596_vm5, %v4073_v32  }
 0x138   :  { %2762 = vst.msk [vmem:[#allocation0 + $0x78] sm:$0xff] %vm2596_vm5, %v4074_v33   ;;  %v4112_v34 = vpop.permute.xlu0 %4111 }
 0x139   :  { %v4114_v35 = vunpack.i.h.bf16 %v4112_v34  ;;  %v4113_v23 = vunpack.i.l.bf16 %v4112_v34  ;;  %v4092_v36 = vpop.permute.xlu2 %4091  ;;  %v4087_v37 = vpop.permute.xlu1 %4086 }
 0x13a   :  { %v4094_v38 = vunpack.i.h.bf16 %v4092_v36  ;;  %v4093_v39 = vunpack.i.l.bf16 %v4092_v36  ;;  %v4088_v40 = vunpack.i.l.bf16 %v4087_v37  ;;  %v4089_v41 = vunpack.i.h.bf16 %v4087_v37 }
 0x13b   :  { %2926 = vst.msk [vmem:[#allocation0 + $0x58] sm:$0xff] %vm2771_vm6, %v4113_v23  }
 0x13c   :  { %2937 = vst.msk [vmem:[#allocation0 + $0x78] sm:$0xff] %vm2771_vm6, %v4114_v35  }
 0x13d   :  { %2838 = vst.msk [vmem:[#allocation0 + $0x48] sm:$0xff] %vm2771_vm6, %v4093_v39  }
 0x13e   :  { %2849 = vst.msk [vmem:[#allocation0 + $0x68] sm:$0xff] %vm2771_vm6, %v4094_v38  }
 0x13f   :  { %2816 = vst.msk [vmem:[#allocation0 + $0x8] sm:$0xff] %vm2771_vm6, %v4088_v40  }
 0x140   :  { %2827 = vst.msk [vmem:[#allocation0 + $0x28] sm:$0xff] %vm2771_vm6, %v4089_v41   ;;  %v4127_v42 = vpop.permute.xlu0 %4126 }
 0x141   :  { %v4129_v43 = vunpack.i.h.bf16 %v4127_v42  ;;  %v4128_v44 = vunpack.i.l.bf16 %v4127_v42  ;;  %v4107_v45 = vpop.permute.xlu2 %4106  ;;  %v4102_v46 = vpop.permute.xlu1 %4101 }
 0x142   :  { %v4109_v47 = vunpack.i.h.bf16 %v4107_v45  ;;  %v4108_v48 = vunpack.i.l.bf16 %v4107_v45  ;;  %v4103_v49 = vunpack.i.l.bf16 %v4102_v46  ;;  %v4104_v51 = vunpack.i.h.bf16 %v4102_v46 }
 0x143   :  { %2991 = vst.msk [vmem:[#allocation0 + $0x8] sm:$0xff] %vm2946_vm7, %v4128_v44  }
 0x144   :  { %3002 = vst.msk [vmem:[#allocation0 + $0x28] sm:$0xff] %vm2946_vm7, %v4129_v43  }
 0x145   :  { %2904 = vst.msk [vmem:[#allocation0 + $0x18] sm:$0xff] %vm2771_vm6, %v4108_v48  }
 0x146   :  { %2915 = vst.msk [vmem:[#allocation0 + $0x38] sm:$0xff] %vm2771_vm6, %v4109_v47  }
 0x147   :  { %2882 = vst.msk [vmem:[#allocation0 + $0x50] sm:$0xff] %vm2771_vm6, %v4103_v49  }
 0x148   :  { %2893 = vst.msk [vmem:[#allocation0 + $0x70] sm:$0xff] %vm2771_vm6, %v4104_v51   ;;  %v4142_v52 = vpop.permute.xlu0 %4141 }
 0x149   :  { %v4144_v53 = vunpack.i.h.bf16 %v4142_v52  ;;  %v4143_v54 = vunpack.i.l.bf16 %v4142_v52  ;;  %v4122_v55 = vpop.permute.xlu2 %4121  ;;  %v4117_v56 = vpop.permute.xlu1 %4116 }
 0x14a   :  { %v4124_v57 = vunpack.i.h.bf16 %v4122_v55  ;;  %v4123_v58 = vunpack.i.l.bf16 %v4122_v55  ;;  %v4118_v59 = vunpack.i.l.bf16 %v4117_v56  ;;  %v4119_v60 = vunpack.i.h.bf16 %v4117_v56 }
 0x14b   :  { %3057 = vst.msk [vmem:[#allocation0 + $0x50] sm:$0xff] %vm2946_vm7, %v4143_v54  }
 0x14c   :  { %3068 = vst.msk [vmem:[#allocation0 + $0x70] sm:$0xff] %vm2946_vm7, %v4144_v53  }
 0x14d   :  { %2969 = vst.msk [vmem:[#allocation0 + $0x40] sm:$0xff] %vm2946_vm7, %v4123_v58  }
 0x14e   :  { %2980 = vst.msk [vmem:[#allocation0 + $0x60] sm:$0xff] %vm2946_vm7, %v4124_v57  }
 0x14f   :  { %2947 = vst.msk [vmem:[#allocation0] sm:$0xff] %vm2946_vm7, %v4118_v59  }
 0x150   :  { %2958 = vst.msk [vmem:[#allocation0 + $0x20] sm:$0xff] %vm2946_vm7, %v4119_v60   ;;  %v4157_v3 = vpop.permute.xlu0 %4156 }
 0x151   :  { %v4137_v61 = vpop.permute.xlu2 %4136  ;;  %v4132_v62 = vpop.permute.xlu1 %4131  ;;  %v4159_v4 = vunpack.i.h.bf16 %v4157_v3  ;;  %v4158_v5 = vunpack.i.l.bf16 %v4157_v3 }
 0x152   :  { %v4139_v63 = vunpack.i.h.bf16 %v4137_v61  ;;  %v4138_v0 = vunpack.i.l.bf16 %v4137_v61  ;;  %v4133_v1 = vunpack.i.l.bf16 %v4132_v62  ;;  %v4134_v2 = vunpack.i.h.bf16 %v4132_v62 }
 0x153   :  { %3122 = vst.msk [vmem:[#allocation0] sm:$0xff] %vm3121_vm8, %v4158_v5  }
 0x154   :  { %3035 = vst.msk [vmem:[#allocation0 + $0x10] sm:$0xff] %vm2946_vm7, %v4138_v0  }
 0x155   :  { %3046 = vst.msk [vmem:[#allocation0 + $0x30] sm:$0xff] %vm2946_vm7, %v4139_v63  }
 0x156   :  { %3013 = vst.msk [vmem:[#allocation0 + $0x48] sm:$0xff] %vm2946_vm7, %v4133_v1  }
 0x157   :  { %3024 = vst.msk [vmem:[#allocation0 + $0x68] sm:$0xff] %vm2946_vm7, %v4134_v2  }
 0x158   :  { %3133 = vst.msk [vmem:[#allocation0 + $0x20] sm:$0xff] %vm3121_vm8, %v4159_v4  }
 0x159   :  { %v4152_v6 = vpop.permute.xlu2 %4151  ;;  %v4147_v50 = vpop.permute.xlu1 %4146 }
 0x15a   :  { %v4154_v7 = vunpack.i.h.bf16 %v4152_v6  ;;  %v4153_v8 = vunpack.i.l.bf16 %v4152_v6  ;;  %v4148_v9 = vunpack.i.l.bf16 %v4147_v50  ;;  %v4149_v10 = vunpack.i.h.bf16 %v4147_v50  ;;  %v3290_v20 = vld [vmem:[#allocation0] sm:$0xff] }
 0x15c   :  { %3101 = vst.msk [vmem:[#allocation0 + $0x58] sm:$0xff] %vm2946_vm7, %v4153_v8  }
 0x15d   :  { %3112 = vst.msk [vmem:[#allocation0 + $0x78] sm:$0xff] %vm2946_vm7, %v4154_v7   ;;  %v4172_v17 = vpop.permute.xlu0 %4171 }
 0x15e   :  { %3079 = vst.msk [vmem:[#allocation0 + $0x18] sm:$0xff] %vm2946_vm7, %v4148_v9   ;;  %v4174_v18 = vunpack.i.h.bf16 %v4172_v17  ;;  %v4173_v19 = vunpack.i.l.bf16 %v4172_v17 }
 0x15f   :  { %3090 = vst.msk [vmem:[#allocation0 + $0x38] sm:$0xff] %vm2946_vm7, %v4149_v10   ;;  %v3317_v24 = vld [vmem:[#allocation0 + $0x20] sm:$0xff] }
 0x160   :  { %3188 = vst.msk [vmem:[#allocation0 + $0x48] sm:$0xff] %vm3121_vm8, %v4173_v19  }
 0x161   :  { %v4167_v11 = vpop.permute.xlu2 %4166  ;;  %v4162_v12 = vpop.permute.xlu1 %4161  ;;  %3199 = vst.msk [vmem:[#allocation0 + $0x68] sm:$0xff] %vm3121_vm8, %v4174_v18  }
 0x162   :  { %v4169_v13 = vunpack.i.h.bf16 %v4167_v11  ;;  %v4168_v14 = vunpack.i.l.bf16 %v4167_v11  ;;  %v4163_v15 = vunpack.i.l.bf16 %v4162_v12  ;;  %v4164_v16 = vunpack.i.h.bf16 %v4162_v12 }
 0x164   :  { %3166 = vst.msk [vmem:[#allocation0 + $0x8] sm:$0xff] %vm3121_vm8, %v4168_v14  }
 0x165   :  { %3177 = vst.msk [vmem:[#allocation0 + $0x28] sm:$0xff] %vm3121_vm8, %v4169_v13  }
 0x166   :  { %3144 = vst.msk [vmem:[#allocation0 + $0x40] sm:$0xff] %vm3121_vm8, %v4163_v15  }
 0x167   :  { %3155 = vst.msk [vmem:[#allocation0 + $0x60] sm:$0xff] %vm3121_vm8, %v4164_v16   ;;  %v4187_v33 = vpop.permute.xlu0 %4186  ;;  %v3352_v35 = vld [vmem:[#allocation0 + $0x48] sm:$0xff] }
 0x168   :  { %v3380_v36 = vld [vmem:[#allocation0 + $0x68] sm:$0xff]  ;;  %v4188_v38 = vunpack.i.l.bf16 %v4187_v33  ;;  %v4189_v40 = vunpack.i.h.bf16 %v4187_v33 }
 0x169   :  { %v4177_v21 = vpop.permute.xlu1 %4176  ;;  %v4182_v22 = vpop.permute.xlu2 %4181 }
 0x16a   :  { %v4179_v25 = vunpack.i.h.bf16 %v4177_v21  ;;  %v4178_v27 = vunpack.i.l.bf16 %v4177_v21  ;;  %v4183_v30 = vunpack.i.l.bf16 %v4182_v22  ;;  %v4184_v32 = vunpack.i.h.bf16 %v4182_v22  ;;  %3254 = vst.msk [vmem:[#allocation0 + $0x18] sm:$0xff] %vm3121_vm8, %v4188_v38  }
 0x16b   :  { %v3296_v26 = vld [vmem:[#allocation0 + $0x8] sm:$0xff]  ;;  %3265 = vst.msk [vmem:[#allocation0 + $0x38] sm:$0xff] %vm3121_vm8, %v4189_v40  }
 0x16c   :  { %v3324_v28 = vld [vmem:[#allocation0 + $0x28] sm:$0xff]  ;;  %v3801_v29 = vpack.c.bf16 %v3296_v26, %v3290_v20  ;;  %3210 = vst.msk [vmem:[#allocation0 + $0x10] sm:$0xff] %vm3121_vm8, %v4178_v27  }
 0x16d   :  { %v3811_v31 = vpack.c.bf16 %v3324_v28, %v3317_v24  ;;  %3221 = vst.msk [vmem:[#allocation0 + $0x30] sm:$0xff] %vm3121_vm8, %v4179_v25   ;;  %v3345_v34 = vld [vmem:[#allocation0 + $0x40] sm:$0xff] }
 0x16e   :  { %3802 = vst [vmem:[%s4761_s1] sm:$0xff] %v3801_v29   ;;  %v3373_v23 = vld [vmem:[#allocation0 + $0x60] sm:$0xff]  ;;  %v3821_v37 = vpack.c.bf16 %v3352_v35, %v3345_v34 }
 0x16f   :  { %3902 = vst [vmem:[%s4761_s1 + $0x10] sm:$0xff] %v3811_v31   ;;  %v3831_v39 = vpack.c.bf16 %v3380_v36, %v3373_v23 }
 0x170   :  { %3232 = vst.msk [vmem:[#allocation0 + $0x50] sm:$0xff] %vm3121_vm8, %v4183_v30  }
 0x171   :  { %3243 = vst.msk [vmem:[#allocation0 + $0x70] sm:$0xff] %vm3121_vm8, %v4184_v32   ;;  %v4192_v41 = vpop.permute.xlu1 %4191  ;;  %v3310_v46 = vld [vmem:[#allocation0 + $0x18] sm:$0xff] }
 0x172   :  { %3904 = vst [vmem:[%s4761_s1 + $0x20] sm:$0xff] %v3821_v37   ;;  %v4193_v42 = vunpack.i.l.bf16 %v4192_v41  ;;  %v4194_v43 = vunpack.i.h.bf16 %v4192_v41  ;;  %v3338_v51 = vld [vmem:[#allocation0 + $0x38] sm:$0xff] }
 0x173   :  { %3906 = vst [vmem:[%s4761_s1 + $0x30] sm:$0xff] %v3831_v39   ;;  %v3303_v44 = vld [vmem:[#allocation0 + $0x10] sm:$0xff] }
 0x174   :  { %3276 = vst.msk [vmem:[#allocation0 + $0x58] sm:$0xff] %vm3121_vm8, %v4193_v42   ;;  %v3331_v47 = vld [vmem:[#allocation0 + $0x30] sm:$0xff]  ;;  %v3806_v49 = vpack.c.bf16 %v3310_v46, %v3303_v44 }
 0x175   :  { %3287 = vst.msk [vmem:[#allocation0 + $0x78] sm:$0xff] %vm3121_vm8, %v4194_v43   ;;  %v3816_v52 = vpack.c.bf16 %v3338_v51, %v3331_v47 }
 0x176   :  { %3901 = vst [vmem:[%s4761_s1 + $0x8] sm:$0xff] %v3806_v49  }
 0x177   :  { %v3359_v45 = vld [vmem:[#allocation0 + $0x50] sm:$0xff]  ;;  %3903 = vst [vmem:[%s4761_s1 + $0x18] sm:$0xff] %v3816_v52  }
 0x178   :  { %v3387_v48 = vld [vmem:[#allocation0 + $0x70] sm:$0xff] }
 0x17b   :  { %v3366_v53 = vld [vmem:[#allocation0 + $0x58] sm:$0xff] }
 0x17c   :  { %v3826_v54 = vpack.c.bf16 %v3366_v53, %v3359_v45  ;;  %v3394_v55 = vld [vmem:[#allocation0 + $0x78] sm:$0xff] }
 0x17d   :  { %v3836_v56 = vpack.c.bf16 %v3394_v55, %v3387_v48 }
 0x17e   :  { %3905 = vst [vmem:[%s4761_s1 + $0x28] sm:$0xff] %v3826_v54  }
 0x17f   :  { %3907 = vst [vmem:[%s4761_s1 + $0x38] sm:$0xff] %v3836_v56  }

// kernel: a_call__.1
= control target key start
LH: loop header
LB: loop body
LE: loop exit
PB: predicated region body
PF: predicated region fallthrough
CT: control target
= control target key end

     0   :  { %s1117_s17 = smov 0   ;;  %s1261_s0 = inlined_call_operand.vmem [shape: f32[5,8,64], index: 0, kind: input, shape index: {}]   ;;  %s1262_s1 = inlined_call_operand.vmem [shape: f32[8,1], index: 1, kind: input, shape index: {}]   ;;  %s1263_s2 = inlined_call_operand.vmem [shape: f32[8,1], index: 2, kind: input, shape index: {}]   ;;  %s1264_s3 = inlined_call_operand.vmem [shape: bf16[64,128], index: 3, kind: input, shape index: {}]   ;;  %s1265_s4 = inlined_call_operand.vmem [shape: bf16[64,128], index: 4, kind: input, shape index: {}]   ;;  %s1266_s5 = inlined_call_operand.vmem [shape: bf16[64,128], index: 5, kind: input, shape index: {}]   ;;  %s1267_s6 = inlined_call_operand.vmem [shape: f32[1,128], index: 6, kind: input, shape index: {}, may-alias: {6,10}]   ;;  %s1268_s7 = inlined_call_operand.vmem [shape: bf16[128,128], index: 7, kind: input, shape index: {}]   ;;  %s1269_s8 = inlined_call_operand.vmem [shape: bf16[128,128], index: 8, kind: input, shape index: {}]   ;;  %s1270_s9 = inlined_call_operand.vmem [shape: bf16[128,128], index: 9, kind: input, shape index: {}]   ;;  %s1271_s10 = inlined_call_operand.vmem [shape: f32[1,128], index: 10, kind: input, shape index: {}, may-alias: {6,10}]   ;;  %s1272_s11 = inlined_call_operand.vmem [shape: f32[5,8,128], index: 11, kind: output, shape index: {}]  }
   0x1 LB: > { %s844_s18 = sadd.s32 4294967295, %s1054_s17   ;;  %p848_p0 = scmp.ge.s32.totalorder %s1054_s17, 1  ;;  %s1054_s17 = sphi %s1117_s17, %s21_s17  }
   0x2   : > { %p336_p1 = scmp.lt.s32.totalorder %s1054_s17, 6 }
   0x4   : > { %p337_p2 = pnand %p848_p0, %p336_p1 }
   0x5   : > { %p374_p3 = scmp.lt.s32.totalorder (!%p337_p2), %s844_s18, 4 }
   0x6   : > { %340 = sbr.rel (%p337_p2) target bundleno = 330 (0x14a), region = 64 }
   0xb   : > { %v1003_v0 = vld [vmem:[%s1264_s3 + $0x18] sm:$0xff]  ;;  %v1056_v2 = vmov 0   ;;  %v1002_v3 = vld [vmem:[%s1264_s3 + $0x10] sm:$0xff]  ;;  %s1274_s18 = smov (!%p374_p3, %s844_s18), 4  ;;  %v383_v5 = vld [vmem:[%s1262_s1] sm:$0xff]  ;;  %vm436_vm0 = vcmask 523264  }
   0xc   : > { %v1011_v1 = vld [vmem:[%s1266_s5 + $0x18] sm:$0xff]  ;;  %1045 = vset.pattern.permute.xlu0 %v1056_v2  ;;  %444 = vmatpush.bf16.msra.mxu2 %v1003_v0  ;;  %v1010_v4 = vld [vmem:[%s1266_s5 + $0x10] sm:$0xff]  ;;  %s849_s27 = sshll.u32 %s1274_s18, 3  ;;  %v1001_v8 = vld [vmem:[%s1264_s3 + $0x8] sm:$0xff] }
   0xd   : > { %481 = vmatpush.bf16.msra.mxu1 %v1011_v1  ;;  %v1019_v6 = vld [vmem:[%s1268_s7 + $0x38] sm:$0xff]  ;;  %493 = vperm.xlu0 %1045, %v383_v5   ;;  %v1009_v9 = vld [vmem:[%s1266_s5 + $0x8] sm:$0xff]  ;;  %v1018_v10 = vld [vmem:[%s1268_s7 + $0x30] sm:$0xff]  ;;  %s377_s25 = scalar_lea.vmem %s1261_s0, %s849_s27  ;;  %s381_s24 = scalar_lea.vmem %s1272_s11, %s849_s27 }
   0xe   : > { %v1035_v7 = vld [vmem:[%s1270_s9 + $0x38] sm:$0xff]  ;;  %645 = vmatpush.bf16.msra.mxu3 %v1019_v6  ;;  %v1034_v11 = vld [vmem:[%s1270_s9 + $0x30] sm:$0xff]  ;;  %v1000_v12 = vld [vmem:[%s1264_s3] sm:$0xff] }
   0xf   : > { %706 = vmatpush.bf16.msra.mxu0 %v1035_v7  ;;  %v385_v13 = vld [vmem:[%s377_s25] sm:$0xff]  ;;  %v1007_v15 = vld [vmem:[%s1265_s4 + $0x18] sm:$0xff]  ;;  %v1006_v19 = vld [vmem:[%s1265_s4 + $0x10] sm:$0xff] }
  0x10   : > { %445 = vmatpush.bf16.msra.mxu2 %v1002_v3  ;;  %v384_v14 = vld [vmem:[%s1263_s2] sm:$0xff]  ;;  %v1027_v17 = vld [vmem:[%s1269_s8 + $0x38] sm:$0xff]  ;;  %v386_v18 = vpack.c.bf16 %v385_v13, %v385_v13  ;;  %v1026_v20 = vld [vmem:[%s1269_s8 + $0x30] sm:$0xff] }
  0x11   : > { %482 = vmatpush.bf16.msra.mxu1 %v1010_v4  ;;  %v1008_v16 = vld [vmem:[%s1266_s5] sm:$0xff]  ;;  %v1005_v21 = vld [vmem:[%s1265_s4 + $0x8] sm:$0xff]  ;;  %v1015_v29 = vld [vmem:[%s1268_s7 + $0x18] sm:$0xff] }
  0x12   : > { %646 = vmatpush.bf16.msra.mxu3 %v1018_v10  ;;  %v1004_v22 = vld [vmem:[%s1265_s4] sm:$0xff]  ;;  %v1017_v23 = vld [vmem:[%s1268_s7 + $0x28] sm:$0xff]  ;;  %v1031_v30 = vld [vmem:[%s1270_s9 + $0x18] sm:$0xff] }
  0x13   : > { %707 = vmatpush.bf16.msra.mxu0 %v1034_v11  ;;  %v1033_v24 = vld [vmem:[%s1270_s9 + $0x28] sm:$0xff]  ;;  %v1016_v26 = vld [vmem:[%s1268_s7 + $0x20] sm:$0xff]  ;;  %v1023_v31 = vld [vmem:[%s1269_s8 + $0x18] sm:$0xff] }
  0x14   : > { %446 = vmatpush.bf16.msra.mxu2 %v1001_v8  ;;  %v1025_v25 = vld [vmem:[%s1269_s8 + $0x28] sm:$0xff]  ;;  %v1032_v27 = vld [vmem:[%s1270_s9 + $0x20] sm:$0xff]  ;;  %v1014_v32 = vld [vmem:[%s1268_s7 + $0x10] sm:$0xff] }
  0x15   : > { %483 = vmatpush.bf16.msra.mxu1 %v1009_v9  ;;  %537 = vperm.xlu0 %1045, %v384_v14   ;;  %v1024_v28 = vld [vmem:[%s1269_s8 + $0x20] sm:$0xff]  ;;  %v1030_v33 = vld [vmem:[%s1270_s9 + $0x10] sm:$0xff]  ;;  %v1013_v35 = vld [vmem:[%s1268_s7 + $0x8] sm:$0xff] }
  0x16   : > { %647 = vmatpush.bf16.msra.mxu3 %v1017_v23  ;;  %v1022_v34 = vld [vmem:[%s1269_s8 + $0x10] sm:$0xff]  ;;  %v1029_v36 = vld [vmem:[%s1270_s9 + $0x8] sm:$0xff]  ;;  %v1012_v38 = vld [vmem:[%s1268_s7] sm:$0xff] }
  0x17   : > { %708 = vmatpush.bf16.msra.mxu0 %v1033_v24  ;;  %v1021_v37 = vld [vmem:[%s1269_s8 + $0x8] sm:$0xff]  ;;  %v1028_v39 = vld [vmem:[%s1270_s9] sm:$0xff] }
  0x18   : > { %447 = vmatpush.bf16.msra.mxu2 %v1000_v12  ;;  %v1020_v40 = vld [vmem:[%s1269_s8] sm:$0xff] }
  0x19   : > { %484 = vmatpush.bf16.msra.mxu1 %v1008_v16  ;;  %v1046_v53 = vld [vmem:[%s1267_s6] ss:$0 sm:$0xff] }
  0x1a   : > { %648 = vmatpush.bf16.msra.mxu3 %v1016_v26  ;;  %v1047_v5 = vld [vmem:[%s1271_s10] ss:$0 sm:$0xff] }
  0x1b   : > { %867 = vmatmul.msk.bf16.vlgmr.msra.gmra.mxu2 %vm436_vm0, %v386_v18  ;;  %709 = vmatpush.bf16.msra.mxu0 %v1032_v27 }
  0x1c   : > { %525 = vmatpush.bf16.msrb.mxu2 %v1007_v15  ;;  %884 = vmatmul.msk.bf16.vlgmr.msra.gmra.mxu1 %vm436_vm0, %v386_v18 }
  0x1d   : > { %769 = vmatpush.bf16.msrb.mxu1 %v1027_v17 }
  0x1e   : > { %649 = vmatpush.bf16.msra.mxu3 %v1015_v29 }
  0x1f   : > { %710 = vmatpush.bf16.msra.mxu0 %v1031_v30 }
  0x20   : > { %526 = vmatpush.bf16.msrb.mxu2 %v1006_v19 }
  0x21   : > { %770 = vmatpush.bf16.msrb.mxu1 %v1026_v20 }
  0x22   : > { %650 = vmatpush.bf16.msra.mxu3 %v1014_v32 }
  0x23   : > { %711 = vmatpush.bf16.msra.mxu0 %v1030_v33 }
  0x24   : > { %527 = vmatpush.bf16.msrb.mxu2 %v1005_v21 }
  0x25   : > { %771 = vmatpush.bf16.msrb.mxu1 %v1025_v25 }
  0x26   : > { %651 = vmatpush.bf16.msra.mxu3 %v1013_v35 }
  0x27   : > { %712 = vmatpush.bf16.msra.mxu0 %v1029_v36 }
  0x28   : > { %528 = vmatpush.bf16.msrb.mxu2 %v1004_v22 }
  0x29   : > { %772 = vmatpush.bf16.msrb.mxu1 %v1024_v28 }
  0x2a   : > { %652 = vmatpush.bf16.msra.mxu3 %v1012_v38 }
  0x2b   : > { %901 = vmatmul.msk.bf16.vlgmr.msrb.gmra.mxu2 %vm436_vm0, %v386_v18  ;;  %713 = vmatpush.bf16.msra.mxu0 %v1028_v39 }
  0x2d   : > { %773 = vmatpush.bf16.msrb.mxu1 %v1023_v31 }
  0x31   : > { %774 = vmatpush.bf16.msrb.mxu1 %v1022_v34 }
  0x35   : > { %775 = vmatpush.bf16.msrb.mxu1 %v1021_v37 }
  0x39   : > { %776 = vmatpush.bf16.msrb.mxu1 %v1020_v40 }
  0x7f   : > { %v494_v44 = vpop.permute.xlu0 %493 }
  0x87   : > { %v538_v48 = vpop.permute.xlu0 %537 }
  0x99   : > { %v486_v41 = vpop.f32.mrf.mxu1 }
  0x9a   : > { %v534_v47 = vrot.slane %v486_v41, 1 }
  0x9c   : > { %v540_v51 = vmul.f32 %v538_v48, %v534_v47 }
  0x9e   : > { %v449_v42 = vpop.f32.mrf.mxu2 }
  0x9f   : > { %v490_v46 = vrot.slane %v449_v42, 7 }
  0xa1   : > { %v488_v43 = vpop.f32.mrf.mxu1  ;;  %v496_v49 = vmul.f32 %v494_v44, %v490_v46 }
  0xa6   : > { %v451_v45 = vpop.f32.mrf.mxu2 }
  0xae   : > { %v530_v50 = vpop.f32.mrf.mxu2 }
  0xaf   : > { %v531_v52 = vadd.f32 %v530_v50, %v496_v49 }
  0xb1   : > { %v541_v54 = vadd.f32 %v540_v51, %v531_v52 }
  0xb3   : > { %v545_v55 = vadd.f32 %v1046_v53, %v541_v54 }
  0xb5   : > { %v546_v56 = vmax.f32 %v545_v55, 0.0 }
  0xb6   : > { %v532_v57 = vpop.f32.mrf.mxu2 }
  0xb7   : > { %v547_v58 = vpack.c.bf16 %v546_v56, %v546_v56 }
  0xb9   : > { %653 = vmatmul.bf16.vlgmr.msra.gmra.mxu3 %v547_v58  ;;  %714 = vmatmul.bf16.vlgmr.msra.gmra.mxu0 %v547_v58 }
  0xba   : > { %777 = vmatmul.bf16.vlgmr.msrb.gmra.mxu1 %v547_v58 }
 0x136   : > { %v715_v59 = vpop.f32.mrf.mxu0 }
 0x137   : > { %v778_v60 = vpop.f32.mrf.mxu1  ;;  %v782_v62 = vrot.slane %v715_v59, 1 }
 0x139   : > { %v783_v3 = vmul.f32 %v782_v62, %v538_v48 }
 0x13c   : > { %v654_v61 = vpop.f32.mrf.mxu3 }
 0x13d   : > { %v719_v63 = vrot.slane %v654_v61, 7 }
 0x13e   : > { %v717_v0 = vpop.f32.mrf.mxu0 }
 0x13f   : > { %v720_v1 = vmul.f32 %v719_v63, %v494_v44  ;;  %v780_v2 = vpop.f32.mrf.mxu1 }
 0x141   : > { %v779_v4 = vadd.f32 %v778_v60, %v720_v1 }
 0x143   : > { %v784_v6 = vadd.f32 %v783_v3, %v779_v4 }
 0x144   : > { %v656_v7 = vpop.f32.mrf.mxu3 }
 0x145   : > { %v788_v8 = vadd.f32 %v1047_v5, %v784_v6 }
 0x147   : > { %v789_v9 = vmax.f32 %v788_v8, 0.0 }
 0x149   : > { %790 = vst [vmem:[%s381_s24] sm:$0xff] %v789_v9 }
 0x14a PF: > { %s21_s17 = sadd.s32 1, %s1054_s17  }
 0x14b   : > { %p18_p4 = scmp.ge.s32.totalorder %s21_s17, 7  }
 0x14d   :  { %20 = sbr.rel (!%p18_p4) target bundleno = 1 (0x1), region = 94 }

</bundles_post_ra>
